<compile_context>
chip_gen: v7x
topology: tpu7x:2x2x1
jax: 0.10.0
libtpu: 0.0.40
codegen_flags: <defaults>
</compile_context>

<pallas_src>
import functools

import jax
import jax.numpy as jnp
from jax import lax
from jax.experimental import pallas as pl
from jax.experimental.pallas import tpu as pltpu

BN_EPS = 1e-5
VMEM_LIMIT_BYTES = 32 * 1024 * 1024   # safe scoped-VMEM limit on v5e/v6e/v7x


# -----------------------------------------------------------------------------
# Fused kernel: cv1 (1x1) -> n x [3x3 -> 3x3 (+res)] -> cv2 (1x1 over concat).
# One grid step == one image; everything stays in VMEM between stages.
# -----------------------------------------------------------------------------
def _c3k2_kernel(*refs, n, use_residual):
    x_ref = refs[0]
    cv1 = refs[1:7]                                   # w0,s0,b0,w1,s1,b1
    blk_refs = refs[7:7 + 6 * n]                      # n x (w1,s1,b1,w2,s2,b2)
    cv2_w_ref, cv2_s_ref, cv2_b_ref = refs[7 + 6 * n:10 + 6 * n]
    o_ref = refs[10 + 6 * n]
    pad_a, pad_b = refs[11 + 6 * n], refs[12 + 6 * n]

    H, W = o_ref.shape[1], o_ref.shape[2]
    x = x_ref[0]                                      # (H, W, C1), channels on lanes

    def silu(v):
        return v * jax.nn.sigmoid(v)

    def cbs1x1(v, w_ref, s_ref, b_ref):
        y = jnp.dot(v, w_ref[...], preferred_element_type=jnp.float32)
        return silu(y * s_ref[...] + b_ref[...])      # folded eval-mode BatchNorm

    def zero_halo(pad_ref):
        # Only the 1-pixel halo; the interior is fully overwritten every use.
        C = pad_ref.shape[-1]
        pad_ref[0:1, :, :] = jnp.zeros((1, W + 2, C), jnp.float32)
        pad_ref[H + 1:H + 2, :, :] = jnp.zeros((1, W + 2, C), jnp.float32)
        pad_ref[1:H + 1, 0:1, :] = jnp.zeros((H, 1, C), jnp.float32)
        pad_ref[1:H + 1, W + 1:W + 2, :] = jnp.zeros((H, 1, C), jnp.float32)

    zero_halo(pad_a)
    zero_halo(pad_b)

    def conv3x3(v, pad_ref, w_ref, s_ref, b_ref):
        # SAME padding via the haloed scratch; 9 accumulating dots over the
        # shifted windows (no im2col lane-concatenate).
        Cout = w_ref.shape[-1]
        pad_ref[1:H + 1, 1:W + 1, :] = v
        acc = jnp.zeros((H, W, Cout), jnp.float32)
        for kh in range(3):
            for kw in range(3):
                acc = acc + jnp.dot(pad_ref[kh:kh + H, kw:kw + W, :],
                                    w_ref[kh * 3 + kw],
                                    preferred_element_type=jnp.float32)
        return silu(acc * s_ref[...] + b_ref[...])

    # cv1 with the channel "chunk" fused: two dots against pre-split halves.
    y0 = cbs1x1(x, cv1[0], cv1[1], cv1[2])            # (H, W, c)
    y1 = cbs1x1(x, cv1[3], cv1[4], cv1[5])            # (H, W, c)

    ys = [y0, y1]
    prev = y1
    for i in range(n):
        w1, s1, b1, w2, s2, b2 = blk_refs[6 * i:6 * i + 6]
        z = conv3x3(prev, pad_a, w1, s1, b1)          # (H, W, c_)
        z = conv3x3(z, pad_b, w2, s2, b2)             # (H, W, c)
        prev = prev + z if use_residual else z
        ys.append(prev)

    # cv2 over the fused channel concat: sum of partial dots vs. weight groups.
    C2 = cv2_w_ref.shape[-1]
    acc = jnp.zeros((H, W, C2), jnp.float32)
    for g in range(len(ys)):
        acc = acc + jnp.dot(ys[g], cv2_w_ref[g], preferred_element_type=jnp.float32)
    out = silu(acc * cv2_s_ref[...] + cv2_b_ref[...])
    o_ref[0] = out.astype(o_ref.dtype)


def c3k2_fused(x_nhwc, packed, use_residual):
    B, H, W, C1 = x_nhwc.shape
    blocks = packed["blocks"]
    n = len(blocks)
    assert n >= 1
    c = packed["cv1_w0"].shape[1]
    c_ = blocks[0]["w1"].shape[2]
    C2 = packed["cv2_w"].shape[2]
    assert packed["cv2_w"].shape[0] == 2 + n and packed["cv2_w"].shape[1] == c

    args = [x_nhwc,
            packed["cv1_w0"], packed["cv1_s0"], packed["cv1_b0"],
            packed["cv1_w1"], packed["cv1_s1"], packed["cv1_b1"]]
    for blk in blocks:
        args += [blk["w1"], blk["s1"], blk["b1"], blk["w2"], blk["s2"], blk["b2"]]
    args += [packed["cv2_w"], packed["cv2_s"], packed["cv2_b"]]

    def full_spec(a):
        nd = a.ndim
        return pl.BlockSpec(a.shape, lambda b, _nd=nd: (0,) * _nd)

    in_specs = [pl.BlockSpec((1, H, W, C1), lambda b: (b, 0, 0, 0))]
    in_specs += [full_spec(a) for a in args[1:]]

    kernel = functools.partial(_c3k2_kernel, n=n, use_residual=use_residual)

    return pl.pallas_call(
        kernel,
        out_shape=jax.ShapeDtypeStruct((B, H, W, C2), x_nhwc.dtype),
        grid_spec=pltpu.PrefetchScalarGridSpec(
            num_scalar_prefetch=0,
            grid=(B,),                                # >=2 shards for v7x megacore
            in_specs=in_specs,
            out_specs=pl.BlockSpec((1, H, W, C2), lambda b: (b, 0, 0, 0)),
            scratch_shapes=[
                pltpu.VMEM((H + 2, W + 2, c), jnp.float32),    # padded conv1 input
                pltpu.VMEM((H + 2, W + 2, c_), jnp.float32),   # padded conv2 input
            ],
        ),
        compiler_params=pltpu.CompilerParams(
            dimension_semantics=("parallel",),
            vmem_limit_bytes=VMEM_LIMIT_BYTES),
    )(*args)


# -----------------------------------------------------------------------------
# Full C3K2 forward (c3k=False path, matching the PyTorch module).
# -----------------------------------------------------------------------------
@functools.partial(jax.jit, static_argnames=("use_residual",))
def c3k2_forward(x_nchw, packed, use_residual=True):
    x = jnp.transpose(x_nchw, (0, 2, 3, 1))           # NCHW -> NHWC once
    out = c3k2_fused(x, packed, use_residual)
    return jnp.transpose(out, (0, 3, 1, 2))           # NHWC -> NCHW once


# -----------------------------------------------------------------------------
# Parameters (synthetic, deterministic) + packing for the kernel.
# -----------------------------------------------------------------------------
def _init_conv(key, cin, cout, k):
    kw, kg, kb, km, kv = jax.random.split(key, 5)
    std = 1.0 / jnp.sqrt(jnp.float32(cin * k * k))
    return {
        "w": jax.random.normal(kw, (cout, cin, k, k), jnp.float32) * std,  # OIHW
        "gamma": 1.0 + 0.1 * jax.random.normal(kg, (cout,), jnp.float32),
        "beta": 0.1 * jax.random.normal(kb, (cout,), jnp.float32),
        "mean": 0.1 * jax.random.normal(km, (cout,), jnp.float32),
        "var": jax.random.uniform(kv, (cout,), jnp.float32, 0.5, 1.5),
    }


def init_c3k2_params(key, c1, c2, n=1, e=0.5, shortcut=True):
    c = int(c2 * e)
    keys = jax.random.split(key, 2 + 2 * n)
    raw = {
        "cv1": _init_conv(keys[0], c1, 2 * c, 1),
        "cv2": _init_conv(keys[1], (2 + n) * c, c2, 1),
        "blocks": [],
        "use_residual": bool(shortcut),     # chin == chout inside these bottlenecks
    }
    c_ = int(c * 0.5)                       # BottleNeckBlock default e = 0.5
    for i in range(n):
        raw["blocks"].append({
            "conv1": _init_conv(keys[2 + 2 * i], c, c_, 3),
            "conv2": _init_conv(keys[3 + 2 * i], c_, c, 3),
        })
    return raw


def pack_params(raw):
    def fold(p):
        scale = p["gamma"] / jnp.sqrt(p["var"] + BN_EPS)
        shift = p["beta"] - p["mean"] * scale
        return scale.reshape(1, -1), shift.reshape(1, -1)

    def w1x1(w):                            # OIHW (O,I,1,1) -> (I, O)
        return jnp.transpose(w[:, :, 0, 0], (1, 0))

    def w3x3(w):                            # OIHW -> (kh,kw,I,O) -> (9, I, O)
        cout, cin = w.shape[0], w.shape[1]
        return jnp.transpose(w, (2, 3, 1, 0)).reshape(9, cin, cout)

    # cv1: pre-split into the two chunk halves -> no in-kernel channel slice.
    w_cv1 = w1x1(raw["cv1"]["w"])
    s_cv1, b_cv1 = fold(raw["cv1"])
    c = w_cv1.shape[1] // 2
    # cv2: weight groups stacked on a leading dim -> fused concat via g-indexing.
    w_cv2 = w1x1(raw["cv2"]["w"])
    n_groups = w_cv2.shape[0] // c
    s_cv2, b_cv2 = fold(raw["cv2"])

    packed = {
        "cv1_w0": w_cv1[:, :c], "cv1_s0": s_cv1[:, :c], "cv1_b0": b_cv1[:, :c],
        "cv1_w1": w_cv1[:, c:], "cv1_s1": s_cv1[:, c:], "cv1_b1": b_cv1[:, c:],
        "cv2_w": w_cv2.reshape(n_groups, c, w_cv2.shape[1]),
        "cv2_s": s_cv2, "cv2_b": b_cv2,
        "blocks": [],
    }
    for blk in raw["blocks"]:
        sa, ba = fold(blk["conv1"])
        sb, bb = fold(blk["conv2"])
        packed["blocks"].append({
            "w1": w3x3(blk["conv1"]["w"]), "s1": sa, "b1": ba,
            "w2": w3x3(blk["conv2"]["w"]), "s2": sb, "b2": bb,
        })
    return packed


# -----------------------------------------------------------------------------
# Plain-JAX reference (NCHW, eval-mode BN) with identical semantics.
# -----------------------------------------------------------------------------
def reference_forward(x, raw, use_residual):
    def cbs(x, p, pad):
        y = lax.conv_general_dilated(
            x, p["w"], (1, 1), ((pad, pad), (pad, pad)),
            dimension_numbers=("NCHW", "OIHW", "NCHW"))
        scale = p["gamma"] / jnp.sqrt(p["var"] + BN_EPS)
        shift = p["beta"] - p["mean"] * scale
        y = y * scale[None, :, None, None] + shift[None, :, None, None]
        return y * jax.nn.sigmoid(y)

    t = cbs(x, raw["cv1"], 0)
    c = t.shape[1] // 2
    ys = [t[:, :c], t[:, c:]]
    for blk in raw["blocks"]:
        h = cbs(ys[-1], blk["conv1"], 1)
        h = cbs(h, blk["conv2"], 1)
        ys.append(ys[-1] + h if use_residual else h)
    return cbs(jnp.concatenate(ys, axis=1), raw["cv2"], 0)


if __name__ == "__main__":
    key = jax.random.PRNGKey(0)
    kx, kp = jax.random.split(key)

    # C3K2Block(c1=16, c2=16, n=1, c3k=False, e=0.5, shortcut=True)
    B, C, H, W = 2, 16, 16, 16
    x = jax.random.normal(kx, (B, C, H, W), jnp.float32)

    raw = init_c3k2_params(kp, c1=C, c2=C, n=1, e=0.5, shortcut=True)
    packed = pack_params(raw)

    out = c3k2_forward(x, packed, use_residual=raw["use_residual"])
    out = jax.block_until_ready(out)

    ref = reference_forward(x, raw, raw["use_residual"])
    assert out.shape == ref.shape == (B, C, H, W)
    max_err = float(jnp.max(jnp.abs(out - ref)))
    assert max_err < 2e-3, f"max abs diff = {max_err}"

    print("KERNEL_OK")
</pallas_src>

<mosaic_0001>
module attributes {stable_mosaic.version = 11 : i64} {
  func.func @_c3k2_kernel(%arg0: i32, %arg1: memref<1x16x16x16xf32, #tpu.memory_space<vmem>>, %arg2: memref<16x8xf32, #tpu.memory_space<vmem>>, %arg3: memref<1x8xf32, #tpu.memory_space<vmem>>, %arg4: memref<1x8xf32, #tpu.memory_space<vmem>>, %arg5: memref<16x8xf32, #tpu.memory_space<vmem>>, %arg6: memref<1x8xf32, #tpu.memory_space<vmem>>, %arg7: memref<1x8xf32, #tpu.memory_space<vmem>>, %arg8: memref<9x8x4xf32, #tpu.memory_space<vmem>>, %arg9: memref<1x4xf32, #tpu.memory_space<vmem>>, %arg10: memref<1x4xf32, #tpu.memory_space<vmem>>, %arg11: memref<9x4x8xf32, #tpu.memory_space<vmem>>, %arg12: memref<1x8xf32, #tpu.memory_space<vmem>>, %arg13: memref<1x8xf32, #tpu.memory_space<vmem>>, %arg14: memref<3x8x16xf32, #tpu.memory_space<vmem>>, %arg15: memref<1x16xf32, #tpu.memory_space<vmem>>, %arg16: memref<1x16xf32, #tpu.memory_space<vmem>>, %arg17: memref<1x16x16x16xf32, #tpu.memory_space<vmem>>, %arg18: memref<18x18x8xf32, #tpu.memory_space<vmem>>, %arg19: memref<18x18x4xf32, #tpu.memory_space<vmem>>) attributes {dimension_semantics = [#tpu.dimension_semantics<parallel>], iteration_bounds = array<i64: 2>, scalar_prefetch = 0 : i64, scratch_operands = 2 : i64, tpu.core_type = #tpu.core_type<tc>, window_params = [{transform_indices = @transform_0, window_bounds = array<i64: 1, 16, 16, 16>}, {pipeline_mode = #tpu.pipeline_mode<synchronous>, transform_indices = @transform_1, window_bounds = array<i64: 16, 8>}, {pipeline_mode = #tpu.pipeline_mode<synchronous>, transform_indices = @transform_2, window_bounds = array<i64: 1, 8>}, {pipeline_mode = #tpu.pipeline_mode<synchronous>, transform_indices = @transform_3, window_bounds = array<i64: 1, 8>}, {pipeline_mode = #tpu.pipeline_mode<synchronous>, transform_indices = @transform_4, window_bounds = array<i64: 16, 8>}, {pipeline_mode = #tpu.pipeline_mode<synchronous>, transform_indices = @transform_5, window_bounds = array<i64: 1, 8>}, {pipeline_mode = #tpu.pipeline_mode<synchronous>, transform_indices = @transform_6, window_bounds = array<i64: 1, 8>}, {pipeline_mode = #tpu.pipeline_mode<synchronous>, transform_indices = @transform_7, window_bounds = array<i64: 9, 8, 4>}, {pipeline_mode = #tpu.pipeline_mode<synchronous>, transform_indices = @transform_8, window_bounds = array<i64: 1, 4>}, {pipeline_mode = #tpu.pipeline_mode<synchronous>, transform_indices = @transform_9, window_bounds = array<i64: 1, 4>}, {pipeline_mode = #tpu.pipeline_mode<synchronous>, transform_indices = @transform_10, window_bounds = array<i64: 9, 4, 8>}, {pipeline_mode = #tpu.pipeline_mode<synchronous>, transform_indices = @transform_11, window_bounds = array<i64: 1, 8>}, {pipeline_mode = #tpu.pipeline_mode<synchronous>, transform_indices = @transform_12, window_bounds = array<i64: 1, 8>}, {pipeline_mode = #tpu.pipeline_mode<synchronous>, transform_indices = @transform_13, window_bounds = array<i64: 3, 8, 16>}, {pipeline_mode = #tpu.pipeline_mode<synchronous>, transform_indices = @transform_14, window_bounds = array<i64: 1, 16>}, {pipeline_mode = #tpu.pipeline_mode<synchronous>, transform_indices = @transform_15, window_bounds = array<i64: 1, 16>}, {transform_indices = @transform_16, window_bounds = array<i64: 1, 16, 16, 16>}]} {
    %c0 = arith.constant 0 : index
    %c0_0 = arith.constant 0 : index
    %c0_1 = arith.constant 0 : index
    %c0_2 = arith.constant 0 : index
    %0 = vector.load %arg1[%c0, %c0_0, %c0_1, %c0_2] : memref<1x16x16x16xf32, #tpu.memory_space<vmem>>, vector<1x16x16x16xf32>
    %1 = vector.shape_cast %0 : vector<1x16x16x16xf32> to vector<16x16x16xf32>
    %cst = arith.constant 0.000000e+00 : f32
    %2 = vector.broadcast %cst : f32 to vector<1x18x8xf32>
    %c0_3 = arith.constant 0 : index
    %c0_4 = arith.constant 0 : index
    %c0_5 = arith.constant 0 : index
    %3 = vector.load %arg18[%c0_3, %c0_4, %c0_5] : memref<18x18x8xf32, #tpu.memory_space<vmem>>, vector<1x18x8xf32>
    tpu.vector_store %arg18[%c0_3, %c0_4, %c0_5], %2 {strides = array<i32>} : memref<18x18x8xf32, #tpu.memory_space<vmem>>, vector<1x18x8xf32>,
    %cst_6 = arith.constant 0.000000e+00 : f32
    %4 = vector.broadcast %cst_6 : f32 to vector<1x18x8xf32>
    %c17 = arith.constant 17 : index
    %c0_7 = arith.constant 0 : index
    %c0_8 = arith.constant 0 : index
    %5 = vector.load %arg18[%c17, %c0_7, %c0_8] : memref<18x18x8xf32, #tpu.memory_space<vmem>>, vector<1x18x8xf32>
    tpu.vector_store %arg18[%c17, %c0_7, %c0_8], %4 {strides = array<i32>} : memref<18x18x8xf32, #tpu.memory_space<vmem>>, vector<1x18x8xf32>,
    %cst_9 = arith.constant 0.000000e+00 : f32
    %6 = vector.broadcast %cst_9 : f32 to vector<16x1x8xf32>
    %c1 = arith.constant 1 : index
    %c0_10 = arith.constant 0 : index
    %c0_11 = arith.constant 0 : index
    %7 = vector.load %arg18[%c1, %c0_10, %c0_11] : memref<18x18x8xf32, #tpu.memory_space<vmem>>, vector<16x1x8xf32>
    tpu.vector_store %arg18[%c1, %c0_10, %c0_11], %6 {strides = array<i32>} : memref<18x18x8xf32, #tpu.memory_space<vmem>>, vector<16x1x8xf32>,
    %cst_12 = arith.constant 0.000000e+00 : f32
    %8 = vector.broadcast %cst_12 : f32 to vector<16x1x8xf32>
    %c1_13 = arith.constant 1 : index
    %c17_14 = arith.constant 17 : index
    %c0_15 = arith.constant 0 : index
    %9 = vector.load %arg18[%c1_13, %c17_14, %c0_15] : memref<18x18x8xf32, #tpu.memory_space<vmem>>, vector<16x1x8xf32>
    tpu.vector_store %arg18[%c1_13, %c17_14, %c0_15], %8 {strides = array<i32>} : memref<18x18x8xf32, #tpu.memory_space<vmem>>, vector<16x1x8xf32>,
    %cst_16 = arith.constant 0.000000e+00 : f32
    %10 = vector.broadcast %cst_16 : f32 to vector<1x18x4xf32>
    %c0_17 = arith.constant 0 : index
    %c0_18 = arith.constant 0 : index
    %c0_19 = arith.constant 0 : index
    %11 = vector.load %arg19[%c0_17, %c0_18, %c0_19] : memref<18x18x4xf32, #tpu.memory_space<vmem>>, vector<1x18x4xf32>
    tpu.vector_store %arg19[%c0_17, %c0_18, %c0_19], %10 {strides = array<i32>} : memref<18x18x4xf32, #tpu.memory_space<vmem>>, vector<1x18x4xf32>,
    %cst_20 = arith.constant 0.000000e+00 : f32
    %12 = vector.broadcast %cst_20 : f32 to vector<1x18x4xf32>
    %c17_21 = arith.constant 17 : index
    %c0_22 = arith.constant 0 : index
    %c0_23 = arith.constant 0 : index
    %13 = vector.load %arg19[%c17_21, %c0_22, %c0_23] : memref<18x18x4xf32, #tpu.memory_space<vmem>>, vector<1x18x4xf32>
    tpu.vector_store %arg19[%c17_21, %c0_22, %c0_23], %12 {strides = array<i32>} : memref<18x18x4xf32, #tpu.memory_space<vmem>>, vector<1x18x4xf32>,
    %cst_24 = arith.constant 0.000000e+00 : f32
    %14 = vector.broadcast %cst_24 : f32 to vector<16x1x4xf32>
    %c1_25 = arith.constant 1 : index
    %c0_26 = arith.constant 0 : index
    %c0_27 = arith.constant 0 : index
    %15 = vector.load %arg19[%c1_25, %c0_26, %c0_27] : memref<18x18x4xf32, #tpu.memory_space<vmem>>, vector<16x1x4xf32>
    tpu.vector_store %arg19[%c1_25, %c0_26, %c0_27], %14 {strides = array<i32>} : memref<18x18x4xf32, #tpu.memory_space<vmem>>, vector<16x1x4xf32>,
    %cst_28 = arith.constant 0.000000e+00 : f32
    %16 = vector.broadcast %cst_28 : f32 to vector<16x1x4xf32>
    %c1_29 = arith.constant 1 : index
    %c17_30 = arith.constant 17 : index
    %c0_31 = arith.constant 0 : index
    %17 = vector.load %arg19[%c1_29, %c17_30, %c0_31] : memref<18x18x4xf32, #tpu.memory_space<vmem>>, vector<16x1x4xf32>
    tpu.vector_store %arg19[%c1_29, %c17_30, %c0_31], %16 {strides = array<i32>} : memref<18x18x4xf32, #tpu.memory_space<vmem>>, vector<16x1x4xf32>,
    %c0_32 = arith.constant 0 : index
    %c0_33 = arith.constant 0 : index
    %18 = vector.load %arg2[%c0_32, %c0_33] : memref<16x8xf32, #tpu.memory_space<vmem>>, vector<16x8xf32>
    %cst_34 = arith.constant dense<0.000000e+00> : vector<16x16x8xf32>
    %19 = tpu.matmul %1, %18, %cst_34 {dimension_numbers = #tpu.dot_dimension_numbers<[2], [0], [0, 1], [1], [0, 0, 0, 1, 1, 1], [], []>} : vector<16x16x16xf32>, vector<16x8xf32>, vector<16x16x8xf32> -> vector<16x16x8xf32>
    %c0_35 = arith.constant 0 : index
    %c0_36 = arith.constant 0 : index
    %20 = vector.load %arg3[%c0_35, %c0_36] : memref<1x8xf32, #tpu.memory_space<vmem>>, vector<1x8xf32>
    %21 = vector.shape_cast %20 : vector<1x8xf32> to vector<1x1x8xf32>
    %22 = vector.broadcast %21 : vector<1x1x8xf32> to vector<16x16x8xf32>
    %23 = arith.mulf %19, %22 : vector<16x16x8xf32>
    %c0_37 = arith.constant 0 : index
    %c0_38 = arith.constant 0 : index
    %24 = vector.load %arg4[%c0_37, %c0_38] : memref<1x8xf32, #tpu.memory_space<vmem>>, vector<1x8xf32>
    %25 = vector.shape_cast %24 : vector<1x8xf32> to vector<1x1x8xf32>
    %26 = vector.broadcast %25 : vector<1x1x8xf32> to vector<16x16x8xf32>
    %27 = arith.addf %23, %26 : vector<16x16x8xf32>
    %28 = arith.negf %27 : vector<16x16x8xf32>
    %29 = math.exp %28 : vector<16x16x8xf32>
    %cst_39 = arith.constant 1.000000e+00 : f32
    %30 = vector.broadcast %cst_39 : f32 to vector<16x16x8xf32>
    %31 = arith.addf %30, %29 : vector<16x16x8xf32>
    %32 = arith.divf %30, %31 : vector<16x16x8xf32>
    %33 = arith.mulf %27, %32 : vector<16x16x8xf32>
    %c0_40 = arith.constant 0 : index
    %c0_41 = arith.constant 0 : index
    %34 = vector.load %arg5[%c0_40, %c0_41] : memref<16x8xf32, #tpu.memory_space<vmem>>, vector<16x8xf32>
    %cst_42 = arith.constant dense<0.000000e+00> : vector<16x16x8xf32>
    %35 = tpu.matmul %1, %34, %cst_42 {dimension_numbers = #tpu.dot_dimension_numbers<[2], [0], [0, 1], [1], [0, 0, 0, 1, 1, 1], [], []>} : vector<16x16x16xf32>, vector<16x8xf32>, vector<16x16x8xf32> -> vector<16x16x8xf32>
    %c0_43 = arith.constant 0 : index
    %c0_44 = arith.constant 0 : index
    %36 = vector.load %arg6[%c0_43, %c0_44] : memref<1x8xf32, #tpu.memory_space<vmem>>, vector<1x8xf32>
    %37 = vector.shape_cast %36 : vector<1x8xf32> to vector<1x1x8xf32>
    %38 = vector.broadcast %37 : vector<1x1x8xf32> to vector<16x16x8xf32>
    %39 = arith.mulf %35, %38 : vector<16x16x8xf32>
    %c0_45 = arith.constant 0 : index
    %c0_46 = arith.constant 0 : index
    %40 = vector.load %arg7[%c0_45, %c0_46] : memref<1x8xf32, #tpu.memory_space<vmem>>, vector<1x8xf32>
    %41 = vector.shape_cast %40 : vector<1x8xf32> to vector<1x1x8xf32>
    %42 = vector.broadcast %41 : vector<1x1x8xf32> to vector<16x16x8xf32>
    %43 = arith.addf %39, %42 : vector<16x16x8xf32>
    %44 = arith.negf %43 : vector<16x16x8xf32>
    %45 = math.exp %44 : vector<16x16x8xf32>
    %cst_47 = arith.constant 1.000000e+00 : f32
    %46 = vector.broadcast %cst_47 : f32 to vector<16x16x8xf32>
    %47 = arith.addf %46, %45 : vector<16x16x8xf32>
    %48 = arith.divf %46, %47 : vector<16x16x8xf32>
    %49 = arith.mulf %43, %48 : vector<16x16x8xf32>
    %c1_48 = arith.constant 1 : index
    %c1_49 = arith.constant 1 : index
    %c0_50 = arith.constant 0 : index
    %50 = vector.load %arg18[%c1_48, %c1_49, %c0_50] : memref<18x18x8xf32, #tpu.memory_space<vmem>>, vector<16x16x8xf32>
    tpu.vector_store %arg18[%c1_48, %c1_49, %c0_50], %49 {strides = array<i32>} : memref<18x18x8xf32, #tpu.memory_space<vmem>>, vector<16x16x8xf32>,
    %cst_51 = arith.constant 0.000000e+00 : f32
    %51 = vector.broadcast %cst_51 : f32 to vector<16x16x4xf32>
    %c0_52 = arith.constant 0 : index
    %c0_53 = arith.constant 0 : index
    %c0_54 = arith.constant 0 : index
    %52 = vector.load %arg18[%c0_52, %c0_53, %c0_54] : memref<18x18x8xf32, #tpu.memory_space<vmem>>, vector<16x16x8xf32>
    %c0_55 = arith.constant 0 : index
    %c0_56 = arith.constant 0 : index
    %c0_57 = arith.constant 0 : index
    %53 = vector.load %arg8[%c0_55, %c0_56, %c0_57] : memref<9x8x4xf32, #tpu.memory_space<vmem>>, vector<1x8x4xf32>
    %54 = vector.shape_cast %53 : vector<1x8x4xf32> to vector<8x4xf32>
    %cst_58 = arith.constant dense<0.000000e+00> : vector<16x16x4xf32>
    %55 = tpu.matmul %52, %54, %cst_58 {dimension_numbers = #tpu.dot_dimension_numbers<[2], [0], [0, 1], [1], [0, 0, 0, 1, 1, 1], [], []>} : vector<16x16x8xf32>, vector<8x4xf32>, vector<16x16x4xf32> -> vector<16x16x4xf32>
    %56 = arith.addf %51, %55 : vector<16x16x4xf32>
    %c0_59 = arith.constant 0 : index
    %c1_60 = arith.constant 1 : index
    %c0_61 = arith.constant 0 : index
    %57 = vector.load %arg18[%c0_59, %c1_60, %c0_61] : memref<18x18x8xf32, #tpu.memory_space<vmem>>, vector<16x16x8xf32>
    %c1_62 = arith.constant 1 : index
    %c0_63 = arith.constant 0 : index
    %c0_64 = arith.constant 0 : index
    %58 = vector.load %arg8[%c1_62, %c0_63, %c0_64] : memref<9x8x4xf32, #tpu.memory_space<vmem>>, vector<1x8x4xf32>
    %59 = vector.shape_cast %58 : vector<1x8x4xf32> to vector<8x4xf32>
    %cst_65 = arith.constant dense<0.000000e+00> : vector<16x16x4xf32>
    %60 = tpu.matmul %57, %59, %cst_65 {dimension_numbers = #tpu.dot_dimension_numbers<[2], [0], [0, 1], [1], [0, 0, 0, 1, 1, 1], [], []>} : vector<16x16x8xf32>, vector<8x4xf32>, vector<16x16x4xf32> -> vector<16x16x4xf32>
    %61 = arith.addf %56, %60 : vector<16x16x4xf32>
    %c0_66 = arith.constant 0 : index
    %c2 = arith.constant 2 : index
    %c0_67 = arith.constant 0 : index
    %62 = vector.load %arg18[%c0_66, %c2, %c0_67] : memref<18x18x8xf32, #tpu.memory_space<vmem>>, vector<16x16x8xf32>
    %c2_68 = arith.constant 2 : index
    %c0_69 = arith.constant 0 : index
    %c0_70 = arith.constant 0 : index
    %63 = vector.load %arg8[%c2_68, %c0_69, %c0_70] : memref<9x8x4xf32, #tpu.memory_space<vmem>>, vector<1x8x4xf32>
    %64 = vector.shape_cast %63 : vector<1x8x4xf32> to vector<8x4xf32>
    %cst_71 = arith.constant dense<0.000000e+00> : vector<16x16x4xf32>
    %65 = tpu.matmul %62, %64, %cst_71 {dimension_numbers = #tpu.dot_dimension_numbers<[2], [0], [0, 1], [1], [0, 0, 0, 1, 1, 1], [], []>} : vector<16x16x8xf32>, vector<8x4xf32>, vector<16x16x4xf32> -> vector<16x16x4xf32>
    %66 = arith.addf %61, %65 : vector<16x16x4xf32>
    %c1_72 = arith.constant 1 : index
    %c0_73 = arith.constant 0 : index
    %c0_74 = arith.constant 0 : index
    %67 = vector.load %arg18[%c1_72, %c0_73, %c0_74] : memref<18x18x8xf32, #tpu.memory_space<vmem>>, vector<16x16x8xf32>
    %c3 = arith.constant 3 : index
    %c0_75 = arith.constant 0 : index
    %c0_76 = arith.constant 0 : index
    %68 = vector.load %arg8[%c3, %c0_75, %c0_76] : memref<9x8x4xf32, #tpu.memory_space<vmem>>, vector<1x8x4xf32>
    %69 = vector.shape_cast %68 : vector<1x8x4xf32> to vector<8x4xf32>
    %cst_77 = arith.constant dense<0.000000e+00> : vector<16x16x4xf32>
    %70 = tpu.matmul %67, %69, %cst_77 {dimension_numbers = #tpu.dot_dimension_numbers<[2], [0], [0, 1], [1], [0, 0, 0, 1, 1, 1], [], []>} : vector<16x16x8xf32>, vector<8x4xf32>, vector<16x16x4xf32> -> vector<16x16x4xf32>
    %71 = arith.addf %66, %70 : vector<16x16x4xf32>
    %c1_78 = arith.constant 1 : index
    %c1_79 = arith.constant 1 : index
    %c0_80 = arith.constant 0 : index
    %72 = vector.load %arg18[%c1_78, %c1_79, %c0_80] : memref<18x18x8xf32, #tpu.memory_space<vmem>>, vector<16x16x8xf32>
    %c4 = arith.constant 4 : index
    %c0_81 = arith.constant 0 : index
    %c0_82 = arith.constant 0 : index
    %73 = vector.load %arg8[%c4, %c0_81, %c0_82] : memref<9x8x4xf32, #tpu.memory_space<vmem>>, vector<1x8x4xf32>
    %74 = vector.shape_cast %73 : vector<1x8x4xf32> to vector<8x4xf32>
    %cst_83 = arith.constant dense<0.000000e+00> : vector<16x16x4xf32>
    %75 = tpu.matmul %72, %74, %cst_83 {dimension_numbers = #tpu.dot_dimension_numbers<[2], [0], [0, 1], [1], [0, 0, 0, 1, 1, 1], [], []>} : vector<16x16x8xf32>, vector<8x4xf32>, vector<16x16x4xf32> -> vector<16x16x4xf32>
    %76 = arith.addf %71, %75 : vector<16x16x4xf32>
    %c1_84 = arith.constant 1 : index
    %c2_85 = arith.constant 2 : index
    %c0_86 = arith.constant 0 : index
    %77 = vector.load %arg18[%c1_84, %c2_85, %c0_86] : memref<18x18x8xf32, #tpu.memory_space<vmem>>, vector<16x16x8xf32>
    %c5 = arith.constant 5 : index
    %c0_87 = arith.constant 0 : index
    %c0_88 = arith.constant 0 : index
    %78 = vector.load %arg8[%c5, %c0_87, %c0_88] : memref<9x8x4xf32, #tpu.memory_space<vmem>>, vector<1x8x4xf32>
    %79 = vector.shape_cast %78 : vector<1x8x4xf32> to vector<8x4xf32>
    %cst_89 = arith.constant dense<0.000000e+00> : vector<16x16x4xf32>
    %80 = tpu.matmul %77, %79, %cst_89 {dimension_numbers = #tpu.dot_dimension_numbers<[2], [0], [0, 1], [1], [0, 0, 0, 1, 1, 1], [], []>} : vector<16x16x8xf32>, vector<8x4xf32>, vector<16x16x4xf32> -> vector<16x16x4xf32>
    %81 = arith.addf %76, %80 : vector<16x16x4xf32>
    %c2_90 = arith.constant 2 : index
    %c0_91 = arith.constant 0 : index
    %c0_92 = arith.constant 0 : index
    %82 = vector.load %arg18[%c2_90, %c0_91, %c0_92] : memref<18x18x8xf32, #tpu.memory_space<vmem>>, vector<16x16x8xf32>
    %c6 = arith.constant 6 : index
    %c0_93 = arith.constant 0 : index
    %c0_94 = arith.constant 0 : index
    %83 = vector.load %arg8[%c6, %c0_93, %c0_94] : memref<9x8x4xf32, #tpu.memory_space<vmem>>, vector<1x8x4xf32>
    %84 = vector.shape_cast %83 : vector<1x8x4xf32> to vector<8x4xf32>
    %cst_95 = arith.constant dense<0.000000e+00> : vector<16x16x4xf32>
    %85 = tpu.matmul %82, %84, %cst_95 {dimension_numbers = #tpu.dot_dimension_numbers<[2], [0], [0, 1], [1], [0, 0, 0, 1, 1, 1], [], []>} : vector<16x16x8xf32>, vector<8x4xf32>, vector<16x16x4xf32> -> vector<16x16x4xf32>
    %86 = arith.addf %81, %85 : vector<16x16x4xf32>
    %c2_96 = arith.constant 2 : index
    %c1_97 = arith.constant 1 : index
    %c0_98 = arith.constant 0 : index
    %87 = vector.load %arg18[%c2_96, %c1_97, %c0_98] : memref<18x18x8xf32, #tpu.memory_space<vmem>>, vector<16x16x8xf32>
    %c7 = arith.constant 7 : index
    %c0_99 = arith.constant 0 : index
    %c0_100 = arith.constant 0 : index
    %88 = vector.load %arg8[%c7, %c0_99, %c0_100] : memref<9x8x4xf32, #tpu.memory_space<vmem>>, vector<1x8x4xf32>
    %89 = vector.shape_cast %88 : vector<1x8x4xf32> to vector<8x4xf32>
    %cst_101 = arith.constant dense<0.000000e+00> : vector<16x16x4xf32>
    %90 = tpu.matmul %87, %89, %cst_101 {dimension_numbers = #tpu.dot_dimension_numbers<[2], [0], [0, 1], [1], [0, 0, 0, 1, 1, 1], [], []>} : vector<16x16x8xf32>, vector<8x4xf32>, vector<16x16x4xf32> -> vector<16x16x4xf32>
    %91 = arith.addf %86, %90 : vector<16x16x4xf32>
    %c2_102 = arith.constant 2 : index
    %c2_103 = arith.constant 2 : index
    %c0_104 = arith.constant 0 : index
    %92 = vector.load %arg18[%c2_102, %c2_103, %c0_104] : memref<18x18x8xf32, #tpu.memory_space<vmem>>, vector<16x16x8xf32>
    %c8 = arith.constant 8 : index
    %c0_105 = arith.constant 0 : index
    %c0_106 = arith.constant 0 : index
    %93 = vector.load %arg8[%c8, %c0_105, %c0_106] : memref<9x8x4xf32, #tpu.memory_space<vmem>>, vector<1x8x4xf32>
    %94 = vector.shape_cast %93 : vector<1x8x4xf32> to vector<8x4xf32>
    %cst_107 = arith.constant dense<0.000000e+00> : vector<16x16x4xf32>
    %95 = tpu.matmul %92, %94, %cst_107 {dimension_numbers = #tpu.dot_dimension_numbers<[2], [0], [0, 1], [1], [0, 0, 0, 1, 1, 1], [], []>} : vector<16x16x8xf32>, vector<8x4xf32>, vector<16x16x4xf32> -> vector<16x16x4xf32>
    %96 = arith.addf %91, %95 : vector<16x16x4xf32>
    %c0_108 = arith.constant 0 : index
    %c0_109 = arith.constant 0 : index
    %97 = vector.load %arg9[%c0_108, %c0_109] : memref<1x4xf32, #tpu.memory_space<vmem>>, vector<1x4xf32>
    %98 = vector.shape_cast %97 : vector<1x4xf32> to vector<1x1x4xf32>
    %99 = vector.broadcast %98 : vector<1x1x4xf32> to vector<16x16x4xf32>
    %100 = arith.mulf %96, %99 : vector<16x16x4xf32>
    %c0_110 = arith.constant 0 : index
    %c0_111 = arith.constant 0 : index
    %101 = vector.load %arg10[%c0_110, %c0_111] : memref<1x4xf32, #tpu.memory_space<vmem>>, vector<1x4xf32>
    %102 = vector.shape_cast %101 : vector<1x4xf32> to vector<1x1x4xf32>
    %103 = vector.broadcast %102 : vector<1x1x4xf32> to vector<16x16x4xf32>
    %104 = arith.addf %100, %103 : vector<16x16x4xf32>
    %105 = arith.negf %104 : vector<16x16x4xf32>
    %106 = math.exp %105 : vector<16x16x4xf32>
    %cst_112 = arith.constant 1.000000e+00 : f32
    %107 = vector.broadcast %cst_112 : f32 to vector<16x16x4xf32>
    %108 = arith.addf %107, %106 : vector<16x16x4xf32>
    %109 = arith.divf %107, %108 : vector<16x16x4xf32>
    %110 = arith.mulf %104, %109 : vector<16x16x4xf32>
    %c1_113 = arith.constant 1 : index
    %c1_114 = arith.constant 1 : index
    %c0_115 = arith.constant 0 : index
    %111 = vector.load %arg19[%c1_113, %c1_114, %c0_115] : memref<18x18x4xf32, #tpu.memory_space<vmem>>, vector<16x16x4xf32>
    tpu.vector_store %arg19[%c1_113, %c1_114, %c0_115], %110 {strides = array<i32>} : memref<18x18x4xf32, #tpu.memory_space<vmem>>, vector<16x16x4xf32>,
    %cst_116 = arith.constant 0.000000e+00 : f32
    %112 = vector.broadcast %cst_116 : f32 to vector<16x16x8xf32>
    %c0_117 = arith.constant 0 : index
    %c0_118 = arith.constant 0 : index
    %c0_119 = arith.constant 0 : index
    %113 = vector.load %arg19[%c0_117, %c0_118, %c0_119] : memref<18x18x4xf32, #tpu.memory_space<vmem>>, vector<16x16x4xf32>
    %c0_120 = arith.constant 0 : index
    %c0_121 = arith.constant 0 : index
    %c0_122 = arith.constant 0 : index
    %114 = vector.load %arg11[%c0_120, %c0_121, %c0_122] : memref<9x4x8xf32, #tpu.memory_space<vmem>>, vector<1x4x8xf32>
    %115 = vector.shape_cast %114 : vector<1x4x8xf32> to vector<4x8xf32>
    %cst_123 = arith.constant dense<0.000000e+00> : vector<16x16x8xf32>
    %116 = tpu.matmul %113, %115, %cst_123 {dimension_numbers = #tpu.dot_dimension_numbers<[2], [0], [0, 1], [1], [0, 0, 0, 1, 1, 1], [], []>} : vector<16x16x4xf32>, vector<4x8xf32>, vector<16x16x8xf32> -> vector<16x16x8xf32>
    %117 = arith.addf %112, %116 : vector<16x16x8xf32>
    %c0_124 = arith.constant 0 : index
    %c1_125 = arith.constant 1 : index
    %c0_126 = arith.constant 0 : index
    %118 = vector.load %arg19[%c0_124, %c1_125, %c0_126] : memref<18x18x4xf32, #tpu.memory_space<vmem>>, vector<16x16x4xf32>
    %c1_127 = arith.constant 1 : index
    %c0_128 = arith.constant 0 : index
    %c0_129 = arith.constant 0 : index
    %119 = vector.load %arg11[%c1_127, %c0_128, %c0_129] : memref<9x4x8xf32, #tpu.memory_space<vmem>>, vector<1x4x8xf32>
    %120 = vector.shape_cast %119 : vector<1x4x8xf32> to vector<4x8xf32>
    %cst_130 = arith.constant dense<0.000000e+00> : vector<16x16x8xf32>
    %121 = tpu.matmul %118, %120, %cst_130 {dimension_numbers = #tpu.dot_dimension_numbers<[2], [0], [0, 1], [1], [0, 0, 0, 1, 1, 1], [], []>} : vector<16x16x4xf32>, vector<4x8xf32>, vector<16x16x8xf32> -> vector<16x16x8xf32>
    %122 = arith.addf %117, %121 : vector<16x16x8xf32>
    %c0_131 = arith.constant 0 : index
    %c2_132 = arith.constant 2 : index
    %c0_133 = arith.constant 0 : index
    %123 = vector.load %arg19[%c0_131, %c2_132, %c0_133] : memref<18x18x4xf32, #tpu.memory_space<vmem>>, vector<16x16x4xf32>
    %c2_134 = arith.constant 2 : index
    %c0_135 = arith.constant 0 : index
    %c0_136 = arith.constant 0 : index
    %124 = vector.load %arg11[%c2_134, %c0_135, %c0_136] : memref<9x4x8xf32, #tpu.memory_space<vmem>>, vector<1x4x8xf32>
    %125 = vector.shape_cast %124 : vector<1x4x8xf32> to vector<4x8xf32>
    %cst_137 = arith.constant dense<0.000000e+00> : vector<16x16x8xf32>
    %126 = tpu.matmul %123, %125, %cst_137 {dimension_numbers = #tpu.dot_dimension_numbers<[2], [0], [0, 1], [1], [0, 0, 0, 1, 1, 1], [], []>} : vector<16x16x4xf32>, vector<4x8xf32>, vector<16x16x8xf32> -> vector<16x16x8xf32>
    %127 = arith.addf %122, %126 : vector<16x16x8xf32>
    %c1_138 = arith.constant 1 : index
    %c0_139 = arith.constant 0 : index
    %c0_140 = arith.constant 0 : index
    %128 = vector.load %arg19[%c1_138, %c0_139, %c0_140] : memref<18x18x4xf32, #tpu.memory_space<vmem>>, vector<16x16x4xf32>
    %c3_141 = arith.constant 3 : index
    %c0_142 = arith.constant 0 : index
    %c0_143 = arith.constant 0 : index
    %129 = vector.load %arg11[%c3_141, %c0_142, %c0_143] : memref<9x4x8xf32, #tpu.memory_space<vmem>>, vector<1x4x8xf32>
    %130 = vector.shape_cast %129 : vector<1x4x8xf32> to vector<4x8xf32>
    %cst_144 = arith.constant dense<0.000000e+00> : vector<16x16x8xf32>
    %131 = tpu.matmul %128, %130, %cst_144 {dimension_numbers = #tpu.dot_dimension_numbers<[2], [0], [0, 1], [1], [0, 0, 0, 1, 1, 1], [], []>} : vector<16x16x4xf32>, vector<4x8xf32>, vector<16x16x8xf32> -> vector<16x16x8xf32>
    %132 = arith.addf %127, %131 : vector<16x16x8xf32>
    %c1_145 = arith.constant 1 : index
    %c1_146 = arith.constant 1 : index
    %c0_147 = arith.constant 0 : index
    %133 = vector.load %arg19[%c1_145, %c1_146, %c0_147] : memref<18x18x4xf32, #tpu.memory_space<vmem>>, vector<16x16x4xf32>
    %c4_148 = arith.constant 4 : index
    %c0_149 = arith.constant 0 : index
    %c0_150 = arith.constant 0 : index
    %134 = vector.load %arg11[%c4_148, %c0_149, %c0_150] : memref<9x4x8xf32, #tpu.memory_space<vmem>>, vector<1x4x8xf32>
    %135 = vector.shape_cast %134 : vector<1x4x8xf32> to vector<4x8xf32>
    %cst_151 = arith.constant dense<0.000000e+00> : vector<16x16x8xf32>
    %136 = tpu.matmul %133, %135, %cst_151 {dimension_numbers = #tpu.dot_dimension_numbers<[2], [0], [0, 1], [1], [0, 0, 0, 1, 1, 1], [], []>} : vector<16x16x4xf32>, vector<4x8xf32>, vector<16x16x8xf32> -> vector<16x16x8xf32>
    %137 = arith.addf %132, %136 : vector<16x16x8xf32>
    %c1_152 = arith.constant 1 : index
    %c2_153 = arith.constant 2 : index
    %c0_154 = arith.constant 0 : index
    %138 = vector.load %arg19[%c1_152, %c2_153, %c0_154] : memref<18x18x4xf32, #tpu.memory_space<vmem>>, vector<16x16x4xf32>
    %c5_155 = arith.constant 5 : index
    %c0_156 = arith.constant 0 : index
    %c0_157 = arith.constant 0 : index
    %139 = vector.load %arg11[%c5_155, %c0_156, %c0_157] : memref<9x4x8xf32, #tpu.memory_space<vmem>>, vector<1x4x8xf32>
    %140 = vector.shape_cast %139 : vector<1x4x8xf32> to vector<4x8xf32>
    %cst_158 = arith.constant dense<0.000000e+00> : vector<16x16x8xf32>
    %141 = tpu.matmul %138, %140, %cst_158 {dimension_numbers = #tpu.dot_dimension_numbers<[2], [0], [0, 1], [1], [0, 0, 0, 1, 1, 1], [], []>} : vector<16x16x4xf32>, vector<4x8xf32>, vector<16x16x8xf32> -> vector<16x16x8xf32>
    %142 = arith.addf %137, %141 : vector<16x16x8xf32>
    %c2_159 = arith.constant 2 : index
    %c0_160 = arith.constant 0 : index
    %c0_161 = arith.constant 0 : index
    %143 = vector.load %arg19[%c2_159, %c0_160, %c0_161] : memref<18x18x4xf32, #tpu.memory_space<vmem>>, vector<16x16x4xf32>
    %c6_162 = arith.constant 6 : index
    %c0_163 = arith.constant 0 : index
    %c0_164 = arith.constant 0 : index
    %144 = vector.load %arg11[%c6_162, %c0_163, %c0_164] : memref<9x4x8xf32, #tpu.memory_space<vmem>>, vector<1x4x8xf32>
    %145 = vector.shape_cast %144 : vector<1x4x8xf32> to vector<4x8xf32>
    %cst_165 = arith.constant dense<0.000000e+00> : vector<16x16x8xf32>
    %146 = tpu.matmul %143, %145, %cst_165 {dimension_numbers = #tpu.dot_dimension_numbers<[2], [0], [0, 1], [1], [0, 0, 0, 1, 1, 1], [], []>} : vector<16x16x4xf32>, vector<4x8xf32>, vector<16x16x8xf32> -> vector<16x16x8xf32>
    %147 = arith.addf %142, %146 : vector<16x16x8xf32>
    %c2_166 = arith.constant 2 : index
    %c1_167 = arith.constant 1 : index
    %c0_168 = arith.constant 0 : index
    %148 = vector.load %arg19[%c2_166, %c1_167, %c0_168] : memref<18x18x4xf32, #tpu.memory_space<vmem>>, vector<16x16x4xf32>
    %c7_169 = arith.constant 7 : index
    %c0_170 = arith.constant 0 : index
    %c0_171 = arith.constant 0 : index
    %149 = vector.load %arg11[%c7_169, %c0_170, %c0_171] : memref<9x4x8xf32, #tpu.memory_space<vmem>>, vector<1x4x8xf32>
    %150 = vector.shape_cast %149 : vector<1x4x8xf32> to vector<4x8xf32>
    %cst_172 = arith.constant dense<0.000000e+00> : vector<16x16x8xf32>
    %151 = tpu.matmul %148, %150, %cst_172 {dimension_numbers = #tpu.dot_dimension_numbers<[2], [0], [0, 1], [1], [0, 0, 0, 1, 1, 1], [], []>} : vector<16x16x4xf32>, vector<4x8xf32>, vector<16x16x8xf32> -> vector<16x16x8xf32>
    %152 = arith.addf %147, %151 : vector<16x16x8xf32>
    %c2_173 = arith.constant 2 : index
    %c2_174 = arith.constant 2 : index
    %c0_175 = arith.constant 0 : index
    %153 = vector.load %arg19[%c2_173, %c2_174, %c0_175] : memref<18x18x4xf32, #tpu.memory_space<vmem>>, vector<16x16x4xf32>
    %c8_176 = arith.constant 8 : index
    %c0_177 = arith.constant 0 : index
    %c0_178 = arith.constant 0 : index
    %154 = vector.load %arg11[%c8_176, %c0_177, %c0_178] : memref<9x4x8xf32, #tpu.memory_space<vmem>>, vector<1x4x8xf32>
    %155 = vector.shape_cast %154 : vector<1x4x8xf32> to vector<4x8xf32>
    %cst_179 = arith.constant dense<0.000000e+00> : vector<16x16x8xf32>
    %156 = tpu.matmul %153, %155, %cst_179 {dimension_numbers = #tpu.dot_dimension_numbers<[2], [0], [0, 1], [1], [0, 0, 0, 1, 1, 1], [], []>} : vector<16x16x4xf32>, vector<4x8xf32>, vector<16x16x8xf32> -> vector<16x16x8xf32>
    %157 = arith.addf %152, %156 : vector<16x16x8xf32>
    %c0_180 = arith.constant 0 : index
    %c0_181 = arith.constant 0 : index
    %158 = vector.load %arg12[%c0_180, %c0_181] : memref<1x8xf32, #tpu.memory_space<vmem>>, vector<1x8xf32>
    %159 = vector.shape_cast %158 : vector<1x8xf32> to vector<1x1x8xf32>
    %160 = vector.broadcast %159 : vector<1x1x8xf32> to vector<16x16x8xf32>
    %161 = arith.mulf %157, %160 : vector<16x16x8xf32>
    %c0_182 = arith.constant 0 : index
    %c0_183 = arith.constant 0 : index
    %162 = vector.load %arg13[%c0_182, %c0_183] : memref<1x8xf32, #tpu.memory_space<vmem>>, vector<1x8xf32>
    %163 = vector.shape_cast %162 : vector<1x8xf32> to vector<1x1x8xf32>
    %164 = vector.broadcast %163 : vector<1x1x8xf32> to vector<16x16x8xf32>
    %165 = arith.addf %161, %164 : vector<16x16x8xf32>
    %166 = arith.negf %165 : vector<16x16x8xf32>
    %167 = math.exp %166 : vector<16x16x8xf32>
    %cst_184 = arith.constant 1.000000e+00 : f32
    %168 = vector.broadcast %cst_184 : f32 to vector<16x16x8xf32>
    %169 = arith.addf %168, %167 : vector<16x16x8xf32>
    %170 = arith.divf %168, %169 : vector<16x16x8xf32>
    %171 = arith.mulf %165, %170 : vector<16x16x8xf32>
    %172 = arith.addf %49, %171 : vector<16x16x8xf32>
    %cst_185 = arith.constant 0.000000e+00 : f32
    %173 = vector.broadcast %cst_185 : f32 to vector<16x16x16xf32>
    %c0_186 = arith.constant 0 : index
    %c0_187 = arith.constant 0 : index
    %c0_188 = arith.constant 0 : index
    %174 = vector.load %arg14[%c0_186, %c0_187, %c0_188] : memref<3x8x16xf32, #tpu.memory_space<vmem>>, vector<1x8x16xf32>
    %175 = vector.shape_cast %174 : vector<1x8x16xf32> to vector<8x16xf32>
    %cst_189 = arith.constant dense<0.000000e+00> : vector<16x16x16xf32>
    %176 = tpu.matmul %33, %175, %cst_189 {dimension_numbers = #tpu.dot_dimension_numbers<[2], [0], [0, 1], [1], [0, 0, 0, 1, 1, 1], [], []>} : vector<16x16x8xf32>, vector<8x16xf32>, vector<16x16x16xf32> -> vector<16x16x16xf32>
    %177 = arith.addf %173, %176 : vector<16x16x16xf32>
    %c1_190 = arith.constant 1 : index
    %c0_191 = arith.constant 0 : index
    %c0_192 = arith.constant 0 : index
    %178 = vector.load %arg14[%c1_190, %c0_191, %c0_192] : memref<3x8x16xf32, #tpu.memory_space<vmem>>, vector<1x8x16xf32>
    %179 = vector.shape_cast %178 : vector<1x8x16xf32> to vector<8x16xf32>
    %cst_193 = arith.constant dense<0.000000e+00> : vector<16x16x16xf32>
    %180 = tpu.matmul %49, %179, %cst_193 {dimension_numbers = #tpu.dot_dimension_numbers<[2], [0], [0, 1], [1], [0, 0, 0, 1, 1, 1], [], []>} : vector<16x16x8xf32>, vector<8x16xf32>, vector<16x16x16xf32> -> vector<16x16x16xf32>
    %181 = arith.addf %177, %180 : vector<16x16x16xf32>
    %c2_194 = arith.constant 2 : index
    %c0_195 = arith.constant 0 : index
    %c0_196 = arith.constant 0 : index
    %182 = vector.load %arg14[%c2_194, %c0_195, %c0_196] : memref<3x8x16xf32, #tpu.memory_space<vmem>>, vector<1x8x16xf32>
    %183 = vector.shape_cast %182 : vector<1x8x16xf32> to vector<8x16xf32>
    %cst_197 = arith.constant dense<0.000000e+00> : vector<16x16x16xf32>
    %184 = tpu.matmul %172, %183, %cst_197 {dimension_numbers = #tpu.dot_dimension_numbers<[2], [0], [0, 1], [1], [0, 0, 0, 1, 1, 1], [], []>} : vector<16x16x8xf32>, vector<8x16xf32>, vector<16x16x16xf32> -> vector<16x16x16xf32>
    %185 = arith.addf %181, %184 : vector<16x16x16xf32>
    %c0_198 = arith.constant 0 : index
    %c0_199 = arith.constant 0 : index
    %186 = vector.load %arg15[%c0_198, %c0_199] : memref<1x16xf32, #tpu.memory_space<vmem>>, vector<1x16xf32>
    %187 = vector.shape_cast %186 : vector<1x16xf32> to vector<1x1x16xf32>
    %188 = vector.broadcast %187 : vector<1x1x16xf32> to vector<16x16x16xf32>
    %189 = arith.mulf %185, %188 : vector<16x16x16xf32>
    %c0_200 = arith.constant 0 : index
    %c0_201 = arith.constant 0 : index
    %190 = vector.load %arg16[%c0_200, %c0_201] : memref<1x16xf32, #tpu.memory_space<vmem>>, vector<1x16xf32>
    %191 = vector.shape_cast %190 : vector<1x16xf32> to vector<1x1x16xf32>
    %192 = vector.broadcast %191 : vector<1x1x16xf32> to vector<16x16x16xf32>
    %193 = arith.addf %189, %192 : vector<16x16x16xf32>
    %194 = arith.negf %193 : vector<16x16x16xf32>
    %195 = math.exp %194 : vector<16x16x16xf32>
    %cst_202 = arith.constant 1.000000e+00 : f32
    %196 = vector.broadcast %cst_202 : f32 to vector<16x16x16xf32>
    %197 = arith.addf %196, %195 : vector<16x16x16xf32>
    %198 = arith.divf %196, %197 : vector<16x16x16xf32>
    %199 = arith.mulf %193, %198 : vector<16x16x16xf32>
    %c0_203 = arith.constant 0 : index
    %c0_204 = arith.constant 0 : index
    %c0_205 = arith.constant 0 : index
    %c0_206 = arith.constant 0 : index
    %200 = vector.load %arg17[%c0_203, %c0_204, %c0_205, %c0_206] : memref<1x16x16x16xf32, #tpu.memory_space<vmem>>, vector<1x16x16x16xf32>
    %201 = vector.shape_cast %200 : vector<1x16x16x16xf32> to vector<16x16x16xf32>
    %202 = vector.shape_cast %199 : vector<16x16x16xf32> to vector<1x16x16x16xf32>
    tpu.vector_store %arg17[%c0_203, %c0_204, %c0_205, %c0_206], %202 {strides = array<i32>} : memref<1x16x16x16xf32, #tpu.memory_space<vmem>>, vector<1x16x16x16xf32>,
    return
  }
  func.func @transform_0(%arg0: i32) -> (i32, i32, i32, i32) {
    %c0_i32 = arith.constant 0 : i32
    %c0_i32_0 = arith.constant 0 : i32
    %c0_i32_1 = arith.constant 0 : i32
    %c0_i32_2 = arith.constant 0 : i32
    return %arg0, %c0_i32, %c0_i32_0, %c0_i32_1 : i32, i32, i32, i32
  }
  func.func @transform_1(%arg0: i32) -> (i32, i32) {
    %c0_i32 = arith.constant 0 : i32
    %c0_i32_0 = arith.constant 0 : i32
    %c0_i32_1 = arith.constant 0 : i32
    return %c0_i32, %c0_i32_0 : i32, i32
  }
  func.func @transform_2(%arg0: i32) -> (i32, i32) {
    %c0_i32 = arith.constant 0 : i32
    %c0_i32_0 = arith.constant 0 : i32
    %c0_i32_1 = arith.constant 0 : i32
    return %c0_i32, %c0_i32_0 : i32, i32
  }
  func.func @transform_3(%arg0: i32) -> (i32, i32) {
    %c0_i32 = arith.constant 0 : i32
    %c0_i32_0 = arith.constant 0 : i32
    %c0_i32_1 = arith.constant 0 : i32
    return %c0_i32, %c0_i32_0 : i32, i32
  }
  func.func @transform_4(%arg0: i32) -> (i32, i32) {
    %c0_i32 = arith.constant 0 : i32
    %c0_i32_0 = arith.constant 0 : i32
    %c0_i32_1 = arith.constant 0 : i32
    return %c0_i32, %c0_i32_0 : i32, i32
  }
  func.func @transform_5(%arg0: i32) -> (i32, i32) {
    %c0_i32 = arith.constant 0 : i32
    %c0_i32_0 = arith.constant 0 : i32
    %c0_i32_1 = arith.constant 0 : i32
    return %c0_i32, %c0_i32_0 : i32, i32
  }
  func.func @transform_6(%arg0: i32) -> (i32, i32) {
    %c0_i32 = arith.constant 0 : i32
    %c0_i32_0 = arith.constant 0 : i32
    %c0_i32_1 = arith.constant 0 : i32
    return %c0_i32, %c0_i32_0 : i32, i32
  }
  func.func @transform_7(%arg0: i32) -> (i32, i32, i32) {
    %c0_i32 = arith.constant 0 : i32
    %c0_i32_0 = arith.constant 0 : i32
    %c0_i32_1 = arith.constant 0 : i32
    %c0_i32_2 = arith.constant 0 : i32
    return %c0_i32, %c0_i32_0, %c0_i32_1 : i32, i32, i32
  }
  func.func @transform_8(%arg0: i32) -> (i32, i32) {
    %c0_i32 = arith.constant 0 : i32
    %c0_i32_0 = arith.constant 0 : i32
    %c0_i32_1 = arith.constant 0 : i32
    return %c0_i32, %c0_i32_0 : i32, i32
  }
  func.func @transform_9(%arg0: i32) -> (i32, i32) {
    %c0_i32 = arith.constant 0 : i32
    %c0_i32_0 = arith.constant 0 : i32
    %c0_i32_1 = arith.constant 0 : i32
    return %c0_i32, %c0_i32_0 : i32, i32
  }
  func.func @transform_10(%arg0: i32) -> (i32, i32, i32) {
    %c0_i32 = arith.constant 0 : i32
    %c0_i32_0 = arith.constant 0 : i32
    %c0_i32_1 = arith.constant 0 : i32
    %c0_i32_2 = arith.constant 0 : i32
    return %c0_i32, %c0_i32_0, %c0_i32_1 : i32, i32, i32
  }
  func.func @transform_11(%arg0: i32) -> (i32, i32) {
    %c0_i32 = arith.constant 0 : i32
    %c0_i32_0 = arith.constant 0 : i32
    %c0_i32_1 = arith.constant 0 : i32
    return %c0_i32, %c0_i32_0 : i32, i32
  }
  func.func @transform_12(%arg0: i32) -> (i32, i32) {
    %c0_i32 = arith.constant 0 : i32
    %c0_i32_0 = arith.constant 0 : i32
    %c0_i32_1 = arith.constant 0 : i32
    return %c0_i32, %c0_i32_0 : i32, i32
  }
  func.func @transform_13(%arg0: i32) -> (i32, i32, i32) {
    %c0_i32 = arith.constant 0 : i32
    %c0_i32_0 = arith.constant 0 : i32
    %c0_i32_1 = arith.constant 0 : i32
    %c0_i32_2 = arith.constant 0 : i32
    return %c0_i32, %c0_i32_0, %c0_i32_1 : i32, i32, i32
  }
  func.func @transform_14(%arg0: i32) -> (i32, i32) {
    %c0_i32 = arith.constant 0 : i32
    %c0_i32_0 = arith.constant 0 : i32
    %c0_i32_1 = arith.constant 0 : i32
    return %c0_i32, %c0_i32_0 : i32, i32
  }
  func.func @transform_15(%arg0: i32) -> (i32, i32) {
    %c0_i32 = arith.constant 0 : i32
    %c0_i32_0 = arith.constant 0 : i32
    %c0_i32_1 = arith.constant 0 : i32
    return %c0_i32, %c0_i32_0 : i32, i32
  }
  func.func @transform_16(%arg0: i32) -> (i32, i32, i32, i32) {
    %c0_i32 = arith.constant 0 : i32
    %c0_i32_0 = arith.constant 0 : i32
    %c0_i32_1 = arith.constant 0 : i32
    %c0_i32_2 = arith.constant 0 : i32
    return %arg0, %c0_i32, %c0_i32_0, %c0_i32_1 : i32, i32, i32, i32
  }
}

</mosaic_0001>

<bundles_post_ra>
// kernel: c3k2_forward.1
= control target key start
LH: loop header
LB: loop body
LE: loop exit
PB: predicated region body
PF: predicated region fallthrough
CT: control target
= control target key end

     0   :  { %s14940_s21 = smov 0   ;;  %s18366_s0 = inlined_call_operand.vmem [shape: f32[2,16,16,16], index: 0, kind: input, shape index: {}]   ;;  %s18367_s1 = inlined_call_operand.vmem [shape: f32[16,8], index: 1, kind: input, shape index: {}]   ;;  %s18368_s2 = inlined_call_operand.vmem [shape: f32[1,8], index: 2, kind: input, shape index: {}]   ;;  %s18369_s3 = inlined_call_operand.vmem [shape: f32[1,8], index: 3, kind: input, shape index: {}]   ;;  %s18370_s4 = inlined_call_operand.vmem [shape: f32[16,8], index: 4, kind: input, shape index: {}]   ;;  %s18371_s5 = inlined_call_operand.vmem [shape: f32[1,8], index: 5, kind: input, shape index: {}]   ;;  %s18372_s6 = inlined_call_operand.vmem [shape: f32[1,8], index: 6, kind: input, shape index: {}]   ;;  %s18373_s7 = inlined_call_operand.vmem [shape: f32[9,8,4], index: 7, kind: input, shape index: {}]   ;;  %s18374_s8 = inlined_call_operand.vmem [shape: f32[1,4], index: 8, kind: input, shape index: {}]   ;;  %s18375_s9 = inlined_call_operand.vmem [shape: f32[1,4], index: 9, kind: input, shape index: {}]   ;;  %s18376_s10 = inlined_call_operand.vmem [shape: f32[9,4,8], index: 10, kind: input, shape index: {}]   ;;  %s18377_s11 = inlined_call_operand.vmem [shape: f32[1,8], index: 11, kind: input, shape index: {}]   ;;  %s18378_s12 = inlined_call_operand.vmem [shape: f32[1,8], index: 12, kind: input, shape index: {}]   ;;  %s18379_s13 = inlined_call_operand.vmem [shape: f32[3,8,16], index: 13, kind: input, shape index: {}]   ;;  %s18380_s14 = inlined_call_operand.vmem [shape: f32[1,16], index: 14, kind: input, shape index: {}]   ;;  %s18381_s15 = inlined_call_operand.vmem [shape: f32[1,16], index: 15, kind: input, shape index: {}]   ;;  %s18382_s16 = inlined_call_operand.vmem [shape: f32[2,16,16,16], index: 16, kind: output, shape index: {}]  }
   0x1   :  { %18560 = sst [smem:[#allocation111_spill]] %s18366_s0 }
   0x2 LB: > { %s10750_s22 = sadd.s32 4294967295, %s14852_s21   ;;  %p10754_p0 = scmp.ge.s32.totalorder %s14852_s21, 1  ;;  %s14852_s21 = sphi %s14940_s21, %s26_s21  }
   0x3   : > { %p462_p1 = scmp.lt.s32.totalorder %s14852_s21, 3 }
   0x5   : > { %p463_p2 = pnand %p10754_p0, %p462_p1 }
   0x7   : > { %466 = sbr.rel (%p463_p2) target bundleno = 2150 (0x866), region = 84 }
   0xe   : > { %v640_v0 = vld [vmem:[%s18367_s1] sm:$0xff]  ;;  %v641_v1 = vld [vmem:[%s18367_s1 + $0x8] sm:$0xff]  ;;  %p512_p3 = scmp.lt.s32.totalorder %s10750_s22, 1  ;;  %vm642_vm0 = vcmask 130048   ;;  %s18561_s19 = sld [smem:[#allocation111_spill]]  ;;  %vm554_vm1 = vcmask 64512  }
   0xf   : > { %v1266_v2 = vld [vmem:[%s18370_s4] sm:$0xff]  ;;  %v13611_v3 = vpack.c.bf16 %v641_v1, %v640_v0  ;;  %v1267_v4 = vld [vmem:[%s18370_s4 + $0x8] sm:$0xff]  ;;  %v18383_v38 = vmov 0.0   ;;  %vm557_vm2 = vcmask 58368   ;;  %vm564_vm3 = vcmask 57344   ;;  %v15193_v58 = vld [vmem:[%s18373_s7 + $0x10] sm:$0xff] }
  0x10   : > { %s18901_s22 = smov (!%p512_p3, %s10750_s22), 1  ;;  %v13615_v5 = vpack.c.bf16 %v1267_v4, %v1266_v2  ;;  %555 = vst.msk [vmem:[#allocation2] sm:$0xff] %vm554_vm1, %v18383_v38  ;;  %556 = vst.msk [vmem:[#allocation2 + $0x8] sm:$0xff] %vm554_vm1, %v18383_v38  ;;  %v10891_v39 = vld [vmem:[%s18373_s7 + $0x8] sm:$0xff]  ;;  %v1859_v42 = vld [vmem:[%s18373_s7] sm:$0xff]  ;;  %vm597_vm4 = vcmask 31744  }
  0x11   : > { %13612 = vmatprep.subr.bf16.mxu1 %v13611_v3  ;;  %s11694_s0 = sshll.u32 %s18901_s22, 8  ;;  %560 = vst.msk [vmem:[#allocation2 + $0x198] sm:$0xff] %vm554_vm1, %v18383_v38  ;;  %561 = vst.msk [vmem:[#allocation2 + $0x1a0] sm:$0xff] %vm554_vm1, %v18383_v38  ;;  %12561 = vmatprep.subr.mxu0 %v10891_v39  ;;  %vm600_vm5 = vcmask 25600   ;;  %vm607_vm6 = vcmask 24576   ;;  %vm5743_vm7 = vcmask 1043456  }
  0x12   : > { %13614 = vmatpush3.bf16.msra.mxu1 %v13611_v3  ;;  %558 = vst.msk [vmem:[#allocation2 + $0x10] sm:$0x3] %vm557_vm2, %v18383_v38  ;;  %562 = vst.msk [vmem:[#allocation2 + $0x1a8] sm:$0x3] %vm557_vm2, %v18383_v38  ;;  %12562 = vmatpush3.msra.mxu0 %v10891_v39  ;;  %s18170_s27 = scalar_lea.vmem %s18382_s16, %s11694_s0 }
  0x13   : > { %13616 = vmatprep.subr.bf16.mxu1 %v13615_v5  ;;  %565 = vst.msk [vmem:[#allocation2 + $0x18] sm:$0x1] %vm564_vm3, %v18383_v38  ;;  %566 = vst.msk [vmem:[#allocation2 + $0x30] sm:$0x1] %vm564_vm3, %v18383_v38  ;;  %12611 = vmatprep.subr.mxu0 %v1859_v42 }
  0x14   : > { %s14968_s20 = scalar_lea.vmem %s18561_s19, %s11694_s0  ;;  %567 = vst.msk [vmem:[#allocation2 + $0x48] sm:$0x1] %vm564_vm3, %v18383_v38  ;;  %568 = vst.msk [vmem:[#allocation2 + $0x60] sm:$0x1] %vm564_vm3, %v18383_v38 }
  0x15   : > { %v14971_v6 = vld [vmem:[%s14968_s20] sm:$0xff]  ;;  %v14974_v7 = vld [vmem:[%s14968_s20 + $0x8] sm:$0xff]  ;;  %v14977_v8 = vld [vmem:[%s14968_s20 + $0x10] sm:$0xff]  ;;  %569 = vst.msk [vmem:[#allocation2 + $0x78] sm:$0x1] %vm564_vm3, %v18383_v38 }
  0x16   : > { %12461 = vmatprep.mubr.msk.f32.mxu1 %vm642_vm0, %v14971_v6  ;;  %v525_v9 = vld [vmem:[%s14968_s20 + $0x18] sm:$0xff]  ;;  %v526_v10 = vld [vmem:[%s14968_s20 + $0x20] sm:$0xff]  ;;  %v527_v11 = vld [vmem:[%s14968_s20 + $0x28] sm:$0xff]  ;;  %570 = vst.msk [vmem:[#allocation2 + $0x90] sm:$0x1] %vm564_vm3, %v18383_v38 }
  0x17   : > { %12462 = vmatmul.mubr.msk.f32.vlgmr.msra.gmra.mrb[0].mxu1 %vm642_vm0, %v14974_v7  ;;  %v528_v12 = vld [vmem:[%s14968_s20 + $0x30] sm:$0xff]  ;;  %v529_v13 = vld [vmem:[%s14968_s20 + $0x38] sm:$0xff]  ;;  %v530_v14 = vld [vmem:[%s14968_s20 + $0x40] sm:$0xff]  ;;  %571 = vst.msk [vmem:[#allocation2 + $0xa8] sm:$0x1] %vm564_vm3, %v18383_v38 }
  0x18   : > { %13618 = vmatpush3.bf16.msra.mxu1 %v13615_v5  ;;  %12464 = vmatprep.mubr.msk.f32.mxu1 %vm642_vm0, %v14977_v8  ;;  %v531_v15 = vld [vmem:[%s14968_s20 + $0x48] sm:$0xff]  ;;  %v532_v16 = vld [vmem:[%s14968_s20 + $0x50] sm:$0xff]  ;;  %v533_v17 = vld [vmem:[%s14968_s20 + $0x58] sm:$0xff]  ;;  %572 = vst.msk [vmem:[#allocation2 + $0xc0] sm:$0x1] %vm564_vm3, %v18383_v38 }
  0x19   : > { %v534_v18 = vld [vmem:[%s14968_s20 + $0x60] sm:$0xff]  ;;  %v535_v19 = vld [vmem:[%s14968_s20 + $0x68] sm:$0xff]  ;;  %v536_v20 = vld [vmem:[%s14968_s20 + $0x70] sm:$0xff]  ;;  %573 = vst.msk [vmem:[#allocation2 + $0xd8] sm:$0x1] %vm564_vm3, %v18383_v38  ;;  %13619 = vmatprep.subr.mxu1 %v10891_v39 }
  0x1a   : > { %v537_v21 = vld [vmem:[%s14968_s20 + $0x78] sm:$0xff]  ;;  %v538_v22 = vld [vmem:[%s14968_s20 + $0x80] sm:$0xff]  ;;  %v539_v23 = vld [vmem:[%s14968_s20 + $0x88] sm:$0xff]  ;;  %574 = vst.msk [vmem:[#allocation2 + $0xf0] sm:$0x1] %vm564_vm3, %v18383_v38 }
  0x1b   : > { %12465 = vmatmul.mubr.msk.f32.gmra.mrb[2].mxu1 %vm642_vm0, %v525_v9  ;;  %v540_v24 = vld [vmem:[%s14968_s20 + $0x90] sm:$0xff]  ;;  %v541_v25 = vld [vmem:[%s14968_s20 + $0x98] sm:$0xff]  ;;  %v542_v26 = vld [vmem:[%s14968_s20 + $0xa0] sm:$0xff]  ;;  %575 = vst.msk [vmem:[#allocation2 + $0x108] sm:$0x1] %vm564_vm3, %v18383_v38 }
  0x1c   : > { %12467 = vmatprep.mubr.msk.f32.mxu1 %vm642_vm0, %v526_v10  ;;  %v543_v27 = vld [vmem:[%s14968_s20 + $0xa8] sm:$0xff]  ;;  %v544_v28 = vld [vmem:[%s14968_s20 + $0xb0] sm:$0xff]  ;;  %v545_v29 = vld [vmem:[%s14968_s20 + $0xb8] sm:$0xff]  ;;  %576 = vst.msk [vmem:[#allocation2 + $0x120] sm:$0x1] %vm564_vm3, %v18383_v38 }
  0x1d   : > { %v546_v30 = vld [vmem:[%s14968_s20 + $0xc0] sm:$0xff]  ;;  %v547_v31 = vld [vmem:[%s14968_s20 + $0xc8] sm:$0xff]  ;;  %v548_v32 = vld [vmem:[%s14968_s20 + $0xd0] sm:$0xff]  ;;  %577 = vst.msk [vmem:[#allocation2 + $0x138] sm:$0x1] %vm564_vm3, %v18383_v38 }
  0x1e   : > { %v549_v33 = vld [vmem:[%s14968_s20 + $0xd8] sm:$0xff]  ;;  %v550_v34 = vld [vmem:[%s14968_s20 + $0xe0] sm:$0xff]  ;;  %v551_v35 = vld [vmem:[%s14968_s20 + $0xe8] sm:$0xff]  ;;  %578 = vst.msk [vmem:[#allocation2 + $0x150] sm:$0x1] %vm564_vm3, %v18383_v38 }
  0x1f   : > { %12468 = vmatmul.mubr.msk.f32.gmra.mrb[4].mxu1 %vm642_vm0, %v527_v11  ;;  %v552_v36 = vld [vmem:[%s14968_s20 + $0xf0] sm:$0xff]  ;;  %v553_v37 = vld [vmem:[%s14968_s20 + $0xf8] sm:$0xff]  ;;  %579 = vst.msk [vmem:[#allocation2 + $0x168] sm:$0x1] %vm564_vm3, %v18383_v38  ;;  %580 = vst.msk [vmem:[#allocation2 + $0x180] sm:$0x1] %vm564_vm3, %v18383_v38 }
  0x20   : > { %12470 = vmatprep.mubr.msk.f32.mxu1 %vm642_vm0, %v528_v12  ;;  %581 = vst.msk [vmem:[#allocation2 + $0x29] sm:$0x1] %vm564_vm3, %v18383_v38  ;;  %582 = vst.msk [vmem:[#allocation2 + $0x41] sm:$0x1] %vm564_vm3, %v18383_v38  ;;  %v1860_v40 = vld [vmem:[#allocation2 + $0x1] sm:$0xff]  ;;  %v1861_v41 = vld [vmem:[#allocation2 + $0x9] sm:$0xff] }
  0x21   : > { %583 = vst.msk [vmem:[#allocation2 + $0x59] sm:$0x1] %vm564_vm3, %v18383_v38  ;;  %584 = vst.msk [vmem:[#allocation2 + $0x71] sm:$0x1] %vm564_vm3, %v18383_v38  ;;  %12563 = vmatprep.mubr.msk.f32.mxu0 %vm554_vm1, %v1860_v40 }
  0x22   : > { %585 = vst.msk [vmem:[#allocation2 + $0x89] sm:$0x1] %vm564_vm3, %v18383_v38  ;;  %586 = vst.msk [vmem:[#allocation2 + $0xa1] sm:$0x1] %vm564_vm3, %v18383_v38  ;;  %12564 = vmatmul.mubr.msk.f32.vlgmr.msra.gmra.mrb[0].mxu0 %vm554_vm1, %v1861_v41 }
  0x23   : > { %12471 = vmatmul.mubr.msk.f32.gmra.mrb[6].mxu1 %vm642_vm0, %v529_v13  ;;  %587 = vst.msk [vmem:[#allocation2 + $0xb9] sm:$0x1] %vm564_vm3, %v18383_v38  ;;  %588 = vst.msk [vmem:[#allocation2 + $0xd1] sm:$0x1] %vm564_vm3, %v18383_v38  ;;  %12612 = vmatpush3.msra.mxu0 %v1859_v42 }
  0x24   : > { %12473 = vmatprep.mubr.msk.f32.mxu1 %vm642_vm0, %v530_v14  ;;  %589 = vst.msk [vmem:[#allocation2 + $0xe9] sm:$0x1] %vm564_vm3, %v18383_v38  ;;  %590 = vst.msk [vmem:[#allocation2 + $0x101] sm:$0x1] %vm564_vm3, %v18383_v38  ;;  %12661 = vmatprep.subr.mxu0 %v15193_v58 }
  0x25   : > { %591 = vst.msk [vmem:[#allocation2 + $0x119] sm:$0x1] %vm564_vm3, %v18383_v38  ;;  %592 = vst.msk [vmem:[#allocation2 + $0x131] sm:$0x1] %vm564_vm3, %v18383_v38 }
  0x26   : > { %593 = vst.msk [vmem:[#allocation2 + $0x149] sm:$0x1] %vm564_vm3, %v18383_v38  ;;  %594 = vst.msk [vmem:[#allocation2 + $0x161] sm:$0x1] %vm564_vm3, %v18383_v38 }
  0x27   : > { %12474 = vmatmul.mubr.msk.f32.gmra.mrb[8].mxu1 %vm642_vm0, %v531_v15  ;;  %595 = vst.msk [vmem:[#allocation2 + $0x179] sm:$0x1] %vm564_vm3, %v18383_v38  ;;  %596 = vst.msk [vmem:[#allocation2 + $0x191] sm:$0x1] %vm564_vm3, %v18383_v38 }
  0x28   : > { %12476 = vmatprep.mubr.msk.f32.mxu1 %vm642_vm0, %v532_v16 }
  0x2b   : > { %12477 = vmatmul.mubr.msk.f32.gmra.mrb[10].mxu1 %vm642_vm0, %v533_v17 }
  0x2c   : > { %12479 = vmatprep.mubr.msk.f32.mxu1 %vm642_vm0, %v534_v18 }
  0x2f   : > { %12480 = vmatmul.mubr.msk.f32.gmra.mrb[12].mxu1 %vm642_vm0, %v535_v19 }
  0x30   : > { %12482 = vmatprep.mubr.msk.f32.mxu1 %vm642_vm0, %v536_v20 }
  0x33   : > { %12483 = vmatmul.mubr.msk.f32.gmra.mrb[14].mxu1 %vm642_vm0, %v537_v21 }
  0x34   : > { %12485 = vmatprep.mubr.msk.f32.mxu1 %vm642_vm0, %v538_v22 }
  0x37   : > { %12486 = vmatmul.mubr.msk.f32.gmra.mrb[16].mxu1 %vm642_vm0, %v539_v23 }
  0x38   : > { %12488 = vmatprep.mubr.msk.f32.mxu1 %vm642_vm0, %v540_v24 }
  0x3b   : > { %12489 = vmatmul.mubr.msk.f32.gmra.mrb[18].mxu1 %vm642_vm0, %v541_v25 }
  0x3c   : > { %12491 = vmatprep.mubr.msk.f32.mxu1 %vm642_vm0, %v542_v26 }
  0x3f   : > { %12492 = vmatmul.mubr.msk.f32.gmra.mrb[20].mxu1 %vm642_vm0, %v543_v27 }
  0x40   : > { %12494 = vmatprep.mubr.msk.f32.mxu1 %vm642_vm0, %v544_v28 }
  0x43   : > { %12495 = vmatmul.mubr.msk.f32.gmra.mrb[22].mxu1 %vm642_vm0, %v545_v29 }
  0x44   : > { %12497 = vmatprep.mubr.msk.f32.mxu1 %vm642_vm0, %v546_v30 }
  0x47   : > { %12498 = vmatmul.mubr.msk.f32.gmra.mrb[24].mxu1 %vm642_vm0, %v547_v31 }
  0x48   : > { %12500 = vmatprep.mubr.msk.f32.mxu1 %vm642_vm0, %v548_v32 }
  0x4b   : > { %12501 = vmatmul.mubr.msk.f32.gmra.mrb[26].mxu1 %vm642_vm0, %v549_v33 }
  0x4c   : > { %12503 = vmatprep.mubr.msk.f32.mxu1 %vm642_vm0, %v550_v34 }
  0x4f   : > { %12504 = vmatmul.mubr.msk.f32.gmra.mrb[28].mxu1 %vm642_vm0, %v551_v35 }
  0x50   : > { %12506 = vmatprep.mubr.msk.f32.mxu1 %vm642_vm0, %v552_v36 }
  0x53   : > { %12507 = vmatmul.mubr.msk.f32.gmra.mrb[30].mxu1 %vm642_vm0, %v553_v37 }
  0x54   : > { %12513 = vmatprep.mubr.msk.f32.mxu1 %vm642_vm0, %v14971_v6 }
  0x57   : > { %12514 = vmatmul.mubr.msk.f32.vlgmr.msra.gmra.mrb[32].mxu1 %vm642_vm0, %v14974_v7 }
  0x58   : > { %12516 = vmatprep.mubr.msk.f32.mxu1 %vm642_vm0, %v14977_v8  ;;  %13620 = vmatpush3.msra.mxu1 %v10891_v39 }
  0x5b   : > { %12517 = vmatmul.mubr.msk.f32.gmra.mrb[34].mxu1 %vm642_vm0, %v525_v9 }
  0x5c   : > { %12519 = vmatprep.mubr.msk.f32.mxu1 %vm642_vm0, %v526_v10 }
  0x5f   : > { %12520 = vmatmul.mubr.msk.f32.gmra.mrb[36].mxu1 %vm642_vm0, %v527_v11 }
  0x60   : > { %12522 = vmatprep.mubr.msk.f32.mxu1 %vm642_vm0, %v528_v12  ;;  %v15233_v12 = vld [vmem:[%s18371_s5] ss:$0 sm:$0xff] }
  0x63   : > { %12523 = vmatmul.mubr.msk.f32.gmra.mrb[38].mxu1 %vm642_vm0, %v529_v13 }
  0x64   : > { %12525 = vmatprep.mubr.msk.f32.mxu1 %vm642_vm0, %v530_v14  ;;  %v15238_v14 = vld [vmem:[%s18372_s6] ss:$0 sm:$0xff] }
  0x67   : > { %12526 = vmatmul.mubr.msk.f32.gmra.mrb[40].mxu1 %vm642_vm0, %v531_v15 }
  0x68   : > { %12528 = vmatprep.mubr.msk.f32.mxu1 %vm642_vm0, %v532_v16 }
  0x6b   : > { %12529 = vmatmul.mubr.msk.f32.gmra.mrb[42].mxu1 %vm642_vm0, %v533_v17 }
  0x6c   : > { %12531 = vmatprep.mubr.msk.f32.mxu1 %vm642_vm0, %v534_v18 }
  0x6f   : > { %12532 = vmatmul.mubr.msk.f32.gmra.mrb[44].mxu1 %vm642_vm0, %v535_v19 }
  0x70   : > { %12534 = vmatprep.mubr.msk.f32.mxu1 %vm642_vm0, %v536_v20 }
  0x73   : > { %12535 = vmatmul.mubr.msk.f32.gmra.mrb[46].mxu1 %vm642_vm0, %v537_v21 }
  0x74   : > { %12537 = vmatprep.mubr.msk.f32.mxu1 %vm642_vm0, %v538_v22 }
  0x77   : > { %12538 = vmatmul.mubr.msk.f32.gmra.mrb[48].mxu1 %vm642_vm0, %v539_v23 }
  0x78   : > { %12540 = vmatprep.mubr.msk.f32.mxu1 %vm642_vm0, %v540_v24 }
  0x7b   : > { %12541 = vmatmul.mubr.msk.f32.gmra.mrb[50].mxu1 %vm642_vm0, %v541_v25 }
  0x7c   : > { %12543 = vmatprep.mubr.msk.f32.mxu1 %vm642_vm0, %v542_v26 }
  0x7f   : > { %12544 = vmatmul.mubr.msk.f32.gmra.mrb[52].mxu1 %vm642_vm0, %v543_v27 }
  0x80   : > { %12546 = vmatprep.mubr.msk.f32.mxu1 %vm642_vm0, %v544_v28 }
  0x83   : > { %12547 = vmatmul.mubr.msk.f32.gmra.mrb[54].mxu1 %vm642_vm0, %v545_v29 }
  0x84   : > { %12549 = vmatprep.mubr.msk.f32.mxu1 %vm642_vm0, %v546_v30 }
  0x87   : > { %12550 = vmatmul.mubr.msk.f32.gmra.mrb[56].mxu1 %vm642_vm0, %v547_v31 }
  0x88   : > { %12552 = vmatprep.mubr.msk.f32.mxu1 %vm642_vm0, %v548_v32 }
  0x8b   : > { %12553 = vmatmul.mubr.msk.f32.gmra.mrb[58].mxu1 %vm642_vm0, %v549_v33 }
  0x8c   : > { %12555 = vmatprep.mubr.msk.f32.mxu1 %vm642_vm0, %v550_v34 }
  0x8f   : > { %12556 = vmatmul.mubr.msk.f32.gmra.mrb[60].mxu1 %vm642_vm0, %v551_v35 }
  0x90   : > { %12558 = vmatprep.mubr.msk.f32.mxu1 %vm642_vm0, %v552_v36 }
  0x93   : > { %12559 = vmatmul.mubr.msk.f32.gmra.mrb[62].mxu1 %vm642_vm0, %v553_v37 }
  0xea   : > { %v15160_v43 = vpop.f32.mrb[0].mxu1 }
  0xeb   : > { %18562 = vst [vmem:[#allocation4_spill] sm:$0xff] %v15160_v43  ;;  %v15162_v44 = vpop.f32.mrb[1].mxu1 }
  0xec   : > { %18563 = vst [vmem:[#allocation5_spill] sm:$0xff] %v15162_v44 }
  0xee   : > { %v15164_v45 = vpop.f32.mrb[2].mxu1 }
  0xef   : > { %18564 = vst [vmem:[#allocation6_spill] sm:$0xff] %v15164_v45  ;;  %v15166_v46 = vpop.f32.mrb[3].mxu1 }
  0xf0   : > { %18565 = vst [vmem:[#allocation7_spill] sm:$0xff] %v15166_v46 }
  0xf2   : > { %v15168_v47 = vpop.f32.mrb[4].mxu1 }
  0xf3   : > { %18566 = vst [vmem:[#allocation8_spill] sm:$0xff] %v15168_v47  ;;  %v15170_v48 = vpop.f32.mrb[5].mxu1 }
  0xf4   : > { %18567 = vst [vmem:[#allocation9_spill] sm:$0xff] %v15170_v48 }
  0xf6   : > { %v15172_v49 = vpop.f32.mrb[6].mxu1 }
  0xf7   : > { %18568 = vst [vmem:[#allocation10_spill] sm:$0xff] %v15172_v49  ;;  %v15174_v50 = vpop.f32.mrb[7].mxu1 }
  0xf8   : > { %18569 = vst [vmem:[#allocation11_spill] sm:$0xff] %v15174_v50 }
  0xfa   : > { %v15176_v51 = vpop.f32.mrb[8].mxu1 }
  0xfb   : > { %18570 = vst [vmem:[#allocation12_spill] sm:$0xff] %v15176_v51  ;;  %v15178_v52 = vpop.f32.mrb[9].mxu1 }
  0xfc   : > { %18571 = vst [vmem:[#allocation13_spill] sm:$0xff] %v15178_v52 }
  0xfe   : > { %v15180_v53 = vpop.f32.mrb[10].mxu1 }
  0xff   : > { %18572 = vst [vmem:[#allocation14_spill] sm:$0xff] %v15180_v53  ;;  %v15182_v54 = vpop.f32.mrb[11].mxu1 }
 0x100   : > { %18573 = vst [vmem:[#allocation15_spill] sm:$0xff] %v15182_v54 }
 0x102   : > { %v15184_v55 = vpop.f32.mrb[12].mxu1 }
 0x103   : > { %18574 = vst [vmem:[#allocation16_spill] sm:$0xff] %v15184_v55  ;;  %v15186_v56 = vpop.f32.mrb[13].mxu1 }
 0x104   : > { %18575 = vst [vmem:[#allocation17_spill] sm:$0xff] %v15186_v56 }
 0x106   : > { %v15188_v57 = vpop.f32.mrb[14].mxu1 }
 0x107   : > { %18576 = vst [vmem:[#allocation18_spill] sm:$0xff] %v15188_v57  ;;  %v15195_v59 = vpop.f32.mrb[15].mxu1 }
 0x108   : > { %18577 = vst [vmem:[#allocation19_spill] sm:$0xff] %v15195_v59 }
 0x10a   : > { %v15198_v60 = vpop.f32.mrb[16].mxu1 }
 0x10b   : > { %18578 = vst [vmem:[#allocation20_spill] sm:$0xff] %v15198_v60  ;;  %v15200_v61 = vpop.f32.mrb[17].mxu1 }
 0x10c   : > { %18579 = vst [vmem:[#allocation21_spill] sm:$0xff] %v15200_v61 }
 0x10e   : > { %v15202_v62 = vpop.f32.mrb[18].mxu1 }
 0x10f   : > { %18580 = vst [vmem:[#allocation22_spill] sm:$0xff] %v15202_v62  ;;  %v15204_v63 = vpop.f32.mrb[19].mxu1 }
 0x110   : > { %18581 = vst [vmem:[#allocation23_spill] sm:$0xff] %v15204_v63 }
 0x112   : > { %v15206_v0 = vpop.f32.mrb[20].mxu1 }
 0x113   : > { %18582 = vst [vmem:[#allocation24_spill] sm:$0xff] %v15206_v0  ;;  %v15208_v1 = vpop.f32.mrb[21].mxu1 }
 0x114   : > { %18583 = vst [vmem:[#allocation25_spill] sm:$0xff] %v15208_v1 }
 0x116   : > { %v15210_v2 = vpop.f32.mrb[22].mxu1 }
 0x117   : > { %18584 = vst [vmem:[#allocation26_spill] sm:$0xff] %v15210_v2  ;;  %v15212_v3 = vpop.f32.mrb[23].mxu1 }
 0x118   : > { %18585 = vst [vmem:[#allocation27_spill] sm:$0xff] %v15212_v3 }
 0x11a   : > { %v15214_v4 = vpop.f32.mrb[24].mxu1 }
 0x11b   : > { %18586 = vst [vmem:[#allocation28_spill] sm:$0xff] %v15214_v4  ;;  %v15216_v5 = vpop.f32.mrb[25].mxu1 }
 0x11c   : > { %18587 = vst [vmem:[#allocation29_spill] sm:$0xff] %v15216_v5 }
 0x11e   : > { %v15218_v6 = vpop.f32.mrb[26].mxu1 }
 0x11f   : > { %18588 = vst [vmem:[#allocation30_spill] sm:$0xff] %v15218_v6  ;;  %v15220_v7 = vpop.f32.mrb[27].mxu1 }
 0x120   : > { %18589 = vst [vmem:[#allocation31_spill] sm:$0xff] %v15220_v7 }
 0x122   : > { %v15222_v8 = vpop.f32.mrb[28].mxu1 }
 0x123   : > { %18590 = vst [vmem:[#allocation32_spill] sm:$0xff] %v15222_v8  ;;  %v15224_v9 = vpop.f32.mrb[29].mxu1 }
 0x124   : > { %18591 = vst [vmem:[#allocation33_spill] sm:$0xff] %v15224_v9 }
 0x126   : > { %v15226_v10 = vpop.f32.mrb[30].mxu1 }
 0x127   : > { %18592 = vst [vmem:[#allocation34_spill] sm:$0xff] %v15226_v10  ;;  %v15228_v11 = vpop.f32.mrb[31].mxu1 }
 0x128   : > { %18593 = vst [vmem:[#allocation35_spill] sm:$0xff] %v15228_v11 }
 0x12a   : > { %v12515_v13 = vpop.f32.mrb[32].mxu1 }
 0x12b   : > { %v1501_v15 = vmul.f32 %v12515_v13, %v15233_v12  ;;  %v1334_v16 = vpop.f32.mrb[33].mxu1 }
 0x12c   : > { %v1500_v17 = vmul.f32 %v15233_v12, %v1334_v16 }
 0x12d   : > { %v15243_v18 = vadd.f32 %v15238_v14, %v1501_v15 }
 0x12e   : > { %v15246_v19 = vadd.f32 %v15238_v14, %v1500_v17  ;;  %v12518_v20 = vpop.f32.mrb[34].mxu1 }
 0x12f   : > { %v10860_v21 = vmul.f32 -1.442695, %v15243_v18  ;;  %v1503_v22 = vmul.f32 %v12518_v20, %v15233_v12  ;;  %v1344_v23 = vpop.f32.mrb[35].mxu1 }
 0x130   : > { %v10859_v24 = vmul.f32 -1.442695, %v15246_v19  ;;  %v1502_v25 = vmul.f32 %v15233_v12, %v1344_v23 }
 0x131   : > { %v15253_v26 = vadd.f32 %v15238_v14, %v1503_v22  ;;  %14206 = vpow2.f32 %v10860_v21 }
 0x132   : > { %v15256_v27 = vadd.f32 %v15238_v14, %v1502_v25  ;;  %v12521_v28 = vpop.f32.mrb[36].mxu1  ;;  %14208 = vpow2.f32 %v10859_v24 }
 0x133   : > { %v10862_v29 = vmul.f32 -1.442695, %v15253_v26  ;;  %v1505_v30 = vmul.f32 %v12521_v28, %v15233_v12  ;;  %v1354_v31 = vpop.f32.mrb[37].mxu1 }
 0x134   : > { %v10861_v32 = vmul.f32 -1.442695, %v15256_v27  ;;  %v1504_v33 = vmul.f32 %v15233_v12, %v1354_v31 }
 0x135   : > { %14210 = vpow2.f32 %v10862_v29  ;;  %v15263_v34 = vadd.f32 %v15238_v14, %v1505_v30 }
 0x136   : > { %v15266_v35 = vadd.f32 %v15238_v14, %v1504_v33  ;;  %v12524_v36 = vpop.f32.mrb[38].mxu1  ;;  %14212 = vpow2.f32 %v10861_v32 }
 0x137   : > { %v10864_v37 = vmul.f32 -1.442695, %v15263_v34  ;;  %v1507_v39 = vmul.f32 %v12524_v36, %v15233_v12  ;;  %v1364_v40 = vpop.f32.mrb[39].mxu1 }
 0x138   : > { %v10863_v41 = vmul.f32 -1.442695, %v15266_v35  ;;  %v1506_v42 = vmul.f32 %v15233_v12, %v1364_v40 }
 0x139   : > { %14214 = vpow2.f32 %v10864_v37  ;;  %v15273_v13 = vadd.f32 %v15238_v14, %v1507_v39 }
 0x13a   : > { %v15276_v15 = vadd.f32 %v15238_v14, %v1506_v42  ;;  %v12527_v16 = vpop.f32.mrb[40].mxu1  ;;  %14216 = vpow2.f32 %v10863_v41 }
 0x13b   : > { %v10866_v17 = vmul.f32 -1.442695, %v15273_v13  ;;  %v1509_v20 = vmul.f32 %v12527_v16, %v15233_v12  ;;  %v1374_v21 = vpop.f32.mrb[41].mxu1  ;;  %v14207_v24 = vpop.eup %14206 }
 0x13c   : > { %v10865_v22 = vmul.f32 -1.442695, %v15276_v15  ;;  %v1508_v23 = vmul.f32 %v15233_v12, %v1374_v21  ;;  %v14209_v28 = vpop.eup %14208  ;;  %v1668_v29 = vadd.f32 1.0, %v14207_v24 }
 0x13d   : > { %14218 = vpow2.f32 %v10866_v17  ;;  %v15283_v25 = vadd.f32 %v15238_v14, %v1509_v20  ;;  %v1667_v33 = vadd.f32 1.0, %v14209_v28 }
 0x13e   : > { %v15286_v30 = vadd.f32 %v15238_v14, %v1508_v23  ;;  %v12530_v31 = vpop.f32.mrb[42].mxu1  ;;  %14220 = vpow2.f32 %v10865_v22 }
 0x13f   : > { %v14211_v32 = vpop.eup %14210  ;;  %v10868_v36 = vmul.f32 -1.442695, %v15283_v25  ;;  %v1511_v37 = vmul.f32 %v12530_v31, %v15233_v12  ;;  %v1384_v39 = vpop.f32.mrb[43].mxu1  ;;  %14222 = vrcp.f32 %v1668_v29 }
 0x140   : > { %v1670_v40 = vadd.f32 1.0, %v14211_v32  ;;  %v10867_v41 = vmul.f32 -1.442695, %v15286_v30  ;;  %v1510_v42 = vmul.f32 %v15233_v12, %v1384_v39  ;;  %14224 = vrcp.f32 %v1667_v33  ;;  %v14213_v17 = vpop.eup %14212 }
 0x141   : > { %v15293_v16 = vadd.f32 %v15238_v14, %v1511_v37  ;;  %v1669_v23 = vadd.f32 1.0, %v14213_v17 }
 0x142   : > { %14226 = vrcp.f32 %v1670_v40  ;;  %v15296_v20 = vadd.f32 %v15238_v14, %v1510_v42  ;;  %v12533_v21 = vpop.f32.mrb[44].mxu1 }
 0x143   : > { %v14215_v22 = vpop.eup %14214  ;;  %14228 = vpow2.f32 %v10868_v36  ;;  %v10870_v24 = vmul.f32 -1.442695, %v15293_v16  ;;  %v1513_v28 = vmul.f32 %v12533_v21, %v15233_v12  ;;  %v1394_v29 = vpop.f32.mrb[45].mxu1 }
 0x144   : > { %v1672_v31 = vadd.f32 1.0, %v14215_v22  ;;  %14230 = vpow2.f32 %v10867_v41  ;;  %v10869_v32 = vmul.f32 -1.442695, %v15296_v20  ;;  %v1512_v33 = vmul.f32 %v15233_v12, %v1394_v29  ;;  %v14217_v39 = vpop.eup %14216 }
 0x145   : > { %14232 = vrcp.f32 %v1669_v23  ;;  %v15303_v37 = vadd.f32 %v15238_v14, %v1513_v28  ;;  %v1671_v17 = vadd.f32 1.0, %v14217_v39 }
 0x146   : > { %14234 = vrcp.f32 %v1672_v31  ;;  %v15306_v40 = vadd.f32 %v15238_v14, %v1512_v33  ;;  %v12536_v36 = vpop.f32.mrb[46].mxu1 }
 0x147   : > { %v14219_v42 = vpop.eup %14218  ;;  %14236 = vpow2.f32 %v10870_v24  ;;  %v10872_v21 = vmul.f32 -1.442695, %v15303_v37  ;;  %v1515_v41 = vmul.f32 %v12536_v36, %v15233_v12  ;;  %v1404_v22 = vpop.f32.mrb[47].mxu1 }
 0x148   : > { %v1674_v38 = vadd.f32 1.0, %v14219_v42  ;;  %14238 = vpow2.f32 %v10869_v32  ;;  %v1514_v23 = vmul.f32 %v15233_v12, %v1404_v22  ;;  %v14221_v28 = vpop.eup %14220  ;;  %v10871_v29 = vmul.f32 -1.442695, %v15306_v40 }
 0x149   : > { %14240 = vrcp.f32 %v1671_v17  ;;  %v15313_v31 = vadd.f32 %v15238_v14, %v1515_v41  ;;  %v14223_v33 = vpop.eup %14222  ;;  %v1673_v39 = vadd.f32 1.0, %v14221_v28 }
 0x14a   : > { %14242 = vrcp.f32 %v1674_v38  ;;  %v15316_v24 = vadd.f32 %v15238_v14, %v1514_v23  ;;  %v12539_v10 = vpop.f32.mrb[48].mxu1  ;;  %v14225_v36 = vpop.eup %14224  ;;  %v15319_v42 = vmul.f32 %v14223_v33, %v15243_v18 }
 0x14b   : > { %14244 = vpow2.f32 %v10872_v21  ;;  %v10874_v32 = vmul.f32 -1.442695, %v15313_v31  ;;  %v1517_v17 = vmul.f32 %v12539_v10, %v15233_v12  ;;  %v1414_v22 = vpop.f32.mrb[49].mxu1  ;;  %v15324_v41 = vmul.f32 %v14225_v36, %v15246_v19 }
 0x14c   : > { %18594 = vst [vmem:[#allocation36_spill] sm:$0xff] %v15319_v42  ;;  %v14227_v11 = vpop.eup %14226  ;;  %14246 = vrcp.f32 %v1673_v39  ;;  %v10873_v38 = vmul.f32 -1.442695, %v15316_v24  ;;  %v1516_v23 = vmul.f32 %v15233_v12, %v1414_v22  ;;  %1796 = vst.msk [vmem:[#allocation2 + $0x21] sm:$0xff] %vm554_vm1, %v15319_v42  ;;  %v2537_v42 = vld [vmem:[#allocation2 + $0xa] sm:$0xff] }
 0x14d   : > { %18595 = vst [vmem:[#allocation37_spill] sm:$0xff] %v15324_v41  ;;  %v14229_v28 = vpop.eup %14228  ;;  %v15331_v18 = vmul.f32 %v14227_v11, %v15253_v26  ;;  %14248 = vpow2.f32 %v10871_v29  ;;  %v15334_v10 = vadd.f32 %v15238_v14, %v1517_v17  ;;  %1795 = vst.msk [vmem:[#allocation2 + $0x19] sm:$0xff] %vm554_vm1, %v15324_v41  ;;  %v15813_v41 = vld [vmem:[%s18373_s7 + $0x20] sm:$0xff] }
 0x14e   : > { %v14231_v21 = vpop.eup %14230  ;;  %v1676_v19 = vadd.f32 1.0, %v14229_v28  ;;  %14250 = vpow2.f32 %v10874_v32  ;;  %v15339_v33 = vadd.f32 %v15238_v14, %v1516_v23  ;;  %v12542_v39 = vpop.f32.mrb[50].mxu1 }
 0x14f   : > { %18596 = vst [vmem:[#allocation38_spill] sm:$0xff] %v15331_v18  ;;  %v14233_v36 = vpop.eup %14232  ;;  %1798 = vst.msk [vmem:[#allocation2 + $0x39] sm:$0xff] %vm554_vm1, %v15331_v18  ;;  %v1675_v11 = vadd.f32 1.0, %v14231_v21  ;;  %14252 = vpow2.f32 %v10873_v38  ;;  %v10876_v26 = vmul.f32 -1.442695, %v15334_v10  ;;  %v1519_v29 = vmul.f32 %v12542_v39, %v15233_v12  ;;  %v1424_v17 = vpop.f32.mrb[51].mxu1 }
 0x150   : > { %v14235_v22 = vpop.eup %14234  ;;  %v15346_v8 = vmul.f32 %v14233_v36, %v15256_v27  ;;  %14254 = vrcp.f32 %v1676_v19  ;;  %v10875_v32 = vmul.f32 -1.442695, %v15339_v33  ;;  %v1518_v23 = vmul.f32 %v15233_v12, %v1424_v17  ;;  %v2536_v18 = vld [vmem:[#allocation2 + $0x2] sm:$0xff] }
 0x151   : > { %v14237_v28 = vpop.eup %14236  ;;  %v15351_v9 = vmul.f32 %v14235_v22, %v15263_v34  ;;  %14256 = vrcp.f32 %v1675_v11  ;;  %v15354_v38 = vadd.f32 %v15238_v14, %v1519_v29 }
 0x152   : > { %18597 = vst [vmem:[#allocation39_spill] sm:$0xff] %v15346_v8  ;;  %v14239_v21 = vpop.eup %14238  ;;  %1797 = vst.msk [vmem:[#allocation2 + $0x31] sm:$0xff] %vm554_vm1, %v15346_v8  ;;  %v1678_v39 = vadd.f32 1.0, %v14237_v28  ;;  %14258 = vpow2.f32 %v10876_v26  ;;  %v15359_v27 = vadd.f32 %v15238_v14, %v1518_v23  ;;  %v12545_v19 = vpop.f32.mrb[52].mxu1 }
 0x153   : > { %18598 = vst [vmem:[#allocation40_spill] sm:$0xff] %v15351_v9  ;;  %v14241_v36 = vpop.eup %14240  ;;  %1800 = vst.msk [vmem:[#allocation2 + $0x51] sm:$0xff] %vm554_vm1, %v15351_v9  ;;  %v1677_v34 = vadd.f32 1.0, %v14239_v21  ;;  %14260 = vpow2.f32 %v10875_v32  ;;  %v10878_v11 = vmul.f32 -1.442695, %v15354_v38  ;;  %v1521_v29 = vmul.f32 %v12545_v19, %v15233_v12  ;;  %v1434_v17 = vpop.f32.mrb[53].mxu1 }
 0x154   : > { %v14243_v22 = vpop.eup %14242  ;;  %v15366_v6 = vmul.f32 %v14241_v36, %v15266_v35  ;;  %14262 = vrcp.f32 %v1678_v39  ;;  %v10877_v26 = vmul.f32 -1.442695, %v15359_v27  ;;  %v1520_v23 = vmul.f32 %v15233_v12, %v1434_v17  ;;  %v15373_v32 = vld [vmem:[#allocation2 + $0x19] sm:$0xff]  ;;  %v15382_v39 = vld [vmem:[#allocation2 + $0x21] sm:$0xff] }
 0x155   : > { %v14245_v28 = vpop.eup %14244  ;;  %v15371_v7 = vmul.f32 %v14243_v22, %v15273_v13  ;;  %14264 = vrcp.f32 %v1677_v34  ;;  %v15376_v21 = vadd.f32 %v15238_v14, %v1521_v29  ;;  %12566 = vmatprep.mubr.msk.f32.mxu0 %vm554_vm1, %v15373_v32 }
 0x156   : > { %18599 = vst [vmem:[#allocation41_spill] sm:$0xff] %v15366_v6  ;;  %v14247_v19 = vpop.eup %14246  ;;  %1799 = vst.msk [vmem:[#allocation2 + $0x49] sm:$0xff] %vm554_vm1, %v15366_v6  ;;  %v1680_v35 = vadd.f32 1.0, %v14245_v28  ;;  %14266 = vpow2.f32 %v10878_v11  ;;  %v15385_v13 = vadd.f32 %v15238_v14, %v1520_v23  ;;  %v12548_v36 = vpop.f32.mrb[54].mxu1  ;;  %12567 = vmatmul.mubr.msk.f32.gmra.mrb[2].mxu0 %vm554_vm1, %v15382_v39 }
 0x157   : > { %18600 = vst [vmem:[#allocation42_spill] sm:$0xff] %v15371_v7  ;;  %v14249_v34 = vpop.eup %14248  ;;  %1802 = vst.msk [vmem:[#allocation2 + $0x69] sm:$0xff] %vm554_vm1, %v15371_v7  ;;  %v15390_v29 = vmul.f32 %v14247_v19, %v15276_v15  ;;  %14268 = vpow2.f32 %v10877_v26  ;;  %v10880_v17 = vmul.f32 -1.442695, %v15376_v21  ;;  %v1523_v11 = vmul.f32 %v12548_v36, %v15233_v12  ;;  %v1444_v22 = vpop.f32.mrb[55].mxu1 }
 0x158   : > { %v14251_v28 = vpop.eup %14250  ;;  %14270 = vrcp.f32 %v1680_v35  ;;  %v1679_v23 = vadd.f32 1.0, %v14249_v34  ;;  %v1522_v4 = vmul.f32 %v15233_v12, %v1444_v22  ;;  %v10879_v26 = vmul.f32 -1.442695, %v15385_v13  ;;  %v15407_v35 = vld [vmem:[#allocation2 + $0x39] sm:$0xff] }
 0x159   : > { %18601 = vst [vmem:[#allocation43_spill] sm:$0xff] %v15390_v29  ;;  %v14253_v5 = vpop.eup %14252  ;;  %1801 = vst.msk [vmem:[#allocation2 + $0x61] sm:$0xff] %vm554_vm1, %v15390_v29  ;;  %v1682_v15 = vadd.f32 1.0, %v14251_v28  ;;  %v15399_v19 = vld [vmem:[#allocation2 + $0x31] sm:$0xff]  ;;  %14272 = vpow2.f32 %v10880_v17  ;;  %v15403_v2 = vadd.f32 %v15238_v14, %v1523_v11 }
 0x15a   : > { %v14255_v36 = vpop.eup %14254  ;;  %14274 = vrcp.f32 %v1679_v23  ;;  %v1681_v3 = vadd.f32 1.0, %v14253_v5  ;;  %12569 = vmatprep.mubr.msk.f32.mxu0 %vm554_vm1, %v15399_v19  ;;  %v15410_v34 = vadd.f32 %v15238_v14, %v1522_v4  ;;  %v12551_v22 = vpop.f32.mrb[56].mxu1 }
 0x15b   : > { %v14257_v28 = vpop.eup %14256  ;;  %v15413_v17 = vmul.f32 %v14255_v36, %v15283_v25  ;;  %14276 = vrcp.f32 %v1682_v15  ;;  %12570 = vmatmul.mubr.msk.f32.gmra.mrb[4].mxu0 %vm554_vm1, %v15407_v35  ;;  %v10882_v11 = vmul.f32 -1.442695, %v15403_v2  ;;  %v1525_v5 = vmul.f32 %v12551_v22, %v15233_v12  ;;  %v1454_v23 = vpop.f32.mrb[57].mxu1 }
 0x15c   : > { %v14259_v0 = vpop.eup %14258  ;;  %v15420_v1 = vmul.f32 %v14257_v28, %v15286_v30  ;;  %14278 = vrcp.f32 %v1681_v3  ;;  %v1524_v4 = vmul.f32 %v15233_v12, %v1454_v23  ;;  %v10881_v36 = vmul.f32 -1.442695, %v15410_v34  ;;  %v15435_v30 = vld [vmem:[#allocation2 + $0x51] sm:$0xff] }
 0x15d   : > { %18602 = vst [vmem:[#allocation44_spill] sm:$0xff] %v15413_v17  ;;  %v14261_v62 = vpop.eup %14260  ;;  %1804 = vst.msk [vmem:[#allocation2 + $0x81] sm:$0xff] %vm554_vm1, %v15413_v17  ;;  %v1684_v25 = vadd.f32 1.0, %v14259_v0  ;;  %14280 = vpow2.f32 %v10879_v26  ;;  %v15425_v15 = vld [vmem:[#allocation2 + $0x49] sm:$0xff]  ;;  %v15429_v22 = vadd.f32 %v15238_v14, %v1525_v5 }
 0x15e   : > { %18603 = vst [vmem:[#allocation45_spill] sm:$0xff] %v15420_v1  ;;  %v14263_v63 = vpop.eup %14262  ;;  %1803 = vst.msk [vmem:[#allocation2 + $0x79] sm:$0xff] %vm554_vm1, %v15420_v1  ;;  %v1683_v3 = vadd.f32 1.0, %v14261_v62  ;;  %12572 = vmatprep.mubr.msk.f32.mxu0 %vm554_vm1, %v15425_v15  ;;  %14282 = vpow2.f32 %v10882_v11  ;;  %v15438_v0 = vadd.f32 %v15238_v14, %v1524_v4  ;;  %v12554_v26 = vpop.f32.mrb[58].mxu1 }
 0x15f   : > { %v14265_v28 = vpop.eup %14264  ;;  %v15441_v23 = vmul.f32 %v14263_v63, %v15293_v16  ;;  %14284 = vrcp.f32 %v1684_v25  ;;  %12573 = vmatmul.mubr.msk.f32.gmra.mrb[6].mxu0 %vm554_vm1, %v15435_v30  ;;  %v10884_v62 = vmul.f32 -1.442695, %v15429_v22  ;;  %v1527_v5 = vmul.f32 %v12554_v26, %v15233_v12  ;;  %v1464_v60 = vpop.f32.mrb[59].mxu1 }
 0x160   : > { %v14267_v11 = vpop.eup %14266  ;;  %v15448_v61 = vmul.f32 %v14265_v28, %v15296_v20  ;;  %14286 = vrcp.f32 %v1683_v3  ;;  %v15450_v4 = vld [vmem:[#allocation2 + $0x61] sm:$0xff]  ;;  %v1526_v59 = vmul.f32 %v15233_v12, %v1464_v60  ;;  %v10883_v25 = vmul.f32 -1.442695, %v15438_v0  ;;  %v15463_v60 = vld [vmem:[#allocation2 + $0x69] sm:$0xff] }
 0x161   : > { %18604 = vst [vmem:[#allocation46_spill] sm:$0xff] %v15441_v23  ;;  %v14269_v63 = vpop.eup %14268  ;;  %1806 = vst.msk [vmem:[#allocation2 + $0x99] sm:$0xff] %vm554_vm1, %v15441_v23  ;;  %v1686_v16 = vadd.f32 1.0, %v14267_v11  ;;  %14288 = vpow2.f32 %v10881_v36  ;;  %12575 = vmatprep.mubr.msk.f32.mxu0 %vm554_vm1, %v15450_v4  ;;  %v15459_v26 = vadd.f32 %v15238_v14, %v1527_v5 }
 0x162   : > { %18605 = vst [vmem:[#allocation47_spill] sm:$0xff] %v15448_v61  ;;  %v14271_v20 = vpop.eup %14270  ;;  %1805 = vst.msk [vmem:[#allocation2 + $0x91] sm:$0xff] %vm554_vm1, %v15448_v61  ;;  %v1685_v3 = vadd.f32 1.0, %v14269_v63  ;;  %14290 = vpow2.f32 %v10884_v62  ;;  %v15466_v28 = vadd.f32 %v15238_v14, %v1526_v59  ;;  %v12557_v36 = vpop.f32.mrb[60].mxu1 }
 0x163   : > { %v14273_v11 = vpop.eup %14272  ;;  %v15469_v57 = vmul.f32 %v14271_v20, %v15303_v37  ;;  %14292 = vrcp.f32 %v1686_v16  ;;  %12576 = vmatmul.mubr.msk.f32.gmra.mrb[8].mxu0 %vm554_vm1, %v15463_v60  ;;  %v10886_v5 = vmul.f32 -1.442695, %v15459_v26  ;;  %v1529_v55 = vmul.f32 %v12557_v36, %v15233_v12  ;;  %v1474_v63 = vpop.f32.mrb[61].mxu1 }
 0x164   : > { %v14275_v62 = vpop.eup %14274  ;;  %14294 = vrcp.f32 %v1685_v3  ;;  %v1688_v56 = vadd.f32 1.0, %v14273_v11  ;;  %v10885_v59 = vmul.f32 -1.442695, %v15466_v28  ;;  %v1528_v53 = vmul.f32 %v15233_v12, %v1474_v63  ;;  %v15492_v11 = vld [vmem:[#allocation2 + $0x81] sm:$0xff] }
 0x165   : > { %18606 = vst [vmem:[#allocation48_spill] sm:$0xff] %v15469_v57  ;;  %v14277_v54 = vpop.eup %14276  ;;  %1808 = vst.msk [vmem:[#allocation2 + $0xb1] sm:$0xff] %vm554_vm1, %v15469_v57  ;;  %v15480_v37 = vmul.f32 %v14275_v62, %v15306_v40  ;;  %14296 = vpow2.f32 %v10883_v25  ;;  %v15482_v16 = vld [vmem:[#allocation2 + $0x79] sm:$0xff]  ;;  %v15485_v20 = vadd.f32 %v15238_v14, %v1529_v55 }
 0x166   : > { %v14279_v36 = vpop.eup %14278  ;;  %v15488_v3 = vmul.f32 %v14277_v54, %v15313_v31  ;;  %14298 = vrcp.f32 %v1688_v56  ;;  %12578 = vmatprep.mubr.msk.f32.mxu0 %vm554_vm1, %v15482_v16  ;;  %v15495_v63 = vadd.f32 %v15238_v14, %v1528_v53 }
 0x167   : > { %18607 = vst [vmem:[#allocation49_spill] sm:$0xff] %v15480_v37  ;;  %v14281_v40 = vpop.eup %14280  ;;  %1807 = vst.msk [vmem:[#allocation2 + $0xa9] sm:$0xff] %vm554_vm1, %v15480_v37  ;;  %v15500_v55 = vmul.f32 %v14279_v36, %v15316_v24  ;;  %14300 = vpow2.f32 %v10886_v5  ;;  %12579 = vmatmul.mubr.msk.f32.gmra.mrb[10].mxu0 %vm554_vm1, %v15492_v11  ;;  %v10888_v54 = vmul.f32 -1.442695, %v15485_v20 }
 0x168   : > { %18608 = vst [vmem:[#allocation50_spill] sm:$0xff] %v15488_v3  ;;  %v14283_v56 = vpop.eup %14282  ;;  %1810 = vst.msk [vmem:[#allocation2 + $0xc9] sm:$0xff] %vm554_vm1, %v15488_v3  ;;  %v1687_v31 = vadd.f32 1.0, %v14281_v40  ;;  %14302 = vpow2.f32 %v10885_v59  ;;  %v10887_v53 = vmul.f32 -1.442695, %v15495_v63  ;;  %v15517_v40 = vld [vmem:[#allocation2 + $0x99] sm:$0xff] }
 0x169   : > { %18609 = vst [vmem:[#allocation51_spill] sm:$0xff] %v15500_v55  ;;  %v14285_v25 = vpop.eup %14284  ;;  %1809 = vst.msk [vmem:[#allocation2 + $0xc1] sm:$0xff] %vm554_vm1, %v15500_v55  ;;  %v1690_v24 = vadd.f32 1.0, %v14283_v56  ;;  %v15510_v62 = vld [vmem:[#allocation2 + $0x91] sm:$0xff]  ;;  %14304 = vpow2.f32 %v10888_v54 }
 0x16a   : > { %v14287_v5 = vpop.eup %14286  ;;  %v15513_v36 = vmul.f32 %v14285_v25, %v15334_v10  ;;  %14306 = vrcp.f32 %v1687_v31  ;;  %12581 = vmatprep.mubr.msk.f32.mxu0 %vm554_vm1, %v15510_v62  ;;  %v12560_v25 = vpop.f32.mrb[62].mxu1  ;;  %v15721_v47 = vld [vmem:[#allocation2 + $0x98] sm:$0xff] }
 0x16b   : > { %v14289_v59 = vpop.eup %14288  ;;  %v15520_v51 = vmul.f32 %v14287_v5, %v15339_v33  ;;  %14308 = vrcp.f32 %v1690_v24  ;;  %12582 = vmatmul.mubr.msk.f32.gmra.mrb[12].mxu0 %vm554_vm1, %v15517_v40  ;;  %v1531_v5 = vmul.f32 %v12560_v25, %v15233_v12  ;;  %v1484_v49 = vpop.f32.mrb[63].mxu1  ;;  %v1827_v25 = vld [vmem:[#allocation2] sm:$0xff] }
 0x16c   : > { %18610 = vst [vmem:[#allocation52_spill] sm:$0xff] %v15513_v36  ;;  %v14291_v56 = vpop.eup %14290  ;;  %1812 = vst.msk [vmem:[#allocation2 + $0xe1] sm:$0xff] %vm554_vm1, %v15513_v36  ;;  %v1689_v10 = vadd.f32 1.0, %v14289_v59  ;;  %14310 = vpow2.f32 %v10887_v53  ;;  %v15539_v53 = vld [vmem:[#allocation2 + $0xb1] sm:$0xff] }
 0x16d   : > { %18611 = vst [vmem:[#allocation53_spill] sm:$0xff] %v15520_v51  ;;  %v14293_v54 = vpop.eup %14292  ;;  %1811 = vst.msk [vmem:[#allocation2 + $0xd9] sm:$0xff] %vm554_vm1, %v15520_v51  ;;  %v1692_v31 = vadd.f32 1.0, %v14291_v56  ;;  %v1530_v56 = vmul.f32 %v15233_v12, %v1484_v49 }
 0x16e   : > { %v14295_v52 = vpop.eup %14294  ;;  %v15529_v33 = vmul.f32 %v14293_v54, %v15354_v38  ;;  %14312 = vrcp.f32 %v1689_v10  ;;  %v15531_v24 = vld [vmem:[#allocation2 + $0xa9] sm:$0xff] }
 0x16f   : > { %v14297_v3 = vpop.eup %14296  ;;  %v15535_v59 = vmul.f32 %v14295_v52, %v15359_v27  ;;  %14314 = vrcp.f32 %v1692_v31  ;;  %12584 = vmatprep.mubr.msk.f32.mxu0 %vm554_vm1, %v15531_v24  ;;  %v15549_v52 = vadd.f32 %v15238_v14, %v1531_v5  ;;  %v15559_v49 = vadd.f32 %v15238_v14, %v1530_v56  ;;  %v15563_v36 = vld [vmem:[#allocation2 + $0xc9] sm:$0xff] }
 0x170   : > { %18612 = vst [vmem:[#allocation54_spill] sm:$0xff] %v15529_v33  ;;  %v14299_v38 = vpop.eup %14298  ;;  %1814 = vst.msk [vmem:[#allocation2 + $0xf9] sm:$0xff] %vm554_vm1, %v15529_v33  ;;  %v1691_v10 = vadd.f32 1.0, %v14297_v3  ;;  %12585 = vmatmul.mubr.msk.f32.gmra.mrb[14].mxu0 %vm554_vm1, %v15539_v53  ;;  %v15546_v54 = vld [vmem:[#allocation2 + $0xc1] sm:$0xff] }
 0x171   : > { %18613 = vst [vmem:[#allocation55_spill] sm:$0xff] %v15535_v59  ;;  %v14301_v27 = vpop.eup %14300  ;;  %1813 = vst.msk [vmem:[#allocation2 + $0xf1] sm:$0xff] %vm554_vm1, %v15535_v59  ;;  %v15554_v31 = vmul.f32 %v14299_v38, %v15376_v21  ;;  %12587 = vmatprep.mubr.msk.f32.mxu0 %vm554_vm1, %v15546_v54  ;;  %v10890_v21 = vmul.f32 -1.442695, %v15549_v52  ;;  %v10889_v56 = vmul.f32 -1.442695, %v15559_v49 }
 0x172   : > { %v14303_v12 = vpop.eup %14302  ;;  %14316 = vrcp.f32 %v1691_v10  ;;  %v1694_v3 = vadd.f32 1.0, %v14301_v27  ;;  %v15728_v23 = vld [vmem:[#allocation2 + $0xa8] sm:$0xff] }
 0x173   : > { %18614 = vst [vmem:[#allocation56_spill] sm:$0xff] %v15554_v31  ;;  %v14305_v33 = vpop.eup %14304  ;;  %1816 = vst.msk [vmem:[#allocation2 + $0x111] sm:$0xff] %vm554_vm1, %v15554_v31  ;;  %v1693_v5 = vadd.f32 1.0, %v14303_v12  ;;  %v15565_v59 = vld [vmem:[#allocation2 + $0xe1] sm:$0xff] }
 0x174   : > { %v14307_v38 = vpop.eup %14306  ;;  %14318 = vrcp.f32 %v1694_v3  ;;  %v1696_v51 = vadd.f32 1.0, %v14305_v33  ;;  %12588 = vmatmul.mubr.msk.f32.gmra.mrb[16].mxu0 %vm554_vm1, %v15563_v36  ;;  %v15570_v14 = vld [vmem:[#allocation2 + $0xd9] sm:$0xff]  ;;  %v1828_v12 = vld [vmem:[#allocation2 + $0x8] sm:$0xff] }
 0x175   : > { %v14309_v10 = vpop.eup %14308  ;;  %v15574_v27 = vmul.f32 %v14307_v38, %v15385_v13  ;;  %14320 = vrcp.f32 %v1693_v5  ;;  %12613 = vmatprep.mubr.msk.f32.mxu0 %vm554_vm1, %v1827_v25  ;;  %12590 = vmatprep.mubr.msk.f32.mxu1 %vm554_vm1, %v15570_v14  ;;  %v15589_v25 = vld [vmem:[%s18373_s7 + $0x18] sm:$0xff] }
 0x176   : > { %v14311_v3 = vpop.eup %14310  ;;  %v15580_v33 = vmul.f32 %v14309_v10, %v15403_v2  ;;  %14322 = vrcp.f32 %v1696_v51  ;;  %12591 = vmatmul.mubr.msk.f32.vlgmr.msra.gmra.mrb[64].mxu1 %vm554_vm1, %v15565_v59  ;;  %v15594_v51 = vld [vmem:[#allocation2 + $0x18] sm:$0xff] }
 0x177   : > { %18615 = vst [vmem:[#allocation57_spill] sm:$0xff] %v15574_v27  ;;  %1815 = vst.msk [vmem:[#allocation2 + $0x109] sm:$0xff] %vm554_vm1, %v15574_v27  ;;  %v1695_v13 = vadd.f32 1.0, %v14311_v3  ;;  %14324 = vpow2.f32 %v10890_v21  ;;  %v15598_v38 = vld [vmem:[#allocation2 + $0xf9] sm:$0xff] }
 0x178   : > { %18616 = vst [vmem:[#allocation58_spill] sm:$0xff] %v15580_v33  ;;  %v14313_v5 = vpop.eup %14312  ;;  %1818 = vst.msk [vmem:[#allocation2 + $0x129] sm:$0xff] %vm554_vm1, %v15580_v33  ;;  %12614 = vmatmul.mubr.msk.f32.vlgmr.msra.gmra.mrb[0].mxu0 %vm554_vm1, %v1828_v12  ;;  %v15596_v2 = vld [vmem:[#allocation2 + $0xf1] sm:$0xff]  ;;  %14326 = vpow2.f32 %v10889_v56  ;;  %v15614_v56 = vld [vmem:[#allocation2 + $0x20] sm:$0xff] }
 0x179   : > { %v14315_v10 = vpop.eup %14314  ;;  %v15601_v3 = vmul.f32 %v14313_v5, %v15410_v34  ;;  %14328 = vrcp.f32 %v1695_v13  ;;  %12662 = vmatpush3.msra.mxu0 %v15193_v58  ;;  %12616 = vmatprep.mubr.msk.f32.mxu0 %vm554_vm1, %v15594_v51  ;;  %v15622_v34 = vld [vmem:[#allocation2 + $0x30] sm:$0xff]  ;;  %v15638_v33 = vld [vmem:[#allocation2 + $0x38] sm:$0xff] }
 0x17a   : > { %v15607_v21 = vmul.f32 %v14315_v10, %v15429_v22  ;;  %12593 = vmatprep.mubr.msk.f32.mxu1 %vm554_vm1, %v15596_v2  ;;  %12711 = vmatprep.subr.mxu0 %v15589_v25  ;;  %v15629_v12 = vld [vmem:[#allocation2 + $0x111] sm:$0xff] }
 0x17b   : > { %18617 = vst [vmem:[#allocation59_spill] sm:$0xff] %v15601_v3  ;;  %1817 = vst.msk [vmem:[#allocation2 + $0x121] sm:$0xff] %vm554_vm1, %v15601_v3  ;;  %12594 = vmatmul.mubr.msk.f32.gmra.mrb[66].mxu1 %vm554_vm1, %v15598_v38  ;;  %v15647_v3 = vld [vmem:[#allocation2 + $0x48] sm:$0xff]  ;;  %v15765_v45 = vld [vmem:[#allocation2 + $0xf8] sm:$0xff] }
 0x17c   : > { %18618 = vst [vmem:[#allocation60_spill] sm:$0xff] %v15607_v21  ;;  %v14317_v58 = vpop.eup %14316  ;;  %1820 = vst.msk [vmem:[#allocation2 + $0x141] sm:$0xff] %vm554_vm1, %v15607_v21  ;;  %12617 = vmatmul.mubr.msk.f32.gmra.mrb[2].mxu0 %vm554_vm1, %v15614_v56 }
 0x17d   : > { %v15625_v22 = vmul.f32 %v14317_v58, %v15438_v0  ;;  %12619 = vmatprep.mubr.msk.f32.mxu0 %vm554_vm1, %v15622_v34 }
 0x17e   : > { %v14319_v13 = vpop.eup %14318  ;;  %v15631_v5 = vld [vmem:[#allocation2 + $0x109] sm:$0xff] }
 0x17f   : > { %18619 = vst [vmem:[#allocation61_spill] sm:$0xff] %v15625_v22  ;;  %v14321_v10 = vpop.eup %14320  ;;  %1819 = vst.msk [vmem:[#allocation2 + $0x139] sm:$0xff] %vm554_vm1, %v15625_v22  ;;  %v15636_v21 = vmul.f32 %v14319_v13, %v15459_v26  ;;  %12596 = vmatprep.mubr.msk.f32.mxu1 %vm554_vm1, %v15631_v5  ;;  %v15769_v61 = vld [vmem:[#allocation2 + $0x108] sm:$0xff]  ;;  %v15773_v17 = vld [vmem:[#allocation2 + $0x110] sm:$0xff] }
 0x180   : > { %v14323_v0 = vpop.eup %14322  ;;  %v15643_v58 = vmul.f32 %v14321_v10, %v15466_v28  ;;  %12620 = vmatmul.mubr.msk.f32.gmra.mrb[4].mxu0 %vm554_vm1, %v15638_v33  ;;  %12597 = vmatmul.mubr.msk.f32.gmra.mrb[68].mxu1 %vm554_vm1, %v15629_v12  ;;  %v15658_v28 = vld [vmem:[#allocation2 + $0x129] sm:$0xff] }
 0x181   : > { %18620 = vst [vmem:[#allocation62_spill] sm:$0xff] %v15636_v21  ;;  %v14325_v22 = vpop.eup %14324  ;;  %1822 = vst.msk [vmem:[#allocation2 + $0x159] sm:$0xff] %vm554_vm1, %v15636_v21  ;;  %v15654_v26 = vmul.f32 %v14323_v0, %v15485_v20  ;;  %12622 = vmatprep.mubr.msk.f32.mxu0 %vm554_vm1, %v15647_v3  ;;  %v15666_v21 = vld [vmem:[#allocation2 + $0x50] sm:$0xff] }
 0x182   : > { %18621 = vst [vmem:[#allocation63_spill] sm:$0xff] %v15643_v58  ;;  %v14327_v13 = vpop.eup %14326  ;;  %1821 = vst.msk [vmem:[#allocation2 + $0x151] sm:$0xff] %vm554_vm1, %v15643_v58  ;;  %v15662_v10 = vld [vmem:[#allocation2 + $0x121] sm:$0xff]  ;;  %v1698_v31 = vadd.f32 1.0, %v14325_v22 }
 0x183   : > { %18622 = vst [vmem:[#allocation64_spill] sm:$0xff] %v15654_v26  ;;  %v14329_v27 = vpop.eup %14328  ;;  %1824 = vst.msk [vmem:[#allocation2 + $0x171] sm:$0xff] %vm554_vm1, %v15654_v26  ;;  %12599 = vmatprep.mubr.msk.f32.mxu1 %vm554_vm1, %v15662_v10  ;;  %v1697_v20 = vadd.f32 1.0, %v14327_v13  ;;  %v15675_v58 = vld [vmem:[#allocation2 + $0x60] sm:$0xff]  ;;  %v15781_v43 = vld [vmem:[#allocation2 + $0x128] sm:$0xff] }
 0x184   : > { %v15671_v0 = vmul.f32 %v14329_v27, %v15495_v63  ;;  %12623 = vmatmul.mubr.msk.f32.gmra.mrb[6].mxu0 %vm554_vm1, %v15666_v21  ;;  %12600 = vmatmul.mubr.msk.f32.gmra.mrb[70].mxu1 %vm554_vm1, %v15658_v28  ;;  %14330 = vrcp.f32 %v1698_v31  ;;  %v15681_v22 = vld [vmem:[#allocation2 + $0x141] sm:$0xff]  ;;  %v15693_v31 = vld [vmem:[#allocation2 + $0x78] sm:$0xff] }
 0x185   : > { %12625 = vmatprep.mubr.msk.f32.mxu0 %vm554_vm1, %v15675_v58  ;;  %14332 = vrcp.f32 %v1697_v20  ;;  %v15687_v27 = vld [vmem:[#allocation2 + $0x68] sm:$0xff]  ;;  %v15705_v26 = vld [vmem:[#allocation2 + $0x80] sm:$0xff] }
 0x186   : > { %18623 = vst [vmem:[#allocation65_spill] sm:$0xff] %v15671_v0  ;;  %1823 = vst.msk [vmem:[#allocation2 + $0x169] sm:$0xff] %vm554_vm1, %v15671_v0  ;;  %v15685_v63 = vld [vmem:[#allocation2 + $0x139] sm:$0xff]  ;;  %v15709_v0 = vld [vmem:[#allocation2 + $0x90] sm:$0xff] }
 0x187   : > { %12602 = vmatprep.mubr.msk.f32.mxu1 %vm554_vm1, %v15685_v63  ;;  %v15777_v44 = vld [vmem:[#allocation2 + $0x120] sm:$0xff]  ;;  %v15785_v1 = vld [vmem:[#allocation2 + $0x138] sm:$0xff] }
 0x188   : > { %12626 = vmatmul.mubr.msk.f32.gmra.mrb[8].mxu0 %vm554_vm1, %v15687_v27  ;;  %12603 = vmatmul.mubr.msk.f32.gmra.mrb[72].mxu1 %vm554_vm1, %v15681_v22  ;;  %v15701_v20 = vld [vmem:[#allocation2 + $0x159] sm:$0xff] }
 0x189   : > { %12628 = vmatprep.mubr.msk.f32.mxu0 %vm554_vm1, %v15693_v31  ;;  %v15699_v13 = vld [vmem:[#allocation2 + $0x151] sm:$0xff]  ;;  %v15789_v7 = vld [vmem:[#allocation2 + $0x140] sm:$0xff] }
 0x18a   : > { %12605 = vmatprep.mubr.msk.f32.mxu1 %vm554_vm1, %v15699_v13  ;;  %v15717_v55 = vld [vmem:[#allocation2 + $0x171] sm:$0xff] }
 0x18b   : > { %18625 = vst [vmem:[#allocation67_spill] sm:$0xff] %v15717_v55  ;;  %v15793_v29 = vld [vmem:[#allocation2 + $0x150] sm:$0xff]  ;;  %v15797_v9 = vld [vmem:[#allocation2 + $0x158] sm:$0xff] }
 0x18c   : > { %12629 = vmatmul.mubr.msk.f32.gmra.mrb[10].mxu0 %vm554_vm1, %v15705_v26  ;;  %12606 = vmatmul.mubr.msk.f32.gmra.mrb[74].mxu1 %vm554_vm1, %v15701_v20 }
 0x18d   : > { %12631 = vmatprep.mubr.msk.f32.mxu0 %vm554_vm1, %v15709_v0  ;;  %v15715_v50 = vld [vmem:[#allocation2 + $0x169] sm:$0xff] }
 0x18e   : > { %18624 = vst [vmem:[#allocation66_spill] sm:$0xff] %v15715_v50  ;;  %v14331_v57 = vpop.eup %14330  ;;  %12608 = vmatprep.mubr.msk.f32.mxu1 %vm554_vm1, %v15715_v50  ;;  %v15801_v6 = vld [vmem:[#allocation2 + $0x168] sm:$0xff]  ;;  %v15805_v8 = vld [vmem:[#allocation2 + $0x170] sm:$0xff] }
 0x18f   : > { %v14333_v48 = vpop.eup %14332  ;;  %v15724_v37 = vmul.f32 %v14331_v57, %v15549_v52  ;;  %v15741_v57 = vld [vmem:[#allocation2 + $0xb0] sm:$0xff]  ;;  %v15745_v52 = vld [vmem:[#allocation2 + $0xc0] sm:$0xff] }
 0x190   : > { %12632 = vmatmul.mubr.msk.f32.gmra.mrb[12].mxu0 %vm554_vm1, %v15721_v47  ;;  %12609 = vmatmul.mubr.msk.f32.gmra.mrb[76].mxu1 %vm554_vm1, %v15717_v55  ;;  %v15733_v46 = vmul.f32 %v14333_v48, %v15559_v49  ;;  %v15749_v48 = vld [vmem:[#allocation2 + $0xc8] sm:$0xff]  ;;  %v15753_v49 = vld [vmem:[#allocation2 + $0xd8] sm:$0xff] }
 0x191   : > { %18626 = vst [vmem:[#allocation68_spill] sm:$0xff] %v15724_v37  ;;  %12634 = vmatprep.mubr.msk.f32.mxu0 %vm554_vm1, %v15728_v23  ;;  %1826 = vst.msk [vmem:[#allocation2 + $0x189] sm:$0xff] %vm554_vm1, %v15724_v37  ;;  %v15757_v37 = vld [vmem:[#allocation2 + $0xe0] sm:$0xff] }
 0x192   : > { %18627 = vst [vmem:[#allocation69_spill] sm:$0xff] %v15733_v46  ;;  %1825 = vst.msk [vmem:[#allocation2 + $0x181] sm:$0xff] %vm554_vm1, %v15733_v46  ;;  %v15761_v46 = vld [vmem:[#allocation2 + $0xf0] sm:$0xff]  ;;  %v15816_v55 = vld [vmem:[#allocation2 + $0x1a] sm:$0xff] }
 0x193   : > { %18628 = vst [vmem:[#allocation70_spill] sm:$0xff] %v15816_v55  ;;  %v15822_v50 = vld [vmem:[#allocation2 + $0x22] sm:$0xff] }
 0x194   : > { %12635 = vmatmul.mubr.msk.f32.gmra.mrb[14].mxu0 %vm554_vm1, %v15741_v57  ;;  %18629 = vst [vmem:[#allocation71_spill] sm:$0xff] %v15822_v50 }
 0x195   : > { %12637 = vmatprep.mubr.msk.f32.mxu0 %vm554_vm1, %v15745_v52 }
 0x198   : > { %12638 = vmatmul.mubr.msk.f32.gmra.mrb[16].mxu0 %vm554_vm1, %v15749_v48 }
 0x199   : > { %12640 = vmatprep.mubr.msk.f32.mxu0 %vm554_vm1, %v15753_v49 }
 0x19c   : > { %12641 = vmatmul.mubr.msk.f32.gmra.mrb[18].mxu0 %vm554_vm1, %v15757_v37 }
 0x19d   : > { %12643 = vmatprep.mubr.msk.f32.mxu0 %vm554_vm1, %v15761_v46 }
 0x1a0   : > { %12644 = vmatmul.mubr.msk.f32.gmra.mrb[20].mxu0 %vm554_vm1, %v15765_v45 }
 0x1a1   : > { %12646 = vmatprep.mubr.msk.f32.mxu0 %vm554_vm1, %v15769_v61 }
 0x1a4   : > { %12647 = vmatmul.mubr.msk.f32.gmra.mrb[22].mxu0 %vm554_vm1, %v15773_v17 }
 0x1a5   : > { %12649 = vmatprep.mubr.msk.f32.mxu0 %vm554_vm1, %v15777_v44 }
 0x1a8   : > { %12650 = vmatmul.mubr.msk.f32.gmra.mrb[24].mxu0 %vm554_vm1, %v15781_v43 }
 0x1a9   : > { %12652 = vmatprep.mubr.msk.f32.mxu0 %vm554_vm1, %v15785_v1 }
 0x1ac   : > { %12653 = vmatmul.mubr.msk.f32.gmra.mrb[26].mxu0 %vm554_vm1, %v15789_v7 }
 0x1ad   : > { %12655 = vmatprep.mubr.msk.f32.mxu0 %vm554_vm1, %v15793_v29 }
 0x1b0   : > { %12656 = vmatmul.mubr.msk.f32.gmra.mrb[28].mxu0 %vm554_vm1, %v15797_v9 }
 0x1b1   : > { %12658 = vmatprep.mubr.msk.f32.mxu0 %vm554_vm1, %v15801_v6 }
 0x1b4   : > { %12659 = vmatmul.mubr.msk.f32.gmra.mrb[30].mxu0 %vm554_vm1, %v15805_v8 }
 0x1b5   : > { %12663 = vmatprep.mubr.msk.f32.mxu0 %vm554_vm1, %v2536_v18  ;;  %v15826_v18 = vld [vmem:[#allocation2 + $0x32] sm:$0xff] }
 0x1b6   : > { %18630 = vst [vmem:[#allocation72_spill] sm:$0xff] %v15826_v18 }
 0x1b8   : > { %12664 = vmatmul.mubr.msk.f32.vlgmr.msra.gmra.mrb[0].mxu0 %vm554_vm1, %v2537_v42  ;;  %v15830_v42 = vld [vmem:[#allocation2 + $0x3a] sm:$0xff] }
 0x1b9   : > { %12712 = vmatpush3.msra.mxu0 %v15589_v25  ;;  %12666 = vmatprep.mubr.msk.f32.mxu0 %vm554_vm1, %v15816_v55  ;;  %18631 = vst [vmem:[#allocation73_spill] sm:$0xff] %v15830_v42  ;;  %v15834_v25 = vld [vmem:[#allocation2 + $0x4a] sm:$0xff]  ;;  %v15838_v55 = vld [vmem:[#allocation2 + $0x52] sm:$0xff] }
 0x1ba   : > { %12761 = vmatprep.subr.mxu0 %v15813_v41  ;;  %18632 = vst [vmem:[#allocation74_spill] sm:$0xff] %v15834_v25  ;;  %18633 = vst [vmem:[#allocation75_spill] sm:$0xff] %v15838_v55 }
 0x1bc   : > { %12667 = vmatmul.mubr.msk.f32.gmra.mrb[2].mxu0 %vm554_vm1, %v15822_v50  ;;  %v15842_v50 = vld [vmem:[#allocation2 + $0x62] sm:$0xff] }
 0x1bd   : > { %12669 = vmatprep.mubr.msk.f32.mxu0 %vm554_vm1, %v15826_v18  ;;  %18634 = vst [vmem:[#allocation76_spill] sm:$0xff] %v15842_v50  ;;  %v15846_v18 = vld [vmem:[#allocation2 + $0x6a] sm:$0xff] }
 0x1be   : > { %18635 = vst [vmem:[#allocation77_spill] sm:$0xff] %v15846_v18 }
 0x1c0   : > { %12670 = vmatmul.mubr.msk.f32.gmra.mrb[4].mxu0 %vm554_vm1, %v15830_v42  ;;  %v15850_v42 = vld [vmem:[#allocation2 + $0x7a] sm:$0xff] }
 0x1c1   : > { %12672 = vmatprep.mubr.msk.f32.mxu0 %vm554_vm1, %v15834_v25  ;;  %18636 = vst [vmem:[#allocation78_spill] sm:$0xff] %v15850_v42  ;;  %v15854_v25 = vld [vmem:[#allocation2 + $0x82] sm:$0xff] }
 0x1c2   : > { %18637 = vst [vmem:[#allocation79_spill] sm:$0xff] %v15854_v25 }
 0x1c4   : > { %12673 = vmatmul.mubr.msk.f32.gmra.mrb[6].mxu0 %vm554_vm1, %v15838_v55  ;;  %v15858_v55 = vld [vmem:[#allocation2 + $0x92] sm:$0xff] }
 0x1c5   : > { %12675 = vmatprep.mubr.msk.f32.mxu0 %vm554_vm1, %v15842_v50  ;;  %18638 = vst [vmem:[#allocation80_spill] sm:$0xff] %v15858_v55  ;;  %v15862_v50 = vld [vmem:[#allocation2 + $0x9a] sm:$0xff] }
 0x1c6   : > { %18639 = vst [vmem:[#allocation81_spill] sm:$0xff] %v15862_v50 }
 0x1c8   : > { %12676 = vmatmul.mubr.msk.f32.gmra.mrb[8].mxu0 %vm554_vm1, %v15846_v18  ;;  %v15866_v18 = vld [vmem:[#allocation2 + $0xaa] sm:$0xff] }
 0x1c9   : > { %12678 = vmatprep.mubr.msk.f32.mxu0 %vm554_vm1, %v15850_v42  ;;  %18640 = vst [vmem:[#allocation82_spill] sm:$0xff] %v15866_v18  ;;  %v15870_v42 = vld [vmem:[#allocation2 + $0xb2] sm:$0xff] }
 0x1ca   : > { %18641 = vst [vmem:[#allocation83_spill] sm:$0xff] %v15870_v42 }
 0x1cc   : > { %12679 = vmatmul.mubr.msk.f32.gmra.mrb[10].mxu0 %vm554_vm1, %v15854_v25  ;;  %v15874_v25 = vld [vmem:[#allocation2 + $0xc2] sm:$0xff] }
 0x1cd   : > { %12681 = vmatprep.mubr.msk.f32.mxu0 %vm554_vm1, %v15858_v55  ;;  %18642 = vst [vmem:[#allocation84_spill] sm:$0xff] %v15874_v25  ;;  %v15878_v55 = vld [vmem:[#allocation2 + $0xca] sm:$0xff] }
 0x1ce   : > { %18643 = vst [vmem:[#allocation85_spill] sm:$0xff] %v15878_v55 }
 0x1d0   : > { %12682 = vmatmul.mubr.msk.f32.gmra.mrb[12].mxu0 %vm554_vm1, %v15862_v50  ;;  %v15882_v50 = vld [vmem:[#allocation2 + $0xda] sm:$0xff] }
 0x1d1   : > { %12684 = vmatprep.mubr.msk.f32.mxu0 %vm554_vm1, %v15866_v18  ;;  %18644 = vst [vmem:[#allocation86_spill] sm:$0xff] %v15882_v50  ;;  %v15886_v18 = vld [vmem:[#allocation2 + $0xe2] sm:$0xff] }
 0x1d2   : > { %18645 = vst [vmem:[#allocation87_spill] sm:$0xff] %v15886_v18 }
 0x1d4   : > { %12685 = vmatmul.mubr.msk.f32.gmra.mrb[14].mxu0 %vm554_vm1, %v15870_v42  ;;  %v15890_v42 = vld [vmem:[#allocation2 + $0xf2] sm:$0xff] }
 0x1d5   : > { %12687 = vmatprep.mubr.msk.f32.mxu0 %vm554_vm1, %v15874_v25  ;;  %18646 = vst [vmem:[#allocation88_spill] sm:$0xff] %v15890_v42  ;;  %v15894_v25 = vld [vmem:[#allocation2 + $0xfa] sm:$0xff] }
 0x1d6   : > { %18647 = vst [vmem:[#allocation89_spill] sm:$0xff] %v15894_v25 }
 0x1d8   : > { %12688 = vmatmul.mubr.msk.f32.gmra.mrb[16].mxu0 %vm554_vm1, %v15878_v55  ;;  %v15898_v55 = vld [vmem:[#allocation2 + $0x10a] sm:$0xff] }
 0x1d9   : > { %12690 = vmatprep.mubr.msk.f32.mxu0 %vm554_vm1, %v15882_v50  ;;  %18648 = vst [vmem:[#allocation90_spill] sm:$0xff] %v15898_v55  ;;  %v15902_v50 = vld [vmem:[#allocation2 + $0x112] sm:$0xff] }
 0x1da   : > { %18649 = vst [vmem:[#allocation91_spill] sm:$0xff] %v15902_v50 }
 0x1dc   : > { %12691 = vmatmul.mubr.msk.f32.gmra.mrb[18].mxu0 %vm554_vm1, %v15886_v18  ;;  %v15906_v18 = vld [vmem:[#allocation2 + $0x122] sm:$0xff] }
 0x1dd   : > { %12693 = vmatprep.mubr.msk.f32.mxu0 %vm554_vm1, %v15890_v42  ;;  %18650 = vst [vmem:[#allocation92_spill] sm:$0xff] %v15906_v18  ;;  %v15910_v42 = vld [vmem:[#allocation2 + $0x12a] sm:$0xff] }
 0x1de   : > { %18651 = vst [vmem:[#allocation93_spill] sm:$0xff] %v15910_v42 }
 0x1e0   : > { %12694 = vmatmul.mubr.msk.f32.gmra.mrb[20].mxu0 %vm554_vm1, %v15894_v25  ;;  %v15914_v25 = vld [vmem:[#allocation2 + $0x13a] sm:$0xff] }
 0x1e1   : > { %12696 = vmatprep.mubr.msk.f32.mxu0 %vm554_vm1, %v15898_v55  ;;  %18652 = vst [vmem:[#allocation94_spill] sm:$0xff] %v15914_v25  ;;  %v15918_v55 = vld [vmem:[#allocation2 + $0x142] sm:$0xff] }
 0x1e4   : > { %12697 = vmatmul.mubr.msk.f32.gmra.mrb[22].mxu0 %vm554_vm1, %v15902_v50  ;;  %v15922_v50 = vld [vmem:[#allocation2 + $0x152] sm:$0xff] }
 0x1e5   : > { %12699 = vmatprep.mubr.msk.f32.mxu0 %vm554_vm1, %v15906_v18  ;;  %18653 = vst [vmem:[#allocation95_spill] sm:$0xff] %v15922_v50  ;;  %v15926_v18 = vld [vmem:[#allocation2 + $0x15a] sm:$0xff] }
 0x1e8   : > { %12700 = vmatmul.mubr.msk.f32.gmra.mrb[24].mxu0 %vm554_vm1, %v15910_v42  ;;  %v15930_v42 = vld [vmem:[#allocation2 + $0x16a] sm:$0xff] }
 0x1e9   : > { %12702 = vmatprep.mubr.msk.f32.mxu0 %vm554_vm1, %v15914_v25  ;;  %18654 = vst [vmem:[#allocation96_spill] sm:$0xff] %v15930_v42  ;;  %v15934_v25 = vld [vmem:[#allocation2 + $0x172] sm:$0xff] }
 0x1ec   : > { %12703 = vmatmul.mubr.msk.f32.gmra.mrb[26].mxu0 %vm554_vm1, %v15918_v55 }
 0x1ed   : > { %12705 = vmatprep.mubr.msk.f32.mxu0 %vm554_vm1, %v15922_v50  ;;  %v11055_v50 = vld [vmem:[%s18373_s7 + $0x28] sm:$0xff] }
 0x1f0   : > { %12706 = vmatmul.mubr.msk.f32.gmra.mrb[28].mxu0 %vm554_vm1, %v15926_v18 }
 0x1f1   : > { %12708 = vmatprep.mubr.msk.f32.mxu0 %vm554_vm1, %v15930_v42 }
 0x1f4   : > { %12709 = vmatmul.mubr.msk.f32.gmra.mrb[30].mxu0 %vm554_vm1, %v15934_v25 }
 0x1f5   : > { %12713 = vmatprep.mubr.msk.f32.mxu0 %vm554_vm1, %v15594_v51  ;;  %v16006_v51 = vld [vmem:[#allocation2 + $0x188] sm:$0xff] }
 0x1f8   : > { %12714 = vmatmul.mubr.msk.f32.vlgmr.msra.gmra.mrb[0].mxu0 %vm554_vm1, %v15614_v56  ;;  %v11088_v56 = vld [vmem:[%s18373_s7 + $0x30] sm:$0xff] }
 0x1f9   : > { %12762 = vmatpush3.msra.mxu0 %v15813_v41  ;;  %12716 = vmatprep.mubr.msk.f32.mxu0 %vm554_vm1, %v15622_v34  ;;  %v16002_v41 = vld [vmem:[#allocation2 + $0x180] sm:$0xff] }
 0x1fa   : > { %12811 = vmatprep.subr.mxu0 %v11055_v50 }
 0x1fc   : > { %12717 = vmatmul.mubr.msk.f32.gmra.mrb[2].mxu0 %vm554_vm1, %v15638_v33 }
 0x1fd   : > { %12719 = vmatprep.mubr.msk.f32.mxu0 %vm554_vm1, %v15647_v3 }
 0x200   : > { %12720 = vmatmul.mubr.msk.f32.gmra.mrb[4].mxu0 %vm554_vm1, %v15666_v21 }
 0x201   : > { %12722 = vmatprep.mubr.msk.f32.mxu0 %vm554_vm1, %v15675_v58 }
 0x204   : > { %12723 = vmatmul.mubr.msk.f32.gmra.mrb[6].mxu0 %vm554_vm1, %v15687_v27 }
 0x205   : > { %12725 = vmatprep.mubr.msk.f32.mxu0 %vm554_vm1, %v15693_v31 }
 0x208   : > { %12726 = vmatmul.mubr.msk.f32.gmra.mrb[8].mxu0 %vm554_vm1, %v15705_v26 }
 0x209   : > { %12728 = vmatprep.mubr.msk.f32.mxu0 %vm554_vm1, %v15709_v0 }
 0x20c   : > { %12729 = vmatmul.mubr.msk.f32.gmra.mrb[10].mxu0 %vm554_vm1, %v15721_v47 }
 0x20d   : > { %12731 = vmatprep.mubr.msk.f32.mxu0 %vm554_vm1, %v15728_v23 }
 0x210   : > { %12732 = vmatmul.mubr.msk.f32.gmra.mrb[12].mxu0 %vm554_vm1, %v15741_v57 }
 0x211   : > { %12734 = vmatprep.mubr.msk.f32.mxu0 %vm554_vm1, %v15745_v52 }
 0x214   : > { %12735 = vmatmul.mubr.msk.f32.gmra.mrb[14].mxu0 %vm554_vm1, %v15749_v48 }
 0x215   : > { %12737 = vmatprep.mubr.msk.f32.mxu0 %vm554_vm1, %v15753_v49 }
 0x218   : > { %12738 = vmatmul.mubr.msk.f32.gmra.mrb[16].mxu0 %vm554_vm1, %v15757_v37 }
 0x219   : > { %12740 = vmatprep.mubr.msk.f32.mxu0 %vm554_vm1, %v15761_v46 }
 0x21c   : > { %12741 = vmatmul.mubr.msk.f32.gmra.mrb[18].mxu0 %vm554_vm1, %v15765_v45 }
 0x21d   : > { %12743 = vmatprep.mubr.msk.f32.mxu0 %vm554_vm1, %v15769_v61 }
 0x220   : > { %12744 = vmatmul.mubr.msk.f32.gmra.mrb[20].mxu0 %vm554_vm1, %v15773_v17 }
 0x221   : > { %12746 = vmatprep.mubr.msk.f32.mxu0 %vm554_vm1, %v15777_v44 }
 0x224   : > { %12747 = vmatmul.mubr.msk.f32.gmra.mrb[22].mxu0 %vm554_vm1, %v15781_v43 }
 0x225   : > { %12749 = vmatprep.mubr.msk.f32.mxu0 %vm554_vm1, %v15785_v1 }
 0x228   : > { %12750 = vmatmul.mubr.msk.f32.gmra.mrb[24].mxu0 %vm554_vm1, %v15789_v7 }
 0x229   : > { %12752 = vmatprep.mubr.msk.f32.mxu0 %vm554_vm1, %v15793_v29 }
 0x22c   : > { %12753 = vmatmul.mubr.msk.f32.gmra.mrb[26].mxu0 %vm554_vm1, %v15797_v9 }
 0x22d   : > { %12755 = vmatprep.mubr.msk.f32.mxu0 %vm554_vm1, %v15801_v6 }
 0x230   : > { %12756 = vmatmul.mubr.msk.f32.gmra.mrb[28].mxu0 %vm554_vm1, %v15805_v8 }
 0x231   : > { %12758 = vmatprep.mubr.msk.f32.mxu0 %vm554_vm1, %v16002_v41 }
 0x234   : > { %12759 = vmatmul.mubr.msk.f32.gmra.mrb[30].mxu0 %vm554_vm1, %v16006_v51 }
 0x235   : > { %12763 = vmatprep.mubr.msk.f32.mxu0 %vm554_vm1, %v15373_v32 }
 0x238   : > { %12764 = vmatmul.mubr.msk.f32.vlgmr.msra.gmra.mrb[0].mxu0 %vm554_vm1, %v15382_v39 }
 0x239   : > { %12812 = vmatpush3.msra.mxu0 %v11055_v50  ;;  %12766 = vmatprep.mubr.msk.f32.mxu0 %vm554_vm1, %v15399_v19 }
 0x23a   : > { %12861 = vmatprep.subr.mxu0 %v11088_v56 }
 0x23c   : > { %12767 = vmatmul.mubr.msk.f32.gmra.mrb[2].mxu0 %vm554_vm1, %v15407_v35 }
 0x23d   : > { %12769 = vmatprep.mubr.msk.f32.mxu0 %vm554_vm1, %v15425_v15 }
 0x240   : > { %12770 = vmatmul.mubr.msk.f32.gmra.mrb[4].mxu0 %vm554_vm1, %v15435_v30 }
 0x241   : > { %12772 = vmatprep.mubr.msk.f32.mxu0 %vm554_vm1, %v15450_v4 }
 0x244   : > { %12773 = vmatmul.mubr.msk.f32.gmra.mrb[6].mxu0 %vm554_vm1, %v15463_v60 }
 0x245   : > { %12775 = vmatprep.mubr.msk.f32.mxu0 %vm554_vm1, %v15482_v16 }
 0x248   : > { %12776 = vmatmul.mubr.msk.f32.gmra.mrb[8].mxu0 %vm554_vm1, %v15492_v11 }
 0x249   : > { %12778 = vmatprep.mubr.msk.f32.mxu0 %vm554_vm1, %v15510_v62  ;;  %v16035_v50 = vpop.f32.mrb[64].mxu1 }
 0x24a   : > { %18655 = vst [vmem:[#allocation97_spill] sm:$0xff] %v16035_v50  ;;  %v16037_v32 = vpop.f32.mrb[65].mxu1  ;;  %v18685_v50 = vld [vmem:[#allocation84_spill] sm:$0xff] }
 0x24b   : > { %18656 = vst [vmem:[#allocation98_spill] sm:$0xff] %v16037_v32  ;;  %v18684_v32 = vld [vmem:[#allocation83_spill] sm:$0xff] }
 0x24c   : > { %12779 = vmatmul.mubr.msk.f32.gmra.mrb[10].mxu0 %vm554_vm1, %v15517_v40 }
 0x24d   : > { %12781 = vmatprep.mubr.msk.f32.mxu0 %vm554_vm1, %v15531_v24  ;;  %v18669_v24 = vld [vmem:[#allocation66_spill] sm:$0xff] }
 0x24e   : > { %v16043_v39 = vpop.f32.mrb[66].mxu1 }
 0x24f   : > { %18657 = vst [vmem:[#allocation99_spill] sm:$0xff] %v16043_v39  ;;  %v16045_v19 = vpop.f32.mrb[67].mxu1  ;;  %v18683_v39 = vld [vmem:[#allocation82_spill] sm:$0xff] }
 0x250   : > { %18658 = vst [vmem:[#allocation100_spill] sm:$0xff] %v16045_v19  ;;  %12782 = vmatmul.mubr.msk.f32.gmra.mrb[12].mxu0 %vm554_vm1, %v15539_v53  ;;  %v18670_v53 = vld [vmem:[#allocation67_spill] sm:$0xff]  ;;  %v18682_v19 = vld [vmem:[#allocation81_spill] sm:$0xff] }
 0x251   : > { %12784 = vmatprep.mubr.msk.f32.mxu0 %vm554_vm1, %v15546_v54  ;;  %v16101_v54 = vld [vmem:[#allocation2 + $0x181] sm:$0xff] }
 0x253   : > { %v16051_v35 = vpop.f32.mrb[68].mxu1 }
 0x254   : > { %18659 = vst [vmem:[#allocation101_spill] sm:$0xff] %v16051_v35  ;;  %12785 = vmatmul.mubr.msk.f32.gmra.mrb[14].mxu0 %vm554_vm1, %v15563_v36  ;;  %v16055_v15 = vpop.f32.mrb[69].mxu1  ;;  %v18681_v35 = vld [vmem:[#allocation80_spill] sm:$0xff] }
 0x255   : > { %18660 = vst [vmem:[#allocation102_spill] sm:$0xff] %v16055_v15  ;;  %12787 = vmatprep.mubr.msk.f32.mxu0 %vm554_vm1, %v15570_v14  ;;  %v18678_v15 = vld [vmem:[#allocation77_spill] sm:$0xff] }
 0x257   : > { %v16059_v30 = vpop.f32.mrb[70].mxu1 }
 0x258   : > { %18661 = vst [vmem:[#allocation103_spill] sm:$0xff] %v16059_v30  ;;  %12788 = vmatmul.mubr.msk.f32.gmra.mrb[16].mxu0 %vm554_vm1, %v15565_v59  ;;  %v16063_v4 = vpop.f32.mrb[71].mxu1  ;;  %v18676_v30 = vld [vmem:[#allocation75_spill] sm:$0xff] }
 0x259   : > { %18662 = vst [vmem:[#allocation104_spill] sm:$0xff] %v16063_v4  ;;  %12790 = vmatprep.mubr.msk.f32.mxu0 %vm554_vm1, %v15596_v2  ;;  %v18675_v4 = vld [vmem:[#allocation74_spill] sm:$0xff] }
 0x25b   : > { %v16067_v60 = vpop.f32.mrb[72].mxu1 }
 0x25c   : > { %18663 = vst [vmem:[#allocation105_spill] sm:$0xff] %v16067_v60  ;;  %12791 = vmatmul.mubr.msk.f32.gmra.mrb[18].mxu0 %vm554_vm1, %v15598_v38  ;;  %v16071_v16 = vpop.f32.mrb[73].mxu1  ;;  %v18674_v60 = vld [vmem:[#allocation73_spill] sm:$0xff] }
 0x25d   : > { %18664 = vst [vmem:[#allocation106_spill] sm:$0xff] %v16071_v16  ;;  %12793 = vmatprep.mubr.msk.f32.mxu0 %vm554_vm1, %v15631_v5  ;;  %v18673_v16 = vld [vmem:[#allocation72_spill] sm:$0xff] }
 0x25f   : > { %v16075_v11 = vpop.f32.mrb[74].mxu1 }
 0x260   : > { %18665 = vst [vmem:[#allocation107_spill] sm:$0xff] %v16075_v11  ;;  %12794 = vmatmul.mubr.msk.f32.gmra.mrb[20].mxu0 %vm554_vm1, %v15629_v12  ;;  %v16079_v62 = vpop.f32.mrb[75].mxu1  ;;  %v18672_v11 = vld [vmem:[#allocation71_spill] sm:$0xff] }
 0x261   : > { %18666 = vst [vmem:[#allocation108_spill] sm:$0xff] %v16079_v62  ;;  %12796 = vmatprep.mubr.msk.f32.mxu0 %vm554_vm1, %v15662_v10  ;;  %v11121_v62 = vld [vmem:[%s18373_s7 + $0x38] sm:$0xff] }
 0x263   : > { %v16083_v36 = vpop.f32.mrb[76].mxu1 }
 0x264   : > { %18667 = vst [vmem:[#allocation109_spill] sm:$0xff] %v16083_v36  ;;  %12797 = vmatmul.mubr.msk.f32.gmra.mrb[22].mxu0 %vm554_vm1, %v15658_v28  ;;  %v16087_v40 = vpop.f32.mrb[77].mxu1  ;;  %v18671_v36 = vld [vmem:[#allocation70_spill] sm:$0xff] }
 0x265   : > { %18668 = vst [vmem:[#allocation110_spill] sm:$0xff] %v16087_v40  ;;  %12799 = vmatprep.mubr.msk.f32.mxu0 %vm554_vm1, %v15685_v63  ;;  %v16105_v40 = vld [vmem:[#allocation2 + $0x189] sm:$0xff] }
 0x268   : > { %12800 = vmatmul.mubr.msk.f32.gmra.mrb[24].mxu0 %vm554_vm1, %v15681_v22 }
 0x269   : > { %12802 = vmatprep.mubr.msk.f32.mxu0 %vm554_vm1, %v15699_v13 }
 0x26c   : > { %12803 = vmatmul.mubr.msk.f32.gmra.mrb[26].mxu0 %vm554_vm1, %v15701_v20 }
 0x26d   : > { %12805 = vmatprep.mubr.msk.f32.mxu0 %vm554_vm1, %v18669_v24 }
 0x270   : > { %12806 = vmatmul.mubr.msk.f32.gmra.mrb[28].mxu0 %vm554_vm1, %v18670_v53 }
 0x271   : > { %12808 = vmatprep.mubr.msk.f32.mxu0 %vm554_vm1, %v16101_v54 }
 0x274   : > { %12809 = vmatmul.mubr.msk.f32.gmra.mrb[30].mxu0 %vm554_vm1, %v16105_v40 }
 0x275   : > { %12813 = vmatprep.mubr.msk.f32.mxu0 %vm554_vm1, %v18671_v36  ;;  %v18677_v36 = vld [vmem:[#allocation76_spill] sm:$0xff] }
 0x278   : > { %12814 = vmatmul.mubr.msk.f32.vlgmr.msra.gmra.mrb[0].mxu0 %vm554_vm1, %v18672_v11  ;;  %v18680_v11 = vld [vmem:[#allocation79_spill] sm:$0xff] }
 0x279   : > { %12862 = vmatpush3.msra.mxu0 %v11088_v56  ;;  %12816 = vmatprep.mubr.msk.f32.mxu0 %vm554_vm1, %v18673_v16  ;;  %v18679_v56 = vld [vmem:[#allocation78_spill] sm:$0xff] }
 0x27a   : > { %12911 = vmatprep.subr.mxu0 %v11121_v62 }
 0x27c   : > { %12817 = vmatmul.mubr.msk.f32.gmra.mrb[2].mxu0 %vm554_vm1, %v18674_v60 }
 0x27d   : > { %12819 = vmatprep.mubr.msk.f32.mxu0 %vm554_vm1, %v18675_v4 }
 0x280   : > { %12820 = vmatmul.mubr.msk.f32.gmra.mrb[4].mxu0 %vm554_vm1, %v18676_v30 }
 0x281   : > { %12822 = vmatprep.mubr.msk.f32.mxu0 %vm554_vm1, %v18677_v36 }
 0x284   : > { %12823 = vmatmul.mubr.msk.f32.gmra.mrb[6].mxu0 %vm554_vm1, %v18678_v15  ;;  %v18686_v15 = vld [vmem:[#allocation85_spill] sm:$0xff] }
 0x285   : > { %12825 = vmatprep.mubr.msk.f32.mxu0 %vm554_vm1, %v18679_v56  ;;  %v18687_v56 = vld [vmem:[#allocation86_spill] sm:$0xff] }
 0x288   : > { %12826 = vmatmul.mubr.msk.f32.gmra.mrb[8].mxu0 %vm554_vm1, %v18680_v11  ;;  %v18688_v11 = vld [vmem:[#allocation87_spill] sm:$0xff] }
 0x289   : > { %12828 = vmatprep.mubr.msk.f32.mxu0 %vm554_vm1, %v18681_v35  ;;  %v18689_v35 = vld [vmem:[#allocation88_spill] sm:$0xff] }
 0x28c   : > { %12829 = vmatmul.mubr.msk.f32.gmra.mrb[10].mxu0 %vm554_vm1, %v18682_v19  ;;  %v18690_v19 = vld [vmem:[#allocation89_spill] sm:$0xff] }
 0x28d   : > { %12831 = vmatprep.mubr.msk.f32.mxu0 %vm554_vm1, %v18683_v39  ;;  %v18691_v39 = vld [vmem:[#allocation90_spill] sm:$0xff] }
 0x290   : > { %12832 = vmatmul.mubr.msk.f32.gmra.mrb[12].mxu0 %vm554_vm1, %v18684_v32  ;;  %v18692_v32 = vld [vmem:[#allocation91_spill] sm:$0xff] }
 0x291   : > { %12834 = vmatprep.mubr.msk.f32.mxu0 %vm554_vm1, %v18685_v50  ;;  %v18693_v50 = vld [vmem:[#allocation92_spill] sm:$0xff] }
 0x294   : > { %12835 = vmatmul.mubr.msk.f32.gmra.mrb[14].mxu0 %vm554_vm1, %v18686_v15  ;;  %v18694_v15 = vld [vmem:[#allocation93_spill] sm:$0xff] }
 0x295   : > { %12837 = vmatprep.mubr.msk.f32.mxu0 %vm554_vm1, %v18687_v56  ;;  %v18695_v56 = vld [vmem:[#allocation94_spill] sm:$0xff] }
 0x298   : > { %12838 = vmatmul.mubr.msk.f32.gmra.mrb[16].mxu0 %vm554_vm1, %v18688_v11 }
 0x299   : > { %12840 = vmatprep.mubr.msk.f32.mxu0 %vm554_vm1, %v18689_v35  ;;  %v18696_v35 = vld [vmem:[#allocation95_spill] sm:$0xff] }
 0x29c   : > { %12841 = vmatmul.mubr.msk.f32.gmra.mrb[18].mxu0 %vm554_vm1, %v18690_v19 }
 0x29d   : > { %12843 = vmatprep.mubr.msk.f32.mxu0 %vm554_vm1, %v18691_v39 }
 0x2a0   : > { %12844 = vmatmul.mubr.msk.f32.gmra.mrb[20].mxu0 %vm554_vm1, %v18692_v32 }
 0x2a1   : > { %12846 = vmatprep.mubr.msk.f32.mxu0 %vm554_vm1, %v18693_v50  ;;  %v16172_v50 = vld [vmem:[#allocation2 + $0x182] sm:$0xff] }
 0x2a4   : > { %12847 = vmatmul.mubr.msk.f32.gmra.mrb[22].mxu0 %vm554_vm1, %v18694_v15 }
 0x2a5   : > { %12849 = vmatprep.mubr.msk.f32.mxu0 %vm554_vm1, %v18695_v56  ;;  %v16176_v56 = vld [vmem:[#allocation2 + $0x18a] sm:$0xff] }
 0x2a8   : > { %12850 = vmatmul.mubr.msk.f32.gmra.mrb[24].mxu0 %vm554_vm1, %v15918_v55 }
 0x2a9   : > { %12852 = vmatprep.mubr.msk.f32.mxu0 %vm554_vm1, %v18696_v35 }
 0x2ac   : > { %12853 = vmatmul.mubr.msk.f32.gmra.mrb[26].mxu0 %vm554_vm1, %v15926_v18 }
 0x2ad   : > { %12855 = vmatprep.mubr.msk.f32.mxu0 %vm554_vm1, %v15930_v42  ;;  %v11154_v42 = vld [vmem:[%s18373_s7 + $0x40] sm:$0xff] }
 0x2b0   : > { %12856 = vmatmul.mubr.msk.f32.gmra.mrb[28].mxu0 %vm554_vm1, %v15934_v25 }
 0x2b1   : > { %12858 = vmatprep.mubr.msk.f32.mxu0 %vm554_vm1, %v16172_v50 }
 0x2b4   : > { %12859 = vmatmul.mubr.msk.f32.gmra.mrb[30].mxu0 %vm554_vm1, %v16176_v56 }
 0x2b5   : > { %12863 = vmatprep.mubr.msk.f32.mxu0 %vm554_vm1, %v15622_v34  ;;  %v18699_v34 = vld [vmem:[#allocation79_spill] sm:$0xff] }
 0x2b8   : > { %12864 = vmatmul.mubr.msk.f32.vlgmr.msra.gmra.mrb[0].mxu0 %vm554_vm1, %v15638_v33  ;;  %v4484_v33 = vld [vmem:[#allocation2 + $0xc1] sm:$0xff] }
 0x2b9   : > { %12912 = vmatpush3.msra.mxu0 %v11121_v62  ;;  %12866 = vmatprep.mubr.msk.f32.mxu0 %vm554_vm1, %v15647_v3  ;;  %v4485_v3 = vld [vmem:[#allocation2 + $0xc9] sm:$0xff] }
 0x2ba   : > { %12961 = vmatprep.subr.mxu0 %v11154_v42 }
 0x2bc   : > { %12867 = vmatmul.mubr.msk.f32.gmra.mrb[2].mxu0 %vm554_vm1, %v15666_v21  ;;  %v18698_v21 = vld [vmem:[#allocation78_spill] sm:$0xff] }
 0x2bd   : > { %12869 = vmatprep.mubr.msk.f32.mxu0 %vm554_vm1, %v15675_v58  ;;  %v18702_v58 = vld [vmem:[#allocation82_spill] sm:$0xff] }
 0x2c0   : > { %12870 = vmatmul.mubr.msk.f32.gmra.mrb[4].mxu0 %vm554_vm1, %v15687_v27  ;;  %v18709_v27 = vld [vmem:[#allocation94_spill] sm:$0xff] }
 0x2c1   : > { %12872 = vmatprep.mubr.msk.f32.mxu0 %vm554_vm1, %v15693_v31  ;;  %v18710_v31 = vld [vmem:[#allocation96_spill] sm:$0xff] }
 0x2c4   : > { %12873 = vmatmul.mubr.msk.f32.gmra.mrb[6].mxu0 %vm554_vm1, %v15705_v26  ;;  %v18703_v26 = vld [vmem:[#allocation83_spill] sm:$0xff] }
 0x2c5   : > { %12875 = vmatprep.mubr.msk.f32.mxu0 %vm554_vm1, %v15709_v0  ;;  %v18706_v0 = vld [vmem:[#allocation86_spill] sm:$0xff] }
 0x2c8   : > { %12876 = vmatmul.mubr.msk.f32.gmra.mrb[8].mxu0 %vm554_vm1, %v15721_v47  ;;  %v11560_v47 = vld [vmem:[%s18379_s13 + $0x8] sm:$0xff] }
 0x2c9   : > { %12878 = vmatprep.mubr.msk.f32.mxu0 %vm554_vm1, %v15728_v23  ;;  %v4482_v23 = vld [vmem:[#allocation2 + $0xa9] sm:$0xff] }
 0x2cc   : > { %12879 = vmatmul.mubr.msk.f32.gmra.mrb[10].mxu0 %vm554_vm1, %v15741_v57  ;;  %v18712_v57 = vmov 0.0  }
 0x2cd   : > { %12881 = vmatprep.mubr.msk.f32.mxu0 %vm554_vm1, %v15745_v52  ;;  %598 = vst.msk [vmem:[#allocation3] sm:$0xff] %vm597_vm4, %v18712_v57  ;;  %599 = vst.msk [vmem:[#allocation3 + $0x8] sm:$0xff] %vm597_vm4, %v18712_v57  ;;  %v18713_v52 = vld [vmem:[#allocation36_spill] sm:$0xff] }
 0x2ce   : > { %603 = vst.msk [vmem:[#allocation3 + $0x198] sm:$0xff] %vm597_vm4, %v18712_v57  ;;  %604 = vst.msk [vmem:[#allocation3 + $0x1a0] sm:$0xff] %vm597_vm4, %v18712_v57 }
 0x2cf   : > { %601 = vst.msk [vmem:[#allocation3 + $0x10] sm:$0x3] %vm600_vm5, %v18712_v57  ;;  %605 = vst.msk [vmem:[#allocation3 + $0x1a8] sm:$0x3] %vm600_vm5, %v18712_v57 }
 0x2d0   : > { %12882 = vmatmul.mubr.msk.f32.gmra.mrb[12].mxu0 %vm554_vm1, %v15749_v48  ;;  %v18714_v48 = vld [vmem:[#allocation39_spill] sm:$0xff]  ;;  %608 = vst.msk [vmem:[#allocation3 + $0x18] sm:$0x1] %vm607_vm6, %v18712_v57  ;;  %609 = vst.msk [vmem:[#allocation3 + $0x30] sm:$0x1] %vm607_vm6, %v18712_v57 }
 0x2d1   : > { %12884 = vmatprep.mubr.msk.f32.mxu0 %vm554_vm1, %v15753_v49  ;;  %v18715_v49 = vld [vmem:[#allocation38_spill] sm:$0xff]  ;;  %610 = vst.msk [vmem:[#allocation3 + $0x48] sm:$0x1] %vm607_vm6, %v18712_v57  ;;  %611 = vst.msk [vmem:[#allocation3 + $0x60] sm:$0x1] %vm607_vm6, %v18712_v57 }
 0x2d2   : > { %612 = vst.msk [vmem:[#allocation3 + $0x78] sm:$0x1] %vm607_vm6, %v18712_v57  ;;  %613 = vst.msk [vmem:[#allocation3 + $0x90] sm:$0x1] %vm607_vm6, %v18712_v57 }
 0x2d3   : > { %614 = vst.msk [vmem:[#allocation3 + $0xa8] sm:$0x1] %vm607_vm6, %v18712_v57  ;;  %615 = vst.msk [vmem:[#allocation3 + $0xc0] sm:$0x1] %vm607_vm6, %v18712_v57 }
 0x2d4   : > { %12885 = vmatmul.mubr.msk.f32.gmra.mrb[14].mxu0 %vm554_vm1, %v15757_v37  ;;  %v4483_v37 = vld [vmem:[#allocation2 + $0xb1] sm:$0xff]  ;;  %616 = vst.msk [vmem:[#allocation3 + $0xd8] sm:$0x1] %vm607_vm6, %v18712_v57  ;;  %617 = vst.msk [vmem:[#allocation3 + $0xf0] sm:$0x1] %vm607_vm6, %v18712_v57 }
 0x2d5   : > { %12887 = vmatprep.mubr.msk.f32.mxu0 %vm554_vm1, %v15761_v46  ;;  %v4473_v46 = vld [vmem:[#allocation2 + $0x39] sm:$0xff]  ;;  %618 = vst.msk [vmem:[#allocation3 + $0x108] sm:$0x1] %vm607_vm6, %v18712_v57  ;;  %619 = vst.msk [vmem:[#allocation3 + $0x120] sm:$0x1] %vm607_vm6, %v18712_v57 }
 0x2d6   : > { %620 = vst.msk [vmem:[#allocation3 + $0x138] sm:$0x1] %vm607_vm6, %v18712_v57  ;;  %621 = vst.msk [vmem:[#allocation3 + $0x150] sm:$0x1] %vm607_vm6, %v18712_v57 }
 0x2d7   : > { %622 = vst.msk [vmem:[#allocation3 + $0x168] sm:$0x1] %vm607_vm6, %v18712_v57  ;;  %623 = vst.msk [vmem:[#allocation3 + $0x180] sm:$0x1] %vm607_vm6, %v18712_v57 }
 0x2d8   : > { %12888 = vmatmul.mubr.msk.f32.gmra.mrb[16].mxu0 %vm554_vm1, %v15765_v45  ;;  %v4472_v45 = vld [vmem:[#allocation2 + $0x31] sm:$0xff]  ;;  %624 = vst.msk [vmem:[#allocation3 + $0x29] sm:$0x1] %vm607_vm6, %v18712_v57  ;;  %625 = vst.msk [vmem:[#allocation3 + $0x41] sm:$0x1] %vm607_vm6, %v18712_v57 }
 0x2d9   : > { %12890 = vmatprep.mubr.msk.f32.mxu0 %vm554_vm1, %v15769_v61  ;;  %v4474_v61 = vld [vmem:[#allocation2 + $0x49] sm:$0xff]  ;;  %626 = vst.msk [vmem:[#allocation3 + $0x59] sm:$0x1] %vm607_vm6, %v18712_v57  ;;  %627 = vst.msk [vmem:[#allocation3 + $0x71] sm:$0x1] %vm607_vm6, %v18712_v57 }
 0x2da   : > { %628 = vst.msk [vmem:[#allocation3 + $0x89] sm:$0x1] %vm607_vm6, %v18712_v57  ;;  %629 = vst.msk [vmem:[#allocation3 + $0xa1] sm:$0x1] %vm607_vm6, %v18712_v57 }
 0x2db   : > { %630 = vst.msk [vmem:[#allocation3 + $0xb9] sm:$0x1] %vm607_vm6, %v18712_v57  ;;  %631 = vst.msk [vmem:[#allocation3 + $0xd1] sm:$0x1] %vm607_vm6, %v18712_v57 }
 0x2dc   : > { %12891 = vmatmul.mubr.msk.f32.gmra.mrb[18].mxu0 %vm554_vm1, %v15773_v17  ;;  %v4481_v17 = vld [vmem:[#allocation2 + $0x99] sm:$0xff]  ;;  %632 = vst.msk [vmem:[#allocation3 + $0xe9] sm:$0x1] %vm607_vm6, %v18712_v57  ;;  %633 = vst.msk [vmem:[#allocation3 + $0x101] sm:$0x1] %vm607_vm6, %v18712_v57 }
 0x2dd   : > { %12893 = vmatprep.mubr.msk.f32.mxu0 %vm554_vm1, %v15777_v44  ;;  %v4116_v44 = vld [vmem:[#allocation2 + $0x1a0] sm:$0xff]  ;;  %634 = vst.msk [vmem:[#allocation3 + $0x119] sm:$0x1] %vm607_vm6, %v18712_v57  ;;  %635 = vst.msk [vmem:[#allocation3 + $0x131] sm:$0x1] %vm607_vm6, %v18712_v57 }
 0x2de   : > { %636 = vst.msk [vmem:[#allocation3 + $0x149] sm:$0x1] %vm607_vm6, %v18712_v57  ;;  %637 = vst.msk [vmem:[#allocation3 + $0x161] sm:$0x1] %vm607_vm6, %v18712_v57 }
 0x2df   : > { %638 = vst.msk [vmem:[#allocation3 + $0x179] sm:$0x1] %vm607_vm6, %v18712_v57  ;;  %639 = vst.msk [vmem:[#allocation3 + $0x191] sm:$0x1] %vm607_vm6, %v18712_v57 }
 0x2e0   : > { %12894 = vmatmul.mubr.msk.f32.gmra.mrb[20].mxu0 %vm554_vm1, %v15781_v43  ;;  %v4115_v43 = vld [vmem:[#allocation2 + $0x198] sm:$0xff] }
 0x2e1   : > { %12896 = vmatprep.mubr.msk.f32.mxu0 %vm554_vm1, %v15785_v1  ;;  %v4475_v1 = vld [vmem:[#allocation2 + $0x51] sm:$0xff] }
 0x2e4   : > { %12897 = vmatmul.mubr.msk.f32.gmra.mrb[22].mxu0 %vm554_vm1, %v15789_v7  ;;  %v4477_v7 = vld [vmem:[#allocation2 + $0x69] sm:$0xff] }
 0x2e5   : > { %12899 = vmatprep.mubr.msk.f32.mxu0 %vm554_vm1, %v15793_v29  ;;  %v4480_v29 = vld [vmem:[#allocation2 + $0x91] sm:$0xff] }
 0x2e8   : > { %12900 = vmatmul.mubr.msk.f32.gmra.mrb[24].mxu0 %vm554_vm1, %v15797_v9  ;;  %v4479_v9 = vld [vmem:[#allocation2 + $0x81] sm:$0xff] }
 0x2e9   : > { %12902 = vmatprep.mubr.msk.f32.mxu0 %vm554_vm1, %v15801_v6  ;;  %v4476_v6 = vld [vmem:[#allocation2 + $0x61] sm:$0xff] }
 0x2ec   : > { %12903 = vmatmul.mubr.msk.f32.gmra.mrb[26].mxu0 %vm554_vm1, %v15805_v8  ;;  %v4478_v8 = vld [vmem:[#allocation2 + $0x79] sm:$0xff] }
 0x2ed   : > { %12905 = vmatprep.mubr.msk.f32.mxu0 %vm554_vm1, %v16002_v41  ;;  %v16386_v41 = vld [vmem:[%s18368_s2] ss:$0 sm:$0xff] }
 0x2f0   : > { %12906 = vmatmul.mubr.msk.f32.gmra.mrb[28].mxu0 %vm554_vm1, %v16006_v51  ;;  %v18719_v51 = vld [vmem:[#allocation42_spill] sm:$0xff] }
 0x2f1   : > { %12908 = vmatprep.mubr.msk.f32.mxu0 %vm554_vm1, %v4115_v43  ;;  %v18729_v43 = vld [vmem:[#allocation8_spill] sm:$0xff] }
 0x2f4   : > { %12909 = vmatmul.mubr.msk.f32.gmra.mrb[30].mxu0 %vm554_vm1, %v4116_v44  ;;  %v976_v44 = vmul.f32 %v18729_v43, %v16386_v41  ;;  %v18746_v43 = vld [vmem:[#allocation56_spill] sm:$0xff] }
 0x2f5   : > { %12913 = vmatprep.mubr.msk.f32.mxu0 %vm554_vm1, %v4472_v45 }
 0x2f8   : > { %12914 = vmatmul.mubr.msk.f32.vlgmr.msra.gmra.mrb[0].mxu0 %vm554_vm1, %v4473_v46 }
 0x2f9   : > { %12962 = vmatpush3.msra.mxu0 %v11154_v42  ;;  %12916 = vmatprep.mubr.msk.f32.mxu0 %vm554_vm1, %v4474_v61  ;;  %v18717_v42 = vld [vmem:[#allocation40_spill] sm:$0xff] }
 0x2fa   : > { %13461 = vmatprep.subr.mxu0 %v11560_v47 }
 0x2fc   : > { %12917 = vmatmul.mubr.msk.f32.gmra.mrb[2].mxu0 %vm554_vm1, %v4475_v1  ;;  %v18731_v1 = vld [vmem:[#allocation48_spill] sm:$0xff] }
 0x2fd   : > { %12919 = vmatprep.mubr.msk.f32.mxu0 %vm554_vm1, %v4476_v6  ;;  %v18732_v6 = vld [vmem:[#allocation51_spill] sm:$0xff] }
 0x300   : > { %12920 = vmatmul.mubr.msk.f32.gmra.mrb[4].mxu0 %vm554_vm1, %v4477_v7  ;;  %v18733_v7 = vld [vmem:[#allocation11_spill] sm:$0xff] }
 0x301   : > { %12922 = vmatprep.mubr.msk.f32.mxu0 %vm554_vm1, %v4478_v8  ;;  %v977_v8 = vmul.f32 %v16386_v41, %v18733_v7 }
 0x304   : > { %12923 = vmatmul.mubr.msk.f32.gmra.mrb[6].mxu0 %vm554_vm1, %v4479_v9 }
 0x305   : > { %12925 = vmatprep.mubr.msk.f32.mxu0 %vm554_vm1, %v4480_v29 }
 0x308   : > { %12926 = vmatmul.mubr.msk.f32.gmra.mrb[8].mxu0 %vm554_vm1, %v4481_v17 }
 0x309   : > { %12928 = vmatprep.mubr.msk.f32.mxu0 %vm554_vm1, %v4482_v23 }
 0x30c   : > { %12929 = vmatmul.mubr.msk.f32.gmra.mrb[10].mxu0 %vm554_vm1, %v4483_v37  ;;  %v18734_v37 = vld [vmem:[#allocation50_spill] sm:$0xff] }
 0x30d   : > { %12931 = vmatprep.mubr.msk.f32.mxu0 %vm554_vm1, %v4484_v33  ;;  %v18735_v33 = vld [vmem:[#allocation53_spill] sm:$0xff] }
 0x310   : > { %12932 = vmatmul.mubr.msk.f32.gmra.mrb[12].mxu0 %vm554_vm1, %v4485_v3  ;;  %v18736_v3 = vld [vmem:[#allocation10_spill] sm:$0xff] }
 0x311   : > { %12934 = vmatprep.mubr.msk.f32.mxu0 %vm554_vm1, %v15570_v14  ;;  %v4503_v14 = vld [vmem:[#allocation2 + $0x1a1] sm:$0xff] }
 0x314   : > { %12935 = vmatmul.mubr.msk.f32.gmra.mrb[14].mxu0 %vm554_vm1, %v15565_v59  ;;  %v4502_v59 = vld [vmem:[#allocation2 + $0x199] sm:$0xff] }
 0x315   : > { %12937 = vmatprep.mubr.msk.f32.mxu0 %vm554_vm1, %v15596_v2  ;;  %v9361_v2 = vld [vmem:[%s18379_s13] sm:$0xff] }
 0x318   : > { %12938 = vmatmul.mubr.msk.f32.gmra.mrb[16].mxu0 %vm554_vm1, %v15598_v38  ;;  %v18697_v38 = vld [vmem:[#allocation77_spill] sm:$0xff] }
 0x319   : > { %12940 = vmatprep.mubr.msk.f32.mxu0 %vm554_vm1, %v15631_v5  ;;  %v18701_v5 = vld [vmem:[#allocation81_spill] sm:$0xff] }
 0x31c   : > { %12941 = vmatmul.mubr.msk.f32.gmra.mrb[18].mxu0 %vm554_vm1, %v15629_v12  ;;  %v18700_v12 = vld [vmem:[#allocation80_spill] sm:$0xff] }
 0x31d   : > { %12943 = vmatprep.mubr.msk.f32.mxu0 %vm554_vm1, %v15662_v10  ;;  %v18705_v10 = vld [vmem:[#allocation85_spill] sm:$0xff] }
 0x320   : > { %12944 = vmatmul.mubr.msk.f32.gmra.mrb[20].mxu0 %vm554_vm1, %v15658_v28  ;;  %v18704_v28 = vld [vmem:[#allocation84_spill] sm:$0xff] }
 0x321   : > { %12946 = vmatprep.mubr.msk.f32.mxu0 %vm554_vm1, %v15685_v63  ;;  %v18708_v63 = vld [vmem:[#allocation92_spill] sm:$0xff] }
 0x324   : > { %12947 = vmatmul.mubr.msk.f32.gmra.mrb[22].mxu0 %vm554_vm1, %v15681_v22  ;;  %v18707_v22 = vld [vmem:[#allocation88_spill] sm:$0xff] }
 0x325   : > { %12949 = vmatprep.mubr.msk.f32.mxu0 %vm554_vm1, %v15699_v13  ;;  %v4889_v13 = vld [vmem:[#allocation2 + $0x19a] sm:$0xff] }
 0x328   : > { %12950 = vmatmul.mubr.msk.f32.gmra.mrb[24].mxu0 %vm554_vm1, %v15701_v20  ;;  %v18711_v20 = vld [vmem:[#allocation37_spill] sm:$0xff] }
 0x329   : > { %12952 = vmatprep.mubr.msk.f32.mxu0 %vm554_vm1, %v18669_v24  ;;  %v18726_v24 = vld [vmem:[#allocation7_spill] sm:$0xff] }
 0x32c   : > { %12953 = vmatmul.mubr.msk.f32.gmra.mrb[26].mxu0 %vm554_vm1, %v18670_v53  ;;  %v973_v53 = vmul.f32 %v16386_v41, %v18726_v24  ;;  %v18745_v24 = vld [vmem:[#allocation17_spill] sm:$0xff] }
 0x32d   : > { %12955 = vmatprep.mubr.msk.f32.mxu0 %vm554_vm1, %v16101_v54  ;;  %v18727_v54 = vld [vmem:[#allocation46_spill] sm:$0xff] }
 0x330   : > { %12956 = vmatmul.mubr.msk.f32.gmra.mrb[28].mxu0 %vm554_vm1, %v16105_v40 }
 0x331   : > { %12958 = vmatprep.mubr.msk.f32.mxu0 %vm554_vm1, %v4502_v59  ;;  %v978_v59 = vmul.f32 %v18736_v3, %v16386_v41 }
 0x334   : > { %12959 = vmatmul.mubr.msk.f32.gmra.mrb[30].mxu0 %vm554_vm1, %v4503_v14 }
 0x335   : > { %12963 = vmatprep.mubr.msk.f32.mxu0 %vm554_vm1, %v18673_v16  ;;  %v18725_v16 = vld [vmem:[#allocation6_spill] sm:$0xff] }
 0x336   : > { %v974_v62 = vmul.f32 %v18725_v16, %v16386_v41 }
 0x338   : > { %12964 = vmatmul.mubr.msk.f32.vlgmr.msra.gmra.mrb[0].mxu0 %vm554_vm1, %v18674_v60 }
 0x339   : > { %12966 = vmatprep.mubr.msk.f32.mxu0 %vm554_vm1, %v18675_v4  ;;  %13462 = vmatpush3.msra.mxu0 %v11560_v47  ;;  %v18724_v4 = vld [vmem:[#allocation47_spill] sm:$0xff]  ;;  %v18730_v47 = vld [vmem:[#allocation9_spill] sm:$0xff] }
 0x33a   : > { %13511 = vmatprep.subr.mxu0 %v9361_v2  ;;  %v975_v61 = vmul.f32 %v16386_v41, %v18730_v47  ;;  %v18747_v47 = vld [vmem:[#allocation59_spill] sm:$0xff] }
 0x33c   : > { %12967 = vmatmul.mubr.msk.f32.gmra.mrb[2].mxu0 %vm554_vm1, %v18676_v30  ;;  %v18723_v30 = vld [vmem:[#allocation44_spill] sm:$0xff] }
 0x33d   : > { %12969 = vmatprep.mubr.msk.f32.mxu0 %vm554_vm1, %v18677_v36  ;;  %v18728_v36 = vld [vmem:[#allocation49_spill] sm:$0xff] }
 0x340   : > { %12970 = vmatmul.mubr.msk.f32.gmra.mrb[4].mxu0 %vm554_vm1, %v18697_v38  ;;  %v18737_v38 = vld [vmem:[#allocation13_spill] sm:$0xff] }
 0x341   : > { %12972 = vmatprep.mubr.msk.f32.mxu0 %vm554_vm1, %v18698_v21  ;;  %v979_v21 = vmul.f32 %v16386_v41, %v18737_v38  ;;  %v18749_v38 = vld [vmem:[#allocation18_spill] sm:$0xff] }
 0x344   : > { %12973 = vmatmul.mubr.msk.f32.gmra.mrb[6].mxu0 %vm554_vm1, %v18699_v34 }
 0x345   : > { %12975 = vmatprep.mubr.msk.f32.mxu0 %vm554_vm1, %v18700_v12  ;;  %v18738_v12 = vld [vmem:[#allocation52_spill] sm:$0xff] }
 0x348   : > { %12976 = vmatmul.mubr.msk.f32.gmra.mrb[8].mxu0 %vm554_vm1, %v18701_v5  ;;  %v18739_v5 = vld [vmem:[#allocation55_spill] sm:$0xff] }
 0x349   : > { %12978 = vmatprep.mubr.msk.f32.mxu0 %vm554_vm1, %v18702_v58 }
 0x34c   : > { %12979 = vmatmul.mubr.msk.f32.gmra.mrb[10].mxu0 %vm554_vm1, %v18703_v26 }
 0x34d   : > { %12981 = vmatprep.mubr.msk.f32.mxu0 %vm554_vm1, %v18704_v28  ;;  %v18740_v28 = vld [vmem:[#allocation12_spill] sm:$0xff] }
 0x350   : > { %12982 = vmatmul.mubr.msk.f32.gmra.mrb[12].mxu0 %vm554_vm1, %v18705_v10  ;;  %v980_v10 = vmul.f32 %v18740_v28, %v16386_v41 }
 0x351   : > { %12984 = vmatprep.mubr.msk.f32.mxu0 %vm554_vm1, %v18706_v0 }
 0x354   : > { %12985 = vmatmul.mubr.msk.f32.gmra.mrb[14].mxu0 %vm554_vm1, %v18688_v11 }
 0x355   : > { %12987 = vmatprep.mubr.msk.f32.mxu0 %vm554_vm1, %v18707_v22  ;;  %v18741_v22 = vld [vmem:[#allocation15_spill] sm:$0xff] }
 0x358   : > { %12988 = vmatmul.mubr.msk.f32.gmra.mrb[16].mxu0 %vm554_vm1, %v18690_v19  ;;  %v16397_v19 = vld [vmem:[%s18369_s3] ss:$0 sm:$0xff] }
 0x359   : > { %12990 = vmatprep.mubr.msk.f32.mxu0 %vm554_vm1, %v18691_v39  ;;  %v16421_v11 = vadd.f32 %v16397_v19, %v974_v62  ;;  %v16427_v46 = vadd.f32 %v16397_v19, %v973_v53  ;;  %v16439_v29 = vadd.f32 %v16397_v19, %v976_v44  ;;  %v16443_v23 = vadd.f32 %v16397_v19, %v975_v61 }
 0x35a   : > { %v16452_v14 = vadd.f32 %v16397_v19, %v977_v8  ;;  %v16463_v58 = vadd.f32 %v16397_v19, %v978_v59  ;;  %v16469_v0 = vadd.f32 %v16397_v19, %v979_v21  ;;  %v983_v53 = vmul.f32 %v16386_v41, %v18745_v24 }
 0x35b   : > { %v10796_v9 = vmul.f32 -1.442695, %v16421_v11  ;;  %v10795_v17 = vmul.f32 -1.442695, %v16427_v46  ;;  %v10797_v34 = vmul.f32 -1.442695, %v16443_v23  ;;  %v986_v21 = vmul.f32 %v18749_v38, %v16386_v41 }
 0x35c   : > { %12991 = vmatmul.mubr.msk.f32.gmra.mrb[18].mxu0 %vm554_vm1, %v18692_v32  ;;  %v18721_v32 = vld [vmem:[#allocation4_spill] sm:$0xff]  ;;  %v10799_v26 = vmul.f32 -1.442695, %v16452_v14  ;;  %v10801_v16 = vmul.f32 -1.442695, %v16469_v0  ;;  %v16501_v59 = vadd.f32 %v16397_v19, %v983_v53 }
 0x35d   : > { %12993 = vmatprep.mubr.msk.f32.mxu0 %vm554_vm1, %v18708_v63  ;;  %v972_v39 = vmul.f32 %v18721_v32, %v16386_v41  ;;  %v981_v63 = vmul.f32 %v16386_v41, %v18741_v22  ;;  %v10800_v32 = vmul.f32 -1.442695, %v16463_v58  ;;  %v16517_v24 = vadd.f32 %v16397_v19, %v986_v21  ;;  %v18753_v53 = vld [vmem:[#allocation60_spill] sm:$0xff] }
 0x35f   : > { %v16406_v60 = vadd.f32 %v16397_v19, %v972_v39  ;;  %v16479_v39 = vadd.f32 %v16397_v19, %v980_v10  ;;  %v16485_v62 = vadd.f32 %v16397_v19, %v981_v63  ;;  %v18751_v10 = vld [vmem:[#allocation19_spill] sm:$0xff]  ;;  %v18752_v63 = vld [vmem:[#allocation61_spill] sm:$0xff]  ;;  %v10808_v21 = vmul.f32 -1.442695, %v16517_v24 }
 0x360   : > { %12994 = vmatmul.mubr.msk.f32.gmra.mrb[20].mxu0 %vm554_vm1, %v18694_v15  ;;  %v985_v22 = vmul.f32 %v16386_v41, %v18751_v10 }
 0x361   : > { %12996 = vmatprep.mubr.msk.f32.mxu0 %vm554_vm1, %v18709_v27  ;;  %v18742_v27 = vld [vmem:[#allocation54_spill] sm:$0xff]  ;;  %v10802_v7 = vmul.f32 -1.442695, %v16479_v39  ;;  %v10803_v3 = vmul.f32 -1.442695, %v16485_v62 }
 0x364   : > { %12997 = vmatmul.mubr.msk.f32.gmra.mrb[22].mxu0 %vm554_vm1, %v15918_v55  ;;  %v4890_v55 = vld [vmem:[#allocation2 + $0x1a2] sm:$0xff] }
 0x365   : > { %12999 = vmatprep.mubr.msk.f32.mxu0 %vm554_vm1, %v18696_v35  ;;  %v18722_v35 = vld [vmem:[#allocation5_spill] sm:$0xff] }
 0x366   : > { %v971_v15 = vmul.f32 %v16386_v41, %v18722_v35  ;;  %v18744_v35 = vld [vmem:[#allocation14_spill] sm:$0xff] }
 0x368   : > { %13000 = vmatmul.mubr.msk.f32.gmra.mrb[24].mxu0 %vm554_vm1, %v15926_v18  ;;  %v18716_v18 = vld [vmem:[#allocation41_spill] sm:$0xff]  ;;  %v16411_v40 = vadd.f32 %v16397_v19, %v971_v15  ;;  %v982_v15 = vmul.f32 %v18744_v35, %v16386_v41  ;;  %v10805_v35 = vmul.f32 -1.442695, %v16501_v59 }
 0x369   : > { %13002 = vmatprep.mubr.msk.f32.mxu0 %vm554_vm1, %v18710_v31 }
 0x36a   : > { %v10793_v45 = vmul.f32 -1.442695, %v16411_v40  ;;  %v16495_v8 = vadd.f32 %v16397_v19, %v982_v15 }
 0x36c   : > { %13003 = vmatmul.mubr.msk.f32.gmra.mrb[26].mxu0 %vm554_vm1, %v15934_v25  ;;  %v18718_v25 = vld [vmem:[#allocation43_spill] sm:$0xff] }
 0x36d   : > { %13005 = vmatprep.mubr.msk.f32.mxu0 %vm554_vm1, %v16172_v50  ;;  %v18720_v50 = vld [vmem:[#allocation45_spill] sm:$0xff] }
 0x370   : > { %13006 = vmatmul.mubr.msk.f32.gmra.mrb[28].mxu0 %vm554_vm1, %v16176_v56  ;;  %v10794_v56 = vmul.f32 -1.442695, %v16406_v60 }
 0x371   : > { %13008 = vmatprep.mubr.msk.f32.mxu0 %vm554_vm1, %v4889_v13  ;;  %v18743_v13 = vld [vmem:[#allocation57_spill] sm:$0xff] }
 0x372   : > { %14334 = vpow2.f32 %v10794_v56 }
 0x373   : > { %14336 = vpow2.f32 %v10793_v45 }
 0x374   : > { %13009 = vmatmul.mubr.msk.f32.gmra.mrb[30].mxu0 %vm554_vm1, %v4890_v55  ;;  %14338 = vpow2.f32 %v10796_v9  ;;  %v18748_v9 = vld [vmem:[#allocation16_spill] sm:$0xff] }
 0x375   : > { %13463 = vmatprep.mubr.msk.f32.mxu0 %vm554_vm1, %v18711_v20  ;;  %14340 = vpow2.f32 %v10795_v17  ;;  %v984_v17 = vmul.f32 %v18748_v9, %v16386_v41  ;;  %v17290_v20 = vld [vmem:[%s18376_s10 + $0x10] sm:$0xf] }
 0x378   : > { %13464 = vmatmul.mubr.msk.f32.vlgmr.msra.gmra.mrb[32].mxu0 %vm554_vm1, %v18713_v52  ;;  %v6297_v52 = vld [vmem:[#allocation3 + $0xa] sm:$0xff] }
 0x379   : > { %13466 = vmatprep.mubr.msk.f32.mxu0 %vm554_vm1, %v18714_v48  ;;  %13512 = vmatpush3.msra.mxu0 %v9361_v2  ;;  %v10798_v2 = vmul.f32 -1.442695, %v16439_v29  ;;  %v6296_v48 = vld [vmem:[#allocation3 + $0x2] sm:$0xff] }
 0x37b   : > { %14342 = vpow2.f32 %v10798_v2 }
 0x37c   : > { %13467 = vmatmul.mubr.msk.f32.gmra.mrb[34].mxu0 %vm554_vm1, %v18715_v49  ;;  %14344 = vpow2.f32 %v10797_v34  ;;  %v14335_v31 = vpop.eup %14334  ;;  %v18750_v34 = vld [vmem:[#allocation58_spill] sm:$0xff] }
 0x37d   : > { %13469 = vmatprep.mubr.msk.f32.mxu0 %vm554_vm1, %v18716_v18  ;;  %v14337_v55 = vpop.eup %14336  ;;  %14346 = vpow2.f32 %v10799_v26  ;;  %v1139_v56 = vadd.f32 1.0, %v14335_v31 }
 0x37e   : > { %v14339_v44 = vpop.eup %14338  ;;  %v1138_v45 = vadd.f32 1.0, %v14337_v55  ;;  %14348 = vpow2.f32 %v10800_v32  ;;  %v10804_v55 = vmul.f32 -1.442695, %v16495_v8  ;;  %v16513_v32 = vadd.f32 %v16397_v19, %v984_v17  ;;  %v18756_v17 = vld [vmem:[#allocation20_spill] sm:$0xff] }
 0x37f   : > { %v14341_v61 = vpop.eup %14340  ;;  %14350 = vpow2.f32 %v10801_v16  ;;  %v1141_v2 = vadd.f32 1.0, %v14339_v44  ;;  %v16522_v44 = vadd.f32 %v16397_v19, %v985_v22 }
 0x380   : > { %13470 = vmatmul.mubr.msk.f32.gmra.mrb[36].mxu0 %vm554_vm1, %v18717_v42  ;;  %14352 = vrcp.f32 %v1139_v56  ;;  %v1140_v28 = vadd.f32 1.0, %v14341_v61  ;;  %v10806_v9 = vmul.f32 -1.442695, %v16513_v32 }
 0x381   : > { %13472 = vmatprep.mubr.msk.f32.mxu0 %vm554_vm1, %v18718_v25  ;;  %14354 = vrcp.f32 %v1138_v45  ;;  %v18754_v45 = vld [vmem:[#allocation21_spill] sm:$0xff]  ;;  %v10807_v10 = vmul.f32 -1.442695, %v16522_v44 }
 0x382   : > { %14356 = vpow2.f32 %v10802_v7  ;;  %v987_v61 = vmul.f32 %v16386_v41, %v18754_v45  ;;  %v18755_v7 = vld [vmem:[#allocation63_spill] sm:$0xff] }
 0x383   : > { %14358 = vpow2.f32 %v10803_v3  ;;  %v988_v3 = vmul.f32 %v18756_v17, %v16386_v41 }
 0x384   : > { %13473 = vmatmul.mubr.msk.f32.gmra.mrb[38].mxu0 %vm554_vm1, %v18719_v51  ;;  %14360 = vrcp.f32 %v1141_v2  ;;  %v16536_v22 = vadd.f32 %v16397_v19, %v987_v61 }
 0x385   : > { %13475 = vmatprep.mubr.msk.f32.mxu0 %vm554_vm1, %v18720_v50  ;;  %v14343_v26 = vpop.eup %14342  ;;  %14362 = vrcp.f32 %v1140_v28 }
 0x386   : > { %v14345_v31 = vpop.eup %14344  ;;  %v1143_v16 = vadd.f32 1.0, %v14343_v26  ;;  %14364 = vpow2.f32 %v10804_v55  ;;  %v18757_v26 = vld [vmem:[#allocation62_spill] sm:$0xff] }
 0x387   : > { %v14347_v15 = vpop.eup %14346  ;;  %v1142_v56 = vadd.f32 1.0, %v14345_v31  ;;  %14366 = vpow2.f32 %v10805_v35  ;;  %v18758_v31 = vld [vmem:[#allocation23_spill] sm:$0xff] }
 0x388   : > { %13476 = vmatmul.mubr.msk.f32.gmra.mrb[40].mxu0 %vm554_vm1, %v18723_v30  ;;  %v1144_v2 = vadd.f32 1.0, %v14347_v15  ;;  %v14349_v38 = vpop.eup %14348  ;;  %14368 = vrcp.f32 %v1143_v16  ;;  %v989_v55 = vmul.f32 %v16386_v41, %v18758_v31  ;;  %v18759_v15 = vld [vmem:[#allocation65_spill] sm:$0xff]  ;;  %v16547_v16 = vadd.f32 %v16397_v19, %v988_v3 }
 0x389   : > { %13478 = vmatprep.mubr.msk.f32.mxu0 %vm554_vm1, %v18724_v4  ;;  %v14351_v28 = vpop.eup %14350  ;;  %14370 = vrcp.f32 %v1142_v56  ;;  %v18760_v56 = vld [vmem:[#allocation22_spill] sm:$0xff]  ;;  %v1145_v17 = vadd.f32 1.0, %v14349_v38  ;;  %v10809_v31 = vmul.f32 -1.442695, %v16536_v22 }
 0x38a   : > { %v16544_v35 = vpop.eup %14352  ;;  %14372 = vpow2.f32 %v10806_v9  ;;  %v990_v45 = vmul.f32 %v18760_v56, %v16386_v41  ;;  %v1146_v3 = vadd.f32 1.0, %v14351_v28  ;;  %v16619_v56 = vadd.f32 %v16397_v19, %v989_v55  ;;  %v11221_v55 = vld [vmem:[%s18376_s10 + $0x4] sm:$0xf] }
 0x38b   : > { %v14355_v61 = vpop.eup %14354  ;;  %14374 = vrcp.f32 %v1144_v2  ;;  %v18761_v2 = vld [vmem:[#allocation64_spill] sm:$0xff]  ;;  %v10810_v28 = vmul.f32 -1.442695, %v16547_v16  ;;  %13011 = vmatprep.subr.msk.mxu1 %vm5743_vm7, %v11221_v55 }
 0x38c   : > { %13479 = vmatmul.mubr.msk.f32.gmra.mrb[42].mxu0 %vm554_vm1, %v18727_v54  ;;  %v14357_v9 = vpop.eup %14356  ;;  %14376 = vpow2.f32 %v10808_v21  ;;  %v16627_v21 = vadd.f32 %v16397_v19, %v990_v45  ;;  %13012 = vmatpush3.msk.msra.mxu1 %vm5743_vm7, %v11221_v55 }
 0x38d   : > { %13481 = vmatprep.mubr.msk.f32.mxu0 %vm554_vm1, %v18728_v36  ;;  %v14359_v38 = vpop.eup %14358  ;;  %14378 = vpow2.f32 %v10807_v10 }
 0x38e   : > { %v14361_v57 = vpop.eup %14360  ;;  %14380 = vrcp.f32 %v1145_v17  ;;  %v1148_v45 = vadd.f32 1.0, %v14359_v38  ;;  %v10812_v38 = vmul.f32 -1.442695, %v16627_v21 }
 0x38f   : > { %14382 = vrcp.f32 %v1146_v3  ;;  %v1235_v3 = vmul.f32 %v16544_v35, %v16406_v60 }
 0x390   : > { %13482 = vmatmul.mubr.msk.f32.gmra.mrb[44].mxu0 %vm554_vm1, %v18731_v1  ;;  %14384 = vpow2.f32 %v10809_v31 }
 0x391   : > { %13484 = vmatprep.mubr.msk.f32.mxu0 %vm554_vm1, %v18732_v6  ;;  %14386 = vpow2.f32 %v10810_v28 }
 0x394   : > { %13485 = vmatmul.mubr.msk.f32.gmra.mrb[46].mxu0 %vm554_vm1, %v18734_v37 }
 0x395   : > { %13487 = vmatprep.mubr.msk.f32.mxu0 %vm554_vm1, %v18735_v33 }
 0x398   : > { %13488 = vmatmul.mubr.msk.f32.gmra.mrb[48].mxu0 %vm554_vm1, %v18738_v12 }
 0x399   : > { %13490 = vmatprep.mubr.msk.f32.mxu0 %vm554_vm1, %v18739_v5 }
 0x39c   : > { %13491 = vmatmul.mubr.msk.f32.gmra.mrb[50].mxu0 %vm554_vm1, %v18742_v27 }
 0x39d   : > { %13493 = vmatprep.mubr.msk.f32.mxu0 %vm554_vm1, %v18743_v13  ;;  %v10811_v13 = vmul.f32 -1.442695, %v16619_v56 }
 0x3a0   : > { %13494 = vmatmul.mubr.msk.f32.gmra.mrb[52].mxu0 %vm554_vm1, %v18746_v43 }
 0x3a1   : > { %13496 = vmatprep.mubr.msk.f32.mxu0 %vm554_vm1, %v18747_v47  ;;  %v18765_v47 = vld [vmem:[#allocation68_spill] sm:$0xff] }
 0x3a4   : > { %13497 = vmatmul.mubr.msk.f32.gmra.mrb[54].mxu0 %vm554_vm1, %v18750_v34 }
 0x3a5   : > { %13499 = vmatprep.mubr.msk.f32.mxu0 %vm554_vm1, %v18752_v63  ;;  %v1147_v63 = vadd.f32 1.0, %v14357_v9 }
 0x3a7   : > { %14388 = vrcp.f32 %v1147_v63 }
 0x3a8   : > { %13500 = vmatmul.mubr.msk.f32.gmra.mrb[56].mxu0 %vm554_vm1, %v18753_v53  ;;  %v14363_v53 = vpop.eup %14362  ;;  %14390 = vrcp.f32 %v1148_v45 }
 0x3a9   : > { %13502 = vmatprep.mubr.msk.f32.mxu0 %vm554_vm1, %v18755_v7  ;;  %v18763_v7 = vld [vmem:[#allocation69_spill] sm:$0xff]  ;;  %v14365_v34 = vpop.eup %14364  ;;  %v1236_v55 = vmul.f32 %v14363_v53, %v16427_v46  ;;  %14392 = vpow2.f32 %v10811_v13 }
 0x3aa   : > { %v14367_v43 = vpop.eup %14366  ;;  %14394 = vpow2.f32 %v10812_v38  ;;  %v18770_v38 = vld [vmem:[#allocation31_spill] sm:$0xff] }
 0x3ab   : > { %v14369_v9 = vpop.eup %14368 }
 0x3ac   : > { %13503 = vmatmul.mubr.msk.f32.gmra.mrb[58].mxu0 %vm554_vm1, %v18757_v26 }
 0x3ad   : > { %13505 = vmatprep.mubr.msk.f32.mxu0 %vm554_vm1, %v18759_v15  ;;  %v18762_v15 = vld [vmem:[#allocation25_spill] sm:$0xff] }
 0x3ae   : > { %v991_v26 = vmul.f32 %v16386_v41, %v18762_v15  ;;  %v1234_v15 = vmul.f32 %v14355_v61, %v16411_v40  ;;  %v18766_v61 = vld [vmem:[#allocation27_spill] sm:$0xff] }
 0x3af   : > { %v993_v17 = vmul.f32 %v16386_v41, %v18766_v61  ;;  %v1149_v61 = vadd.f32 1.0, %v14365_v34 }
 0x3b0   : > { %13506 = vmatmul.mubr.msk.f32.gmra.mrb[60].mxu0 %vm554_vm1, %v18761_v2  ;;  %v18764_v2 = vld [vmem:[#allocation24_spill] sm:$0xff]  ;;  %v16641_v40 = vadd.f32 %v16397_v19, %v991_v26  ;;  %v14371_v26 = vpop.eup %14370 }
 0x3b1   : > { %13508 = vmatprep.mubr.msk.f32.mxu0 %vm554_vm1, %v18763_v7  ;;  %v992_v10 = vmul.f32 %v18764_v2, %v16386_v41  ;;  %v5613_v7 = vld [vmem:[#allocation3 + $0x1] sm:$0xff]  ;;  %v5614_v2 = vld [vmem:[#allocation3 + $0x9] sm:$0xff]  ;;  %v16660_v28 = vadd.f32 %v16397_v19, %v993_v17  ;;  %v1238_v53 = vmul.f32 %v14371_v26, %v16443_v23  ;;  %14396 = vrcp.f32 %v1149_v61 }
 0x3b2   : > { %13013 = vmatprep.mubr.msk.f32.mxu1 %vm597_vm4, %v5613_v7  ;;  %v1150_v7 = vadd.f32 1.0, %v14367_v43  ;;  %v10813_v35 = vmul.f32 -1.442695, %v16641_v40  ;;  %v1237_v43 = vmul.f32 %v14361_v57, %v16421_v11  ;;  %v997_v23 = vmul.f32 %v16386_v41, %v18770_v38 }
 0x3b3   : > { %v16651_v31 = vadd.f32 %v16397_v19, %v992_v10  ;;  %13014 = vmatmul.mubr.msk.f32.vlgmr.msra.gmra.mrb[78].mxu1 %vm597_vm4, %v5614_v2  ;;  %v18768_v10 = vld [vmem:[#allocation29_spill] sm:$0xff]  ;;  %v18769_v2 = vld [vmem:[#allocation28_spill] sm:$0xff]  ;;  %v10815_v11 = vmul.f32 -1.442695, %v16660_v28 }
 0x3b4   : > { %13509 = vmatmul.mubr.msk.f32.gmra.mrb[62].mxu0 %vm554_vm1, %v18765_v47  ;;  %v18767_v47 = vld [vmem:[#allocation26_spill] sm:$0xff]  ;;  %v995_v46 = vmul.f32 %v16386_v41, %v18768_v10  ;;  %14398 = vrcp.f32 %v1150_v7  ;;  %v996_v17 = vmul.f32 %v18769_v2, %v16386_v41 }
 0x3b5   : > { %13513 = vmatprep.mubr.msk.f32.mxu0 %vm554_vm1, %v1234_v15  ;;  %v14373_v15 = vpop.eup %14372  ;;  %v994_v27 = vmul.f32 %v18767_v47, %v16386_v41  ;;  %v10814_v47 = vmul.f32 -1.442695, %v16651_v31  ;;  %14400 = vpow2.f32 %v10813_v35 }
 0x3b6   : > { %v14375_v60 = vpop.eup %14374  ;;  %v1151_v13 = vadd.f32 1.0, %v14373_v15  ;;  %v16676_v57 = vadd.f32 %v16397_v19, %v995_v46  ;;  %v16685_v46 = vadd.f32 %v16397_v19, %v996_v17 }
 0x3b7   : > { %v14377_v34 = vpop.eup %14376  ;;  %v16669_v45 = vadd.f32 %v16397_v19, %v994_v27  ;;  %v1239_v27 = vmul.f32 %v14369_v9, %v16439_v29  ;;  %14402 = vpow2.f32 %v10814_v47  ;;  %v1240_v15 = vmul.f32 %v14375_v60, %v16452_v14  ;;  %v18772_v14 = vld [vmem:[#allocation33_spill] sm:$0xff] }
 0x3b8   : > { %13514 = vmatmul.mubr.msk.f32.vlgmr.msra.gmra.mrb[32].mxu0 %vm554_vm1, %v1235_v3  ;;  %v14379_v63 = vpop.eup %14378  ;;  %v1153_v7 = vadd.f32 1.0, %v14377_v34  ;;  %14404 = vrcp.f32 %v1151_v13  ;;  %v10817_v29 = vmul.f32 -1.442695, %v16676_v57  ;;  %v16692_v9 = vadd.f32 %v16397_v19, %v997_v23 }
 0x3b9   : > { %13516 = vmatprep.mubr.msk.f32.mxu0 %vm554_vm1, %v1236_v55  ;;  %v14381_v3 = vpop.eup %14380  ;;  %v1152_v55 = vadd.f32 1.0, %v14379_v63  ;;  %v10816_v10 = vmul.f32 -1.442695, %v16669_v45  ;;  %14406 = vpow2.f32 %v10815_v11  ;;  %v999_v60 = vmul.f32 %v16386_v41, %v18772_v14 }
 0x3ba   : > { %v14383_v26 = vpop.eup %14382  ;;  %v1241_v47 = vmul.f32 %v14381_v3, %v16463_v58  ;;  %v10818_v23 = vmul.f32 -1.442695, %v16685_v46  ;;  %v10819_v3 = vmul.f32 -1.442695, %v16692_v9 }
 0x3bb   : > { %v14385_v61 = vpop.eup %14384  ;;  %14408 = vrcp.f32 %v1152_v55  ;;  %v1242_v17 = vmul.f32 %v14383_v26, %v16469_v0  ;;  %v16708_v0 = vadd.f32 %v16397_v19, %v999_v60  ;;  %v18774_v26 = vld [vmem:[#allocation35_spill] sm:$0xff] }
 0x3bc   : > { %13517 = vmatmul.mubr.msk.f32.gmra.mrb[34].mxu0 %vm554_vm1, %v1237_v43  ;;  %v14387_v35 = vpop.eup %14386  ;;  %v18771_v43 = vld [vmem:[#allocation30_spill] sm:$0xff]  ;;  %v1154_v63 = vadd.f32 1.0, %v14385_v61  ;;  %14410 = vrcp.f32 %v1153_v7  ;;  %v1001_v55 = vmul.f32 %v16386_v41, %v18774_v26 }
 0x3bd   : > { %13519 = vmatprep.mubr.msk.f32.mxu0 %vm554_vm1, %v1238_v53  ;;  %v998_v2 = vmul.f32 %v18771_v43, %v16386_v41  ;;  %v14389_v53 = vpop.eup %14388  ;;  %v1155_v11 = vadd.f32 1.0, %v14387_v35  ;;  %14412 = vpow2.f32 %v10816_v10  ;;  %v18773_v43 = vld [vmem:[#allocation32_spill] sm:$0xff] }
 0x3be   : > { %v14391_v34 = vpop.eup %14390  ;;  %14414 = vpow2.f32 %v10817_v29  ;;  %v1243_v7 = vmul.f32 %v14389_v53, %v16479_v39  ;;  %v10821_v39 = vmul.f32 -1.442695, %v16708_v0  ;;  %v16724_v53 = vadd.f32 %v16397_v19, %v1001_v55 }
 0x3bf   : > { %v14393_v13 = vpop.eup %14392  ;;  %14416 = vrcp.f32 %v1154_v63 }
 0x3c0   : > { %13520 = vmatmul.mubr.msk.f32.gmra.mrb[36].mxu0 %vm554_vm1, %v1239_v27  ;;  %v14395_v38 = vpop.eup %14394  ;;  %v16701_v27 = vadd.f32 %v16397_v19, %v998_v2  ;;  %v1156_v35 = vadd.f32 1.0, %v14393_v13  ;;  %v1244_v2 = vmul.f32 %v14391_v34, %v16485_v62  ;;  %14418 = vrcp.f32 %v1155_v11 }
 0x3c1   : > { %13522 = vmatprep.mubr.msk.f32.mxu0 %vm554_vm1, %v1240_v15  ;;  %v1000_v15 = vmul.f32 %v18773_v43, %v16386_v41  ;;  %v14397_v58 = vpop.eup %14396  ;;  %v1157_v29 = vadd.f32 1.0, %v14395_v38  ;;  %14420 = vpow2.f32 %v10818_v23  ;;  %v18775_v43 = vld [vmem:[#allocation34_spill] sm:$0xff] }
 0x3c2   : > { %v14399_v61 = vpop.eup %14398  ;;  %v10820_v60 = vmul.f32 -1.442695, %v16701_v27  ;;  %14422 = vpow2.f32 %v10819_v3  ;;  %v1245_v34 = vmul.f32 %v14397_v58, %v16495_v8  ;;  %v10823_v8 = vmul.f32 -1.442695, %v16724_v53 }
 0x3c3   : > { %v14401_v10 = vpop.eup %14400  ;;  %14424 = vrcp.f32 %v1156_v35  ;;  %v1246_v11 = vmul.f32 %v14399_v61, %v16501_v59 }
 0x3c4   : > { %13523 = vmatmul.mubr.msk.f32.gmra.mrb[38].mxu0 %vm554_vm1, %v1241_v47  ;;  %v14403_v14 = vpop.eup %14402  ;;  %v16717_v47 = vadd.f32 %v16397_v19, %v1000_v15  ;;  %v1158_v63 = vadd.f32 1.0, %v14401_v10  ;;  %14426 = vrcp.f32 %v1157_v29 }
 0x3c5   : > { %13525 = vmatprep.mubr.msk.f32.mxu0 %vm554_vm1, %v1242_v17  ;;  %v1002_v17 = vmul.f32 %v18775_v43, %v16386_v41  ;;  %v14405_v62 = vpop.eup %14404  ;;  %v1159_v41 = vadd.f32 1.0, %v14403_v14  ;;  %14428 = vpow2.f32 %v10820_v60 }
 0x3c6   : > { %v14407_v13 = vpop.eup %14406  ;;  %v10822_v23 = vmul.f32 -1.442695, %v16717_v47  ;;  %14430 = vpow2.f32 %v10821_v39  ;;  %v1247_v59 = vmul.f32 %v14405_v62, %v16513_v32 }
 0x3c7   : > { %v14409_v38 = vpop.eup %14408  ;;  %v16731_v15 = vadd.f32 %v16397_v19, %v1002_v17  ;;  %14432 = vrcp.f32 %v1158_v63  ;;  %v1160_v26 = vadd.f32 1.0, %v14407_v13 }
 0x3c8   : > { %13526 = vmatmul.mubr.msk.f32.gmra.mrb[40].mxu0 %vm554_vm1, %v1243_v7  ;;  %v14411_v3 = vpop.eup %14410  ;;  %v1248_v61 = vmul.f32 %v14409_v38, %v16522_v44  ;;  %14434 = vrcp.f32 %v1159_v41 }
 0x3c9   : > { %13528 = vmatprep.mubr.msk.f32.mxu0 %vm554_vm1, %v1244_v2  ;;  %v14413_v58 = vpop.eup %14412  ;;  %14436 = vpow2.f32 %v10822_v23  ;;  %v10824_v19 = vmul.f32 -1.442695, %v16731_v15  ;;  %v1249_v32 = vmul.f32 %v14411_v3, %v16517_v24  ;;  %v5612_v24 = vld [vmem:[%s18376_s10] sm:$0xf] }
 0x3ca   : > { %v14415_v55 = vpop.eup %14414  ;;  %v1161_v10 = vadd.f32 1.0, %v14413_v58  ;;  %14438 = vpow2.f32 %v10823_v8  ;;  %13061 = vmatprep.subr.msk.mxu1 %vm5743_vm7, %v5612_v24 }
 0x3cb   : > { %v14417_v7 = vpop.eup %14416  ;;  %14440 = vrcp.f32 %v1160_v26  ;;  %v1162_v29 = vadd.f32 1.0, %v14415_v55  ;;  %13062 = vmatpush3.msk.msra.mxu1 %vm5743_vm7, %v5612_v24 }
 0x3cc   : > { %13529 = vmatmul.mubr.msk.f32.gmra.mrb[42].mxu0 %vm554_vm1, %v1245_v34  ;;  %v14419_v35 = vpop.eup %14418  ;;  %v1250_v44 = vmul.f32 %v14417_v7, %v16536_v22  ;;  %14442 = vpow2.f32 %v10824_v19 }
 0x3cd   : > { %13531 = vmatprep.mubr.msk.f32.mxu0 %vm554_vm1, %v1246_v11  ;;  %v14421_v2 = vpop.eup %14420  ;;  %14444 = vrcp.f32 %v1161_v10  ;;  %v1251_v62 = vmul.f32 %v14419_v35, %v16547_v16 }
 0x3ce   : > { %v14423_v14 = vpop.eup %14422  ;;  %v1163_v17 = vadd.f32 1.0, %v14421_v2  ;;  %14446 = vrcp.f32 %v1162_v29 }
 0x3cf   : > { %v14425_v60 = vpop.eup %14424  ;;  %v1164_v34 = vadd.f32 1.0, %v14423_v14 }
 0x3d0   : > { %13532 = vmatmul.mubr.msk.f32.gmra.mrb[44].mxu0 %vm554_vm1, %v1247_v59  ;;  %v14427_v43 = vpop.eup %14426  ;;  %v1252_v22 = vmul.f32 %v14425_v60, %v16619_v56  ;;  %14448 = vrcp.f32 %v1163_v17 }
 0x3d1   : > { %13534 = vmatprep.mubr.msk.f32.mxu0 %vm554_vm1, %v1248_v61  ;;  %v14429_v39 = vpop.eup %14428  ;;  %v1253_v38 = vmul.f32 %v14427_v43, %v16627_v21  ;;  %14450 = vrcp.f32 %v1164_v34 }
 0x3d2   : > { %v14431_v63 = vpop.eup %14430  ;;  %v1165_v41 = vadd.f32 1.0, %v14429_v39 }
 0x3d3   : > { %v14433_v13 = vpop.eup %14432  ;;  %v1166_v23 = vadd.f32 1.0, %v14431_v63 }
 0x3d4   : > { %13535 = vmatmul.mubr.msk.f32.gmra.mrb[46].mxu0 %vm554_vm1, %v1249_v32  ;;  %v14435_v11 = vpop.eup %14434  ;;  %v1254_v56 = vmul.f32 %v14433_v13, %v16641_v40  ;;  %14452 = vrcp.f32 %v1165_v41 }
 0x3d5   : > { %13537 = vmatprep.mubr.msk.f32.mxu0 %vm554_vm1, %v1250_v44  ;;  %v14437_v16 = vpop.eup %14436  ;;  %v1255_v26 = vmul.f32 %v14435_v11, %v16651_v31  ;;  %14454 = vrcp.f32 %v1166_v23 }
 0x3d6   : > { %v14439_v3 = vpop.eup %14438  ;;  %v1167_v58 = vadd.f32 1.0, %v14437_v16 }
 0x3d7   : > { %v14441_v8 = vpop.eup %14440  ;;  %v1168_v55 = vadd.f32 1.0, %v14439_v3 }
 0x3d8   : > { %13538 = vmatmul.mubr.msk.f32.gmra.mrb[48].mxu0 %vm554_vm1, %v1251_v62  ;;  %v14443_v59 = vpop.eup %14442  ;;  %v1256_v21 = vmul.f32 %v14441_v8, %v16660_v28  ;;  %14456 = vrcp.f32 %v1167_v58 }
 0x3d9   : > { %13540 = vmatprep.mubr.msk.f32.mxu0 %vm554_vm1, %v1252_v22  ;;  %v14445_v61 = vpop.eup %14444  ;;  %v1169_v40 = vadd.f32 1.0, %v14443_v59  ;;  %14458 = vrcp.f32 %v1168_v55 }
 0x3da   : > { %v14447_v7 = vpop.eup %14446  ;;  %v1257_v19 = vmul.f32 %v14445_v61, %v16669_v45 }
 0x3db   : > { %v14449_v35 = vpop.eup %14448  ;;  %v1258_v10 = vmul.f32 %v14447_v7, %v16676_v57  ;;  %14460 = vrcp.f32 %v1169_v40 }
 0x3dc   : > { %13541 = vmatmul.mubr.msk.f32.gmra.mrb[50].mxu0 %vm554_vm1, %v1253_v38  ;;  %v14451_v2 = vpop.eup %14450  ;;  %v1259_v31 = vmul.f32 %v14449_v35, %v16685_v46 }
 0x3dd   : > { %13543 = vmatprep.mubr.msk.f32.mxu0 %vm554_vm1, %v1254_v56  ;;  %v1260_v32 = vmul.f32 %v14451_v2, %v16692_v9 }
 0x3de   : > { %v14453_v28 = vpop.eup %14452 }
 0x3df   : > { %v14455_v29 = vpop.eup %14454  ;;  %v1261_v45 = vmul.f32 %v14453_v28, %v16701_v27  ;;  %v16782_v27 = vld [vmem:[%s18376_s10 + $0x8] sm:$0xf] }
 0x3e0   : > { %13544 = vmatmul.mubr.msk.f32.gmra.mrb[52].mxu0 %vm554_vm1, %v1255_v26  ;;  %v1262_v57 = vmul.f32 %v14455_v29, %v16708_v0  ;;  %13111 = vmatprep.subr.msk.mxu1 %vm5743_vm7, %v16782_v27  ;;  %v16790_v0 = vld [vmem:[%s18374_s8] ss:$0 sm:$0xff] }
 0x3e1   : > { %13546 = vmatprep.mubr.msk.f32.mxu0 %vm554_vm1, %v1256_v21 }
 0x3e2   : > { %v14457_v14 = vpop.eup %14456 }
 0x3e3   : > { %v14459_v44 = vpop.eup %14458  ;;  %v1263_v46 = vmul.f32 %v14457_v14, %v16717_v47 }
 0x3e4   : > { %13547 = vmatmul.mubr.msk.f32.gmra.mrb[54].mxu0 %vm554_vm1, %v1257_v19  ;;  %v1264_v9 = vmul.f32 %v14459_v44, %v16724_v53  ;;  %v16795_v53 = vld [vmem:[%s18375_s9] ss:$0 sm:$0xff] }
 0x3e5   : > { %13549 = vmatprep.mubr.msk.f32.mxu0 %vm554_vm1, %v1258_v10  ;;  %v14461_v60 = vpop.eup %14460 }
 0x3e6   : > { %v1265_v43 = vmul.f32 %v14461_v60, %v16731_v15 }
 0x3e8   : > { %13550 = vmatmul.mubr.msk.f32.gmra.mrb[56].mxu0 %vm554_vm1, %v1259_v31 }
 0x3e9   : > { %13552 = vmatprep.mubr.msk.f32.mxu0 %vm554_vm1, %v1260_v32 }
 0x3ec   : > { %13553 = vmatmul.mubr.msk.f32.gmra.mrb[58].mxu0 %vm554_vm1, %v1261_v45 }
 0x3ed   : > { %13555 = vmatprep.mubr.msk.f32.mxu0 %vm554_vm1, %v1262_v57 }
 0x3f0   : > { %13556 = vmatmul.mubr.msk.f32.gmra.mrb[60].mxu0 %vm554_vm1, %v1263_v46 }
 0x3f1   : > { %13558 = vmatprep.mubr.msk.f32.mxu0 %vm554_vm1, %v1264_v9 }
 0x3f4   : > { %13559 = vmatmul.mubr.msk.f32.gmra.mrb[62].mxu0 %vm554_vm1, %v1265_v43 }
 0x40b   : > { %v12965_v47 = vpop.f32.mrb[0].mxu0 }
 0x40c   : > { %v5254_v15 = vmul.f32 %v12965_v47, %v16790_v0  ;;  %v5055_v17 = vpop.f32.mrb[1].mxu0 }
 0x40d   : > { %v5253_v39 = vmul.f32 %v16790_v0, %v5055_v17 }
 0x40e   : > { %v16800_v62 = vadd.f32 %v16795_v53, %v5254_v15 }
 0x40f   : > { %v16803_v34 = vadd.f32 %v16795_v53, %v5253_v39  ;;  %v12968_v24 = vpop.f32.mrb[2].mxu0 }
 0x410   : > { %v11190_v63 = vmul.f32 -1.442695, %v16800_v62  ;;  %v5256_v22 = vmul.f32 %v12968_v24, %v16790_v0  ;;  %v5065_v13 = vpop.f32.mrb[3].mxu0 }
 0x411   : > { %v11189_v11 = vmul.f32 -1.442695, %v16803_v34  ;;  %v5255_v41 = vmul.f32 %v16790_v0, %v5065_v13 }
 0x412   : > { %14462 = vpow2.f32 %v11190_v63  ;;  %v16810_v16 = vadd.f32 %v16795_v53, %v5256_v22 }
 0x413   : > { %14464 = vpow2.f32 %v11189_v11  ;;  %v16813_v38 = vadd.f32 %v16795_v53, %v5255_v41  ;;  %v12971_v23 = vpop.f32.mrb[4].mxu0 }
 0x414   : > { %v11192_v3 = vmul.f32 -1.442695, %v16810_v16  ;;  %v5258_v56 = vmul.f32 %v12971_v23, %v16790_v0  ;;  %v5075_v8 = vpop.f32.mrb[5].mxu0 }
 0x415   : > { %v11191_v58 = vmul.f32 -1.442695, %v16813_v38  ;;  %v5257_v59 = vmul.f32 %v16790_v0, %v5075_v8 }
 0x416   : > { %14466 = vpow2.f32 %v11192_v3  ;;  %v16820_v26 = vadd.f32 %v16795_v53, %v5258_v56 }
 0x417   : > { %14468 = vpow2.f32 %v11191_v58  ;;  %v16823_v55 = vadd.f32 %v16795_v53, %v5257_v59  ;;  %v12974_v61 = vpop.f32.mrb[6].mxu0 }
 0x418   : > { %v11194_v21 = vmul.f32 -1.442695, %v16820_v26  ;;  %v5260_v7 = vmul.f32 %v12974_v61, %v16790_v0  ;;  %v5085_v40 = vpop.f32.mrb[7].mxu0 }
 0x419   : > { %v11193_v19 = vmul.f32 -1.442695, %v16823_v55  ;;  %v5259_v35 = vmul.f32 %v16790_v0, %v5085_v40 }
 0x41a   : > { %14470 = vpow2.f32 %v11194_v21  ;;  %v16830_v10 = vadd.f32 %v16795_v53, %v5260_v7 }
 0x41b   : > { %14472 = vpow2.f32 %v11193_v19  ;;  %v16833_v2 = vadd.f32 %v16795_v53, %v5259_v35  ;;  %v12977_v31 = vpop.f32.mrb[8].mxu0 }
 0x41c   : > { %v14463_v28 = vpop.eup %14462  ;;  %v11196_v32 = vmul.f32 -1.442695, %v16830_v10  ;;  %v5262_v29 = vmul.f32 %v12977_v31, %v16790_v0  ;;  %v5095_v45 = vpop.f32.mrb[9].mxu0 }
 0x41d   : > { %v14465_v14 = vpop.eup %14464  ;;  %v5421_v57 = vadd.f32 1.0, %v14463_v28  ;;  %v11195_v44 = vmul.f32 -1.442695, %v16833_v2  ;;  %v5261_v46 = vmul.f32 %v16790_v0, %v5095_v45 }
 0x41e   : > { %v5420_v60 = vadd.f32 1.0, %v14465_v14  ;;  %14474 = vpow2.f32 %v11196_v32  ;;  %v16840_v9 = vadd.f32 %v16795_v53, %v5262_v29 }
 0x41f   : > { %14476 = vrcp.f32 %v5421_v57  ;;  %v16843_v43 = vadd.f32 %v16795_v53, %v5261_v46  ;;  %v12980_v47 = vpop.f32.mrb[10].mxu0 }
 0x420   : > { %v14467_v15 = vpop.eup %14466  ;;  %14478 = vrcp.f32 %v5420_v60  ;;  %v11198_v17 = vmul.f32 -1.442695, %v16840_v9  ;;  %v5264_v39 = vmul.f32 %v12980_v47, %v16790_v0  ;;  %v5105_v24 = vpop.f32.mrb[11].mxu0 }
 0x421   : > { %v14469_v63 = vpop.eup %14468  ;;  %v5423_v22 = vadd.f32 1.0, %v14467_v15  ;;  %14480 = vpow2.f32 %v11195_v44  ;;  %v11197_v13 = vmul.f32 -1.442695, %v16843_v43  ;;  %v5263_v11 = vmul.f32 %v16790_v0, %v5105_v24 }
 0x422   : > { %v5422_v41 = vadd.f32 1.0, %v14469_v63  ;;  %14482 = vpow2.f32 %v11198_v17  ;;  %v16850_v23 = vadd.f32 %v16795_v53, %v5264_v39 }
 0x423   : > { %14484 = vrcp.f32 %v5423_v22  ;;  %v16853_v3 = vadd.f32 %v16795_v53, %v5263_v11  ;;  %v12983_v56 = vpop.f32.mrb[12].mxu0 }
 0x424   : > { %v14471_v8 = vpop.eup %14470  ;;  %14486 = vrcp.f32 %v5422_v41  ;;  %v11200_v58 = vmul.f32 -1.442695, %v16850_v23  ;;  %v5266_v59 = vmul.f32 %v12983_v56, %v16790_v0  ;;  %v5115_v61 = vpop.f32.mrb[13].mxu0 }
 0x425   : > { %v14473_v21 = vpop.eup %14472  ;;  %v5425_v7 = vadd.f32 1.0, %v14471_v8  ;;  %14488 = vpow2.f32 %v11197_v13  ;;  %v11199_v40 = vmul.f32 -1.442695, %v16853_v3  ;;  %v5265_v19 = vmul.f32 %v16790_v0, %v5115_v61 }
 0x426   : > { %v5424_v35 = vadd.f32 1.0, %v14473_v21  ;;  %14490 = vpow2.f32 %v11200_v58  ;;  %v16860_v31 = vadd.f32 %v16795_v53, %v5266_v59 }
 0x427   : > { %14492 = vrcp.f32 %v5425_v7  ;;  %v16863_v28 = vadd.f32 %v16795_v53, %v5265_v19  ;;  %v12986_v32 = vpop.f32.mrb[14].mxu0 }
 0x428   : > { %v14475_v29 = vpop.eup %14474  ;;  %14494 = vrcp.f32 %v5424_v35  ;;  %v11202_v45 = vmul.f32 -1.442695, %v16860_v31  ;;  %v5268_v14 = vmul.f32 %v12986_v32, %v16790_v0  ;;  %v5125_v57 = vpop.f32.mrb[15].mxu0 }
 0x429   : > { %v14477_v44 = vpop.eup %14476  ;;  %v5427_v46 = vadd.f32 1.0, %v14475_v29  ;;  %14496 = vpow2.f32 %v11199_v40  ;;  %v11201_v60 = vmul.f32 -1.442695, %v16863_v28  ;;  %v5267_v47 = vmul.f32 %v16790_v0, %v5125_v57 }
 0x42a   : > { %v14479_v15 = vpop.eup %14478  ;;  %v5517_v17 = vmul.f32 %v14477_v44, %v16800_v62  ;;  %14498 = vpow2.f32 %v11202_v45  ;;  %v16871_v39 = vadd.f32 %v16795_v53, %v5268_v14 }
 0x42b   : > { %v14481_v24 = vpop.eup %14480  ;;  %v5516_v63 = vmul.f32 %v14479_v15, %v16803_v34  ;;  %14500 = vrcp.f32 %v5427_v46  ;;  %v16875_v22 = vadd.f32 %v16795_v53, %v5267_v47  ;;  %v12989_v13 = vpop.f32.mrb[16].mxu0  ;;  %v18777_v15 = vld [vmem:[#allocation98_spill] sm:$0xff] }
 0x42c   : > { %v14483_v11 = vpop.eup %14482  ;;  %5549 = vst.msk [vmem:[#allocation3 + $0x21] sm:$0xff] %vm597_vm4, %v5517_v17  ;;  %v5426_v41 = vadd.f32 1.0, %v14481_v24  ;;  %14502 = vpow2.f32 %v11201_v60  ;;  %v11204_v56 = vmul.f32 -1.442695, %v16871_v39  ;;  %v5270_v62 = vmul.f32 %v12989_v13, %v16790_v0  ;;  %v5135_v8 = vpop.f32.mrb[17].mxu0 }
 0x42d   : > { %v14485_v58 = vpop.eup %14484  ;;  %5548 = vst.msk [vmem:[#allocation3 + $0x19] sm:$0xff] %vm597_vm4, %v5516_v63  ;;  %v5429_v59 = vadd.f32 1.0, %v14483_v11  ;;  %v11203_v34 = vmul.f32 -1.442695, %v16875_v22  ;;  %v5269_v61 = vmul.f32 %v16790_v0, %v5135_v8 }
 0x42e   : > { %v14487_v21 = vpop.eup %14486  ;;  %v5519_v7 = vmul.f32 %v14485_v58, %v16810_v16  ;;  %14504 = vrcp.f32 %v5426_v41  ;;  %v16885_v40 = vadd.f32 %v16795_v53, %v5270_v62  ;;  %v18776_v16 = vld [vmem:[#allocation97_spill] sm:$0xff] }
 0x42f   : > { %v14489_v19 = vpop.eup %14488  ;;  %v5518_v35 = vmul.f32 %v14487_v21, %v16813_v38  ;;  %14506 = vrcp.f32 %v5429_v59  ;;  %v16889_v32 = vadd.f32 %v16795_v53, %v5269_v61  ;;  %v12992_v29 = vpop.f32.mrb[18].mxu0 }
 0x430   : > { %v14491_v45 = vpop.eup %14490  ;;  %5551 = vst.msk [vmem:[#allocation3 + $0x39] sm:$0xff] %vm597_vm4, %v5519_v7  ;;  %v5428_v14 = vadd.f32 1.0, %v14489_v19  ;;  %14508 = vpow2.f32 %v11204_v56  ;;  %v11206_v57 = vmul.f32 -1.442695, %v16885_v40  ;;  %v13621_v44 = vadd.f32 %v12992_v29, %v18776_v16  ;;  %v5145_v46 = vpop.f32.mrb[19].mxu0 }
 0x431   : > { %v14493_v60 = vpop.eup %14492  ;;  %5550 = vst.msk [vmem:[#allocation3 + $0x31] sm:$0xff] %vm597_vm4, %v5518_v35  ;;  %v5431_v47 = vadd.f32 1.0, %v14491_v45  ;;  %14510 = vpow2.f32 %v11203_v34  ;;  %v11205_v38 = vmul.f32 -1.442695, %v16889_v32  ;;  %v13622_v17 = vadd.f32 %v5145_v46, %v18777_v15  ;;  %v18778_v34 = vld [vmem:[#allocation99_spill] sm:$0xff]  ;;  %v18779_v35 = vld [vmem:[#allocation100_spill] sm:$0xff] }
 0x432   : > { %v14495_v24 = vpop.eup %14494  ;;  %v5521_v63 = vmul.f32 %v14493_v60, %v16820_v26  ;;  %14512 = vrcp.f32 %v5428_v14  ;;  %v5272_v13 = vmul.f32 %v13621_v44, %v16790_v0 }
 0x433   : > { %v14497_v11 = vpop.eup %14496  ;;  %v5520_v41 = vmul.f32 %v14495_v24, %v16823_v55  ;;  %14514 = vrcp.f32 %v5431_v47  ;;  %v5271_v56 = vmul.f32 %v13622_v17, %v16790_v0  ;;  %v12995_v62 = vpop.f32.mrb[20].mxu0  ;;  %v16915_v45 = vld [vmem:[#allocation3 + $0x21] sm:$0xff]  ;;  %v18780_v17 = vld [vmem:[#allocation101_spill] sm:$0xff] }
 0x434   : > { %v14499_v8 = vpop.eup %14498  ;;  %5553 = vst.msk [vmem:[#allocation3 + $0x51] sm:$0xff] %vm597_vm4, %v5521_v63  ;;  %v5430_v58 = vadd.f32 1.0, %v14497_v11  ;;  %14516 = vpow2.f32 %v11206_v57  ;;  %v16903_v59 = vadd.f32 %v16795_v53, %v5272_v13  ;;  %v13623_v26 = vadd.f32 %v12995_v62, %v18778_v34  ;;  %v5155_v61 = vpop.f32.mrb[21].mxu0  ;;  %v16906_v21 = vld [vmem:[#allocation3 + $0x19] sm:$0xff] }
 0x435   : > { %v14501_v7 = vpop.eup %14500  ;;  %5552 = vst.msk [vmem:[#allocation3 + $0x49] sm:$0xff] %vm597_vm4, %v5520_v41  ;;  %v5433_v55 = vadd.f32 1.0, %v14499_v8  ;;  %14518 = vpow2.f32 %v11205_v38  ;;  %v16910_v19 = vadd.f32 %v16795_v53, %v5271_v56  ;;  %v13624_v29 = vadd.f32 %v5155_v61, %v18779_v35  ;;  %13016 = vmatprep.mubr.msk.f32.mxu1 %vm597_vm4, %v16906_v21  ;;  %v18781_v62 = vld [vmem:[#allocation102_spill] sm:$0xff] }
 0x436   : > { %v14503_v14 = vpop.eup %14502  ;;  %v5523_v57 = vmul.f32 %v14501_v7, %v16830_v10  ;;  %14520 = vrcp.f32 %v5430_v58  ;;  %v11208_v16 = vmul.f32 -1.442695, %v16903_v59  ;;  %v5274_v44 = vmul.f32 %v13623_v26, %v16790_v0  ;;  %13017 = vmatmul.mubr.msk.f32.gmra.mrb[80].mxu1 %vm597_vm4, %v16915_v45 }
 0x437   : > { %14522 = vrcp.f32 %v5433_v55  ;;  %v5432_v46 = vadd.f32 1.0, %v14503_v14  ;;  %v11207_v60 = vmul.f32 -1.442695, %v16910_v19  ;;  %v5273_v47 = vmul.f32 %v13624_v29, %v16790_v0  ;;  %v12998_v38 = vpop.f32.mrb[22].mxu0  ;;  %v16938_v58 = vld [vmem:[#allocation3 + $0x39] sm:$0xff] }
 0x438   : > { %v14505_v15 = vpop.eup %14504  ;;  %5555 = vst.msk [vmem:[#allocation3 + $0x69] sm:$0xff] %vm597_vm4, %v5523_v57  ;;  %14524 = vpow2.f32 %v11208_v16  ;;  %v16926_v10 = vadd.f32 %v16795_v53, %v5274_v44  ;;  %v13625_v24 = vadd.f32 %v12998_v38, %v18780_v17  ;;  %v5165_v63 = vpop.f32.mrb[23].mxu0  ;;  %v16929_v13 = vld [vmem:[#allocation3 + $0x31] sm:$0xff]  ;;  %v18782_v44 = vld [vmem:[#allocation103_spill] sm:$0xff] }
 0x439   : > { %v14507_v11 = vpop.eup %14506  ;;  %v5522_v41 = vmul.f32 %v14505_v15, %v16833_v2  ;;  %14526 = vrcp.f32 %v5432_v46  ;;  %v16933_v56 = vadd.f32 %v16795_v53, %v5273_v47  ;;  %v13626_v8 = vadd.f32 %v5165_v63, %v18781_v62  ;;  %13019 = vmatprep.mubr.msk.f32.mxu1 %vm597_vm4, %v16929_v13 }
 0x43a   : > { %v14509_v34 = vpop.eup %14508  ;;  %v5525_v26 = vmul.f32 %v14507_v11, %v16840_v9  ;;  %14528 = vpow2.f32 %v11207_v60  ;;  %v11210_v61 = vmul.f32 -1.442695, %v16926_v10  ;;  %v5276_v7 = vmul.f32 %v13625_v24, %v16790_v0  ;;  %13020 = vmatmul.mubr.msk.f32.gmra.mrb[82].mxu1 %vm597_vm4, %v16938_v58  ;;  %v18783_v24 = vld [vmem:[#allocation104_spill] sm:$0xff] }
 0x43b   : > { %v14511_v2 = vpop.eup %14510  ;;  %5554 = vst.msk [vmem:[#allocation3 + $0x61] sm:$0xff] %vm597_vm4, %v5522_v41  ;;  %v5435_v55 = vadd.f32 1.0, %v14509_v34  ;;  %v11209_v35 = vmul.f32 -1.442695, %v16933_v56  ;;  %v5275_v29 = vmul.f32 %v13626_v8, %v16790_v0  ;;  %v13001_v14 = vpop.f32.mrb[24].mxu0  ;;  %v16962_v11 = vld [vmem:[#allocation3 + $0x51] sm:$0xff] }
 0x43c   : > { %v14513_v57 = vpop.eup %14512  ;;  %5557 = vst.msk [vmem:[#allocation3 + $0x81] sm:$0xff] %vm597_vm4, %v5525_v26  ;;  %v5434_v9 = vadd.f32 1.0, %v14511_v2  ;;  %14530 = vpow2.f32 %v11210_v61  ;;  %v16950_v16 = vadd.f32 %v16795_v53, %v5276_v7  ;;  %v13627_v46 = vadd.f32 %v13001_v14, %v18782_v44  ;;  %v5175_v60 = vpop.f32.mrb[25].mxu0  ;;  %v16953_v47 = vld [vmem:[#allocation3 + $0x49] sm:$0xff]  ;;  %v18784_v14 = vld [vmem:[#allocation105_spill] sm:$0xff] }
 0x43d   : > { %v14515_v38 = vpop.eup %14514  ;;  %v5524_v15 = vmul.f32 %v14513_v57, %v16843_v43  ;;  %14532 = vrcp.f32 %v5435_v55  ;;  %v16957_v17 = vadd.f32 %v16795_v53, %v5275_v29  ;;  %v13628_v63 = vadd.f32 %v5175_v60, %v18783_v24  ;;  %13022 = vmatprep.mubr.msk.f32.mxu1 %vm597_vm4, %v16953_v47  ;;  %v18785_v60 = vld [vmem:[#allocation106_spill] sm:$0xff] }
 0x43e   : > { %v14517_v41 = vpop.eup %14516  ;;  %v5527_v62 = vmul.f32 %v14515_v38, %v16850_v23  ;;  %14534 = vrcp.f32 %v5434_v9  ;;  %v11212_v8 = vmul.f32 -1.442695, %v16950_v16  ;;  %v5278_v34 = vmul.f32 %v13627_v46, %v16790_v0  ;;  %13023 = vmatmul.mubr.msk.f32.gmra.mrb[84].mxu1 %vm597_vm4, %v16962_v11 }
 0x43f   : > { %v14519_v43 = vpop.eup %14518  ;;  %5556 = vst.msk [vmem:[#allocation3 + $0x79] sm:$0xff] %vm597_vm4, %v5524_v15  ;;  %v5437_v26 = vadd.f32 1.0, %v14517_v41  ;;  %14536 = vpow2.f32 %v11209_v35  ;;  %v11211_v61 = vmul.f32 -1.442695, %v16957_v17  ;;  %v5277_v7 = vmul.f32 %v13628_v63, %v16790_v0  ;;  %v13004_v2 = vpop.f32.mrb[26].mxu0 }
 0x440   : > { %v14521_v55 = vpop.eup %14520  ;;  %5559 = vst.msk [vmem:[#allocation3 + $0x99] sm:$0xff] %vm597_vm4, %v5527_v62  ;;  %v5436_v23 = vadd.f32 1.0, %v14519_v43  ;;  %14538 = vpow2.f32 %v11212_v8  ;;  %v16974_v29 = vadd.f32 %v16795_v53, %v5278_v34  ;;  %v13629_v57 = vadd.f32 %v13004_v2, %v18784_v14  ;;  %v5185_v9 = vpop.f32.mrb[27].mxu0 }
 0x441   : > { %v14523_v44 = vpop.eup %14522  ;;  %v5526_v46 = vmul.f32 %v14521_v55, %v16853_v3  ;;  %14540 = vrcp.f32 %v5437_v26  ;;  %v16979_v35 = vadd.f32 %v16795_v53, %v5277_v7  ;;  %v13630_v38 = vadd.f32 %v5185_v9, %v18785_v60 }
 0x442   : > { %v14525_v15 = vpop.eup %14524  ;;  %v5529_v24 = vmul.f32 %v14523_v44, %v16860_v31  ;;  %14542 = vrcp.f32 %v5436_v23  ;;  %v11214_v63 = vmul.f32 -1.442695, %v16974_v29  ;;  %v5280_v41 = vmul.f32 %v13629_v57, %v16790_v0  ;;  %v16985_v62 = vld [vmem:[#allocation3 + $0x61] sm:$0xff]  ;;  %v16992_v31 = vld [vmem:[#allocation3 + $0x69] sm:$0xff] }
 0x443   : > { %v14527_v8 = vpop.eup %14526  ;;  %5558 = vst.msk [vmem:[#allocation3 + $0x91] sm:$0xff] %vm597_vm4, %v5526_v46  ;;  %v5439_v3 = vadd.f32 1.0, %v14525_v15  ;;  %14544 = vpow2.f32 %v11211_v61  ;;  %v11213_v34 = vmul.f32 -1.442695, %v16979_v35  ;;  %v5279_v43 = vmul.f32 %v13630_v38, %v16790_v0  ;;  %13025 = vmatprep.mubr.msk.f32.mxu1 %vm597_vm4, %v16985_v62  ;;  %v13007_v26 = vpop.f32.mrb[28].mxu0  ;;  %v18786_v61 = vld [vmem:[#allocation107_spill] sm:$0xff] }
 0x444   : > { %v14529_v7 = vpop.eup %14528  ;;  %5561 = vst.msk [vmem:[#allocation3 + $0xb1] sm:$0xff] %vm597_vm4, %v5529_v24  ;;  %v5528_v2 = vmul.f32 %v14527_v8, %v16863_v28  ;;  %14546 = vpow2.f32 %v11214_v63  ;;  %v16997_v55 = vadd.f32 %v16795_v53, %v5280_v41  ;;  %13026 = vmatmul.mubr.msk.f32.gmra.mrb[86].mxu1 %vm597_vm4, %v16992_v31  ;;  %v13631_v23 = vadd.f32 %v13007_v26, %v18786_v61  ;;  %v5195_v14 = vpop.f32.mrb[29].mxu0  ;;  %v18787_v44 = vld [vmem:[#allocation108_spill] sm:$0xff] }
 0x445   : > { %14548 = vrcp.f32 %v5439_v3  ;;  %v5438_v57 = vadd.f32 1.0, %v14529_v7  ;;  %v17003_v9 = vadd.f32 %v16795_v53, %v5279_v43  ;;  %v13632_v46 = vadd.f32 %v5195_v14, %v18787_v44  ;;  %v17015_v3 = vld [vmem:[#allocation3 + $0x81] sm:$0xff] }
 0x446   : > { %v14531_v60 = vpop.eup %14530  ;;  %5560 = vst.msk [vmem:[#allocation3 + $0xa9] sm:$0xff] %vm597_vm4, %v5528_v2  ;;  %14550 = vpow2.f32 %v11213_v34  ;;  %v11216_v28 = vmul.f32 -1.442695, %v16997_v55  ;;  %v5282_v38 = vmul.f32 %v13631_v23, %v16790_v0  ;;  %v17009_v15 = vld [vmem:[#allocation3 + $0x79] sm:$0xff] }
 0x447   : > { %v14533_v24 = vpop.eup %14532  ;;  %14552 = vrcp.f32 %v5438_v57  ;;  %v5441_v63 = vadd.f32 1.0, %v14531_v60  ;;  %v11215_v41 = vmul.f32 -1.442695, %v17003_v9  ;;  %v5281_v8 = vmul.f32 %v13632_v46, %v16790_v0  ;;  %13028 = vmatprep.mubr.msk.f32.mxu1 %vm597_vm4, %v17009_v15  ;;  %v13010_v43 = vpop.f32.mrb[30].mxu0  ;;  %v18788_v2 = vld [vmem:[#allocation109_spill] sm:$0xff]  ;;  %v18789_v46 = vld [vmem:[#allocation110_spill] sm:$0xff] }
 0x448   : > { %v14535_v34 = vpop.eup %14534  ;;  %v5531_v26 = vmul.f32 %v14533_v24, %v16871_v39  ;;  %14554 = vpow2.f32 %v11216_v28  ;;  %v17019_v7 = vadd.f32 %v16795_v53, %v5282_v38  ;;  %13029 = vmatmul.mubr.msk.f32.gmra.mrb[88].mxu1 %vm597_vm4, %v17015_v3  ;;  %v13633_v61 = vadd.f32 %v13010_v43, %v18788_v2  ;;  %v5205_v23 = vpop.f32.mrb[31].mxu0 }
 0x449   : > { %v14537_v14 = vpop.eup %14536  ;;  %v5530_v57 = vmul.f32 %v14535_v34, %v16875_v22  ;;  %14556 = vrcp.f32 %v5441_v63  ;;  %v17026_v44 = vadd.f32 %v16795_v53, %v5281_v8  ;;  %v13634_v60 = vadd.f32 %v5205_v23, %v18789_v46  ;;  %v17039_v34 = vld [vmem:[#allocation3 + $0x99] sm:$0xff] }
 0x44a   : > { %v14539_v39 = vpop.eup %14538  ;;  %5563 = vst.msk [vmem:[#allocation3 + $0xc9] sm:$0xff] %vm597_vm4, %v5531_v26  ;;  %v5440_v28 = vadd.f32 1.0, %v14537_v14  ;;  %14558 = vpow2.f32 %v11215_v41  ;;  %v11218_v38 = vmul.f32 -1.442695, %v17019_v7  ;;  %v5284_v24 = vmul.f32 %v13633_v61, %v16790_v0  ;;  %v17032_v43 = vld [vmem:[#allocation3 + $0x91] sm:$0xff] }
 0x44b   : > { %v14541_v2 = vpop.eup %14540  ;;  %5562 = vst.msk [vmem:[#allocation3 + $0xc1] sm:$0xff] %vm597_vm4, %v5530_v57  ;;  %v5443_v22 = vadd.f32 1.0, %v14539_v39  ;;  %v11217_v63 = vmul.f32 -1.442695, %v17026_v44  ;;  %v5283_v8 = vmul.f32 %v13634_v60, %v16790_v0  ;;  %13031 = vmatprep.mubr.msk.f32.mxu1 %vm597_vm4, %v17032_v43 }
 0x44c   : > { %v14543_v41 = vpop.eup %14542  ;;  %v5533_v26 = vmul.f32 %v14541_v2, %v16885_v40  ;;  %14560 = vrcp.f32 %v5440_v28  ;;  %v17043_v61 = vadd.f32 %v16795_v53, %v5284_v24  ;;  %13032 = vmatmul.mubr.msk.f32.gmra.mrb[90].mxu1 %vm597_vm4, %v17039_v34  ;;  %v17058_v28 = vld [vmem:[#allocation3 + $0xb1] sm:$0xff] }
 0x44d   : > { %v14545_v23 = vpop.eup %14544  ;;  %v5532_v14 = vmul.f32 %v14543_v41, %v16889_v32  ;;  %14562 = vrcp.f32 %v5443_v22  ;;  %v17049_v0 = vadd.f32 %v16795_v53, %v5283_v8  ;;  %v17051_v57 = vld [vmem:[#allocation3 + $0xa9] sm:$0xff] }
 0x44e   : > { %v14547_v46 = vpop.eup %14546  ;;  %5565 = vst.msk [vmem:[#allocation3 + $0xe1] sm:$0xff] %vm597_vm4, %v5533_v26  ;;  %v5442_v40 = vadd.f32 1.0, %v14545_v23  ;;  %14564 = vpow2.f32 %v11218_v38  ;;  %v11220_v60 = vmul.f32 -1.442695, %v17043_v61  ;;  %13034 = vmatprep.mubr.msk.f32.mxu1 %vm597_vm4, %v17051_v57 }
 0x44f   : > { %v14549_v39 = vpop.eup %14548  ;;  %5564 = vst.msk [vmem:[#allocation3 + $0xd9] sm:$0xff] %vm597_vm4, %v5532_v14  ;;  %v5445_v32 = vadd.f32 1.0, %v14547_v46  ;;  %14566 = vpow2.f32 %v11217_v63  ;;  %v11219_v2 = vmul.f32 -1.442695, %v17049_v0 }
 0x450   : > { %v14551_v53 = vpop.eup %14550  ;;  %v5535_v24 = vmul.f32 %v14549_v39, %v16903_v59  ;;  %14568 = vrcp.f32 %v5442_v40  ;;  %13035 = vmatmul.mubr.msk.f32.gmra.mrb[92].mxu1 %vm597_vm4, %v17058_v28 }
 0x451   : > { %v14553_v38 = vpop.eup %14552  ;;  %14570 = vrcp.f32 %v5445_v32  ;;  %v5444_v22 = vadd.f32 1.0, %v14551_v53  ;;  %v17070_v23 = vld [vmem:[#allocation3 + $0xc9] sm:$0xff] }
 0x452   : > { %v14555_v8 = vpop.eup %14554  ;;  %5567 = vst.msk [vmem:[#allocation3 + $0xf9] sm:$0xff] %vm597_vm4, %v5535_v24  ;;  %v5534_v41 = vmul.f32 %v14553_v38, %v16910_v19  ;;  %14572 = vpow2.f32 %v11220_v60  ;;  %v17066_v63 = vld [vmem:[#allocation3 + $0xc1] sm:$0xff] }
 0x453   : > { %v14557_v26 = vpop.eup %14556  ;;  %14574 = vrcp.f32 %v5444_v22  ;;  %v5447_v59 = vadd.f32 1.0, %v14555_v8  ;;  %13037 = vmatprep.mubr.msk.f32.mxu1 %vm597_vm4, %v17066_v63  ;;  %v17222_v5 = vld [vmem:[#allocation3 + $0xc0] sm:$0xff]  ;;  %v17226_v12 = vld [vmem:[#allocation3 + $0xc8] sm:$0xff] }
 0x454   : > { %v14559_v14 = vpop.eup %14558  ;;  %5566 = vst.msk [vmem:[#allocation3 + $0xf1] sm:$0xff] %vm597_vm4, %v5534_v41  ;;  %v5537_v46 = vmul.f32 %v14557_v26, %v16926_v10  ;;  %14576 = vpow2.f32 %v11219_v2  ;;  %13038 = vmatmul.mubr.msk.f32.gmra.mrb[94].mxu1 %vm597_vm4, %v17070_v23 }
 0x455   : > { %14578 = vrcp.f32 %v5447_v59  ;;  %v5446_v19 = vadd.f32 1.0, %v14559_v14  ;;  %v17082_v53 = vld [vmem:[#allocation3 + $0xe1] sm:$0xff] }
 0x456   : > { %v14561_v40 = vpop.eup %14560  ;;  %5569 = vst.msk [vmem:[#allocation3 + $0x111] sm:$0xff] %vm597_vm4, %v5537_v46  ;;  %v17077_v60 = vld [vmem:[#allocation3 + $0xd9] sm:$0xff] }
 0x457   : > { %v14563_v39 = vpop.eup %14562  ;;  %v5536_v32 = vmul.f32 %v14561_v40, %v16933_v56  ;;  %14580 = vrcp.f32 %v5446_v19  ;;  %13040 = vmatprep.mubr.msk.f32.mxu1 %vm597_vm4, %v17077_v60  ;;  %v17230_v33 = vld [vmem:[#allocation3 + $0xd8] sm:$0xff]  ;;  %v17234_v37 = vld [vmem:[#allocation3 + $0xe0] sm:$0xff] }
 0x458   : > { %v14565_v10 = vpop.eup %14564  ;;  %v5539_v24 = vmul.f32 %v14563_v39, %v16950_v16  ;;  %13041 = vmatmul.mubr.msk.f32.gmra.mrb[96].mxu1 %vm597_vm4, %v17082_v53 }
 0x459   : > { %v14567_v2 = vpop.eup %14566  ;;  %5568 = vst.msk [vmem:[#allocation3 + $0x109] sm:$0xff] %vm597_vm4, %v5536_v32  ;;  %v5449_v38 = vadd.f32 1.0, %v14565_v10  ;;  %v17095_v14 = vld [vmem:[#allocation3 + $0xf9] sm:$0xff] }
 0x45a   : > { %v14569_v22 = vpop.eup %14568  ;;  %5571 = vst.msk [vmem:[#allocation3 + $0x129] sm:$0xff] %vm597_vm4, %v5539_v24  ;;  %v5448_v56 = vadd.f32 1.0, %v14567_v2 }
 0x45b   : > { %v14571_v8 = vpop.eup %14570  ;;  %v5538_v41 = vmul.f32 %v14569_v22, %v16957_v17  ;;  %14582 = vrcp.f32 %v5449_v38  ;;  %v17090_v26 = vld [vmem:[#allocation3 + $0xf1] sm:$0xff] }
 0x45c   : > { %v14573_v59 = vpop.eup %14572  ;;  %v5541_v16 = vmul.f32 %v14571_v8, %v16974_v29  ;;  %14584 = vrcp.f32 %v5448_v56  ;;  %13043 = vmatprep.mubr.msk.f32.mxu1 %vm597_vm4, %v17090_v26  ;;  %v17238_v6 = vld [vmem:[#allocation3 + $0xf0] sm:$0xff]  ;;  %v17242_v1 = vld [vmem:[#allocation3 + $0xf8] sm:$0xff] }
 0x45d   : > { %v14575_v46 = vpop.eup %14574  ;;  %5570 = vst.msk [vmem:[#allocation3 + $0x121] sm:$0xff] %vm597_vm4, %v5538_v41  ;;  %v5451_v19 = vadd.f32 1.0, %v14573_v59  ;;  %13044 = vmatmul.mubr.msk.f32.gmra.mrb[98].mxu1 %vm597_vm4, %v17095_v14  ;;  %v17108_v2 = vld [vmem:[#allocation3 + $0x111] sm:$0xff] }
 0x45e   : > { %v14577_v17 = vpop.eup %14576  ;;  %5573 = vst.msk [vmem:[#allocation3 + $0x141] sm:$0xff] %vm597_vm4, %v5541_v16  ;;  %v5540_v40 = vmul.f32 %v14575_v46, %v16979_v35 }
 0x45f   : > { %v14579_v39 = vpop.eup %14578  ;;  %14586 = vrcp.f32 %v5451_v19  ;;  %v5450_v29 = vadd.f32 1.0, %v14577_v17 }
 0x460   : > { %5572 = vst.msk [vmem:[#allocation3 + $0x139] sm:$0xff] %vm597_vm4, %v5540_v40  ;;  %v5543_v32 = vmul.f32 %v14579_v39, %v16997_v55  ;;  %v17104_v10 = vld [vmem:[#allocation3 + $0x109] sm:$0xff]  ;;  %v5580_v40 = vld [vmem:[#allocation3] sm:$0xff] }
 0x461   : > { %v14581_v24 = vpop.eup %14580  ;;  %14588 = vrcp.f32 %v5450_v29  ;;  %13046 = vmatprep.mubr.msk.f32.mxu1 %vm597_vm4, %v17104_v10  ;;  %v17119_v22 = vld [vmem:[#allocation3 + $0x129] sm:$0xff]  ;;  %v17159_v29 = vld [vmem:[%s18376_s10 + $0xc] sm:$0xf] }
 0x462   : > { %5575 = vst.msk [vmem:[#allocation3 + $0x159] sm:$0xff] %vm597_vm4, %v5543_v32  ;;  %v5542_v35 = vmul.f32 %v14581_v24, %v17003_v9  ;;  %13047 = vmatmul.mubr.msk.f32.gmra.mrb[100].mxu1 %vm597_vm4, %v17108_v2  ;;  %v17162_v32 = vld [vmem:[#allocation3 + $0x18] sm:$0xff]  ;;  %v17170_v24 = vld [vmem:[#allocation3 + $0x20] sm:$0xff]  ;;  %v17246_v36 = vld [vmem:[#allocation3 + $0x108] sm:$0xff] }
 0x463   : > { %v17250_v54 = vld [vmem:[#allocation3 + $0x110] sm:$0xff] }
 0x464   : > { %5574 = vst.msk [vmem:[#allocation3 + $0x151] sm:$0xff] %vm597_vm4, %v5542_v35  ;;  %v17115_v38 = vld [vmem:[#allocation3 + $0x121] sm:$0xff]  ;;  %v17174_v35 = vld [vmem:[#allocation3 + $0x30] sm:$0xff] }
 0x465   : > { %v14583_v55 = vpop.eup %14582  ;;  %13049 = vmatprep.mubr.msk.f32.mxu1 %vm597_vm4, %v17115_v38  ;;  %v17131_v16 = vld [vmem:[#allocation3 + $0x141] sm:$0xff] }
 0x466   : > { %v14585_v56 = vpop.eup %14584  ;;  %v5545_v8 = vmul.f32 %v14583_v55, %v17019_v7  ;;  %13050 = vmatmul.mubr.msk.f32.gmra.mrb[102].mxu1 %vm597_vm4, %v17119_v22  ;;  %v17178_v55 = vld [vmem:[#allocation3 + $0x38] sm:$0xff]  ;;  %v17254_v4 = vld [vmem:[#allocation3 + $0x120] sm:$0xff]  ;;  %v17258_v50 = vld [vmem:[#allocation3 + $0x128] sm:$0xff] }
 0x467   : > { %v5544_v9 = vmul.f32 %v14585_v56, %v17026_v44  ;;  %v17125_v41 = vld [vmem:[#allocation3 + $0x139] sm:$0xff]  ;;  %v17186_v56 = vld [vmem:[#allocation3 + $0x50] sm:$0xff] }
 0x468   : > { %5577 = vst.msk [vmem:[#allocation3 + $0x171] sm:$0xff] %vm597_vm4, %v5545_v8  ;;  %13052 = vmatprep.mubr.msk.f32.mxu1 %vm597_vm4, %v17125_v41  ;;  %v17190_v8 = vld [vmem:[#allocation3 + $0x60] sm:$0xff]  ;;  %v17262_v30 = vld [vmem:[#allocation3 + $0x138] sm:$0xff] }
 0x469   : > { %v14587_v59 = vpop.eup %14586  ;;  %5576 = vst.msk [vmem:[#allocation3 + $0x169] sm:$0xff] %vm597_vm4, %v5544_v9  ;;  %v17142_v17 = vld [vmem:[#allocation3 + $0x159] sm:$0xff]  ;;  %v17194_v9 = vld [vmem:[#allocation3 + $0x68] sm:$0xff] }
 0x46a   : > { %v5547_v46 = vmul.f32 %v14587_v59, %v17043_v61  ;;  %13053 = vmatmul.mubr.msk.f32.gmra.mrb[104].mxu1 %vm597_vm4, %v17131_v16  ;;  %v17198_v59 = vld [vmem:[#allocation3 + $0x78] sm:$0xff]  ;;  %v17266_v51 = vld [vmem:[#allocation3 + $0x140] sm:$0xff] }
 0x46b   : > { %v14589_v7 = vpop.eup %14588  ;;  %v17136_v19 = vld [vmem:[#allocation3 + $0x151] sm:$0xff] }
 0x46c   : > { %5579 = vst.msk [vmem:[#allocation3 + $0x189] sm:$0xff] %vm597_vm4, %v5547_v46  ;;  %v5546_v44 = vmul.f32 %v14589_v7, %v17049_v0  ;;  %13055 = vmatprep.mubr.msk.f32.mxu1 %vm597_vm4, %v17136_v19  ;;  %v5581_v0 = vld [vmem:[#allocation3 + $0x8] sm:$0xff]  ;;  %v17202_v46 = vld [vmem:[#allocation3 + $0x80] sm:$0xff]  ;;  %v17206_v7 = vld [vmem:[#allocation3 + $0x90] sm:$0xff] }
 0x46d   : > { %v17270_v25 = vld [vmem:[#allocation3 + $0x150] sm:$0xff]  ;;  %v17274_v42 = vld [vmem:[#allocation3 + $0x158] sm:$0xff] }
 0x46e   : > { %5578 = vst.msk [vmem:[#allocation3 + $0x181] sm:$0xff] %vm597_vm4, %v5546_v44  ;;  %13056 = vmatmul.mubr.msk.f32.gmra.mrb[106].mxu1 %vm597_vm4, %v17142_v17  ;;  %v17210_v44 = vld [vmem:[#allocation3 + $0x98] sm:$0xff] }
 0x46f   : > { %v17151_v39 = vld [vmem:[#allocation3 + $0x171] sm:$0xff] }
 0x470   : > { %v17147_v61 = vld [vmem:[#allocation3 + $0x169] sm:$0xff]  ;;  %18791 = vst [vmem:[#allocation67_spill] sm:$0xff] %v17151_v39 }
 0x471   : > { %18790 = vst [vmem:[#allocation66_spill] sm:$0xff] %v17147_v61  ;;  %13058 = vmatprep.mubr.msk.f32.mxu1 %vm597_vm4, %v17147_v61  ;;  %v17278_v18 = vld [vmem:[#allocation3 + $0x168] sm:$0xff]  ;;  %v17282_v49 = vld [vmem:[#allocation3 + $0x170] sm:$0xff] }
 0x472   : > { %13059 = vmatmul.mubr.msk.f32.gmra.mrb[108].mxu1 %vm597_vm4, %v17151_v39  ;;  %v17293_v39 = vld [vmem:[#allocation3 + $0x1a] sm:$0xff]  ;;  %v17305_v61 = vld [vmem:[#allocation3 + $0x32] sm:$0xff] }
 0x473   : > { %13063 = vmatprep.mubr.msk.f32.mxu1 %vm597_vm4, %v5580_v40  ;;  %v17214_v40 = vld [vmem:[#allocation3 + $0xa8] sm:$0xff]  ;;  %18792 = vst [vmem:[#allocation70_spill] sm:$0xff] %v17293_v39  ;;  %18794 = vst [vmem:[#allocation72_spill] sm:$0xff] %v17305_v61 }
 0x476   : > { %13064 = vmatmul.mubr.msk.f32.vlgmr.msra.gmra.mrb[78].mxu1 %vm597_vm4, %v5581_v0  ;;  %v17218_v0 = vld [vmem:[#allocation3 + $0xb0] sm:$0xff] }
 0x477   : > { %13112 = vmatpush3.msk.msra.mxu1 %vm5743_vm7, %v16782_v27  ;;  %13066 = vmatprep.mubr.msk.f32.mxu1 %vm597_vm4, %v17162_v32  ;;  %v17182_v27 = vld [vmem:[#allocation3 + $0x48] sm:$0xff] }
 0x478   : > { %13161 = vmatprep.subr.msk.mxu1 %vm5743_vm7, %v17159_v29 }
 0x47a   : > { %13067 = vmatmul.mubr.msk.f32.gmra.mrb[80].mxu1 %vm597_vm4, %v17170_v24 }
 0x47b   : > { %13069 = vmatprep.mubr.msk.f32.mxu1 %vm597_vm4, %v17174_v35 }
 0x47e   : > { %13070 = vmatmul.mubr.msk.f32.gmra.mrb[82].mxu1 %vm597_vm4, %v17178_v55 }
 0x47f   : > { %13072 = vmatprep.mubr.msk.f32.mxu1 %vm597_vm4, %v17182_v27 }
 0x482   : > { %13073 = vmatmul.mubr.msk.f32.gmra.mrb[84].mxu1 %vm597_vm4, %v17186_v56 }
 0x483   : > { %13075 = vmatprep.mubr.msk.f32.mxu1 %vm597_vm4, %v17190_v8 }
 0x486   : > { %13076 = vmatmul.mubr.msk.f32.gmra.mrb[86].mxu1 %vm597_vm4, %v17194_v9 }
 0x487   : > { %13078 = vmatprep.mubr.msk.f32.mxu1 %vm597_vm4, %v17198_v59 }
 0x48a   : > { %13079 = vmatmul.mubr.msk.f32.gmra.mrb[88].mxu1 %vm597_vm4, %v17202_v46 }
 0x48b   : > { %13081 = vmatprep.mubr.msk.f32.mxu1 %vm597_vm4, %v17206_v7 }
 0x48e   : > { %13082 = vmatmul.mubr.msk.f32.gmra.mrb[90].mxu1 %vm597_vm4, %v17210_v44 }
 0x48f   : > { %13084 = vmatprep.mubr.msk.f32.mxu1 %vm597_vm4, %v17214_v40 }
 0x492   : > { %13085 = vmatmul.mubr.msk.f32.gmra.mrb[92].mxu1 %vm597_vm4, %v17218_v0 }
 0x493   : > { %13087 = vmatprep.mubr.msk.f32.mxu1 %vm597_vm4, %v17222_v5 }
 0x496   : > { %13088 = vmatmul.mubr.msk.f32.gmra.mrb[94].mxu1 %vm597_vm4, %v17226_v12 }
 0x497   : > { %13090 = vmatprep.mubr.msk.f32.mxu1 %vm597_vm4, %v17230_v33 }
 0x49a   : > { %13091 = vmatmul.mubr.msk.f32.gmra.mrb[96].mxu1 %vm597_vm4, %v17234_v37 }
 0x49b   : > { %13093 = vmatprep.mubr.msk.f32.mxu1 %vm597_vm4, %v17238_v6 }
 0x49e   : > { %13094 = vmatmul.mubr.msk.f32.gmra.mrb[98].mxu1 %vm597_vm4, %v17242_v1 }
 0x49f   : > { %13096 = vmatprep.mubr.msk.f32.mxu1 %vm597_vm4, %v17246_v36 }
 0x4a2   : > { %13097 = vmatmul.mubr.msk.f32.gmra.mrb[100].mxu1 %vm597_vm4, %v17250_v54 }
 0x4a3   : > { %13099 = vmatprep.mubr.msk.f32.mxu1 %vm597_vm4, %v17254_v4 }
 0x4a6   : > { %13100 = vmatmul.mubr.msk.f32.gmra.mrb[102].mxu1 %vm597_vm4, %v17258_v50 }
 0x4a7   : > { %13102 = vmatprep.mubr.msk.f32.mxu1 %vm597_vm4, %v17262_v30 }
 0x4aa   : > { %13103 = vmatmul.mubr.msk.f32.gmra.mrb[104].mxu1 %vm597_vm4, %v17266_v51 }
 0x4ab   : > { %13105 = vmatprep.mubr.msk.f32.mxu1 %vm597_vm4, %v17270_v25 }
 0x4ae   : > { %13106 = vmatmul.mubr.msk.f32.gmra.mrb[106].mxu1 %vm597_vm4, %v17274_v42 }
 0x4af   : > { %13108 = vmatprep.mubr.msk.f32.mxu1 %vm597_vm4, %v17278_v18 }
 0x4b2   : > { %13109 = vmatmul.mubr.msk.f32.gmra.mrb[108].mxu1 %vm597_vm4, %v17282_v49 }
 0x4b3   : > { %13113 = vmatprep.mubr.msk.f32.mxu1 %vm597_vm4, %v6296_v48  ;;  %v17301_v48 = vld [vmem:[#allocation3 + $0x22] sm:$0xff] }
 0x4b4   : > { %18793 = vst [vmem:[#allocation71_spill] sm:$0xff] %v17301_v48 }
 0x4b6   : > { %13114 = vmatmul.mubr.msk.f32.vlgmr.msra.gmra.mrb[78].mxu1 %vm597_vm4, %v6297_v52  ;;  %v17309_v52 = vld [vmem:[#allocation3 + $0x3a] sm:$0xff] }
 0x4b7   : > { %13162 = vmatpush3.msk.msra.mxu1 %vm5743_vm7, %v17159_v29  ;;  %13116 = vmatprep.mubr.msk.f32.mxu1 %vm597_vm4, %v17293_v39  ;;  %18795 = vst [vmem:[#allocation73_spill] sm:$0xff] %v17309_v52  ;;  %v17313_v29 = vld [vmem:[#allocation3 + $0x4a] sm:$0xff]  ;;  %v17317_v39 = vld [vmem:[#allocation3 + $0x52] sm:$0xff] }
 0x4b8   : > { %13211 = vmatprep.subr.msk.mxu1 %vm5743_vm7, %v17290_v20  ;;  %18796 = vst [vmem:[#allocation74_spill] sm:$0xff] %v17313_v29  ;;  %18797 = vst [vmem:[#allocation75_spill] sm:$0xff] %v17317_v39 }
 0x4ba   : > { %13117 = vmatmul.mubr.msk.f32.gmra.mrb[80].mxu1 %vm597_vm4, %v17301_v48  ;;  %v17321_v48 = vld [vmem:[#allocation3 + $0x62] sm:$0xff] }
 0x4bb   : > { %13119 = vmatprep.mubr.msk.f32.mxu1 %vm597_vm4, %v17305_v61  ;;  %18798 = vst [vmem:[#allocation76_spill] sm:$0xff] %v17321_v48  ;;  %v17325_v61 = vld [vmem:[#allocation3 + $0x6a] sm:$0xff] }
 0x4bc   : > { %18799 = vst [vmem:[#allocation87_spill] sm:$0xff] %v17325_v61 }
 0x4be   : > { %13120 = vmatmul.mubr.msk.f32.gmra.mrb[82].mxu1 %vm597_vm4, %v17309_v52  ;;  %v17329_v52 = vld [vmem:[#allocation3 + $0x7a] sm:$0xff] }
 0x4bf   : > { %13122 = vmatprep.mubr.msk.f32.mxu1 %vm597_vm4, %v17313_v29  ;;  %18800 = vst [vmem:[#allocation89_spill] sm:$0xff] %v17329_v52  ;;  %v17333_v29 = vld [vmem:[#allocation3 + $0x82] sm:$0xff] }
 0x4c0   : > { %18801 = vst [vmem:[#allocation90_spill] sm:$0xff] %v17333_v29 }
 0x4c2   : > { %13123 = vmatmul.mubr.msk.f32.gmra.mrb[84].mxu1 %vm597_vm4, %v17317_v39  ;;  %v17337_v39 = vld [vmem:[#allocation3 + $0x92] sm:$0xff] }
 0x4c3   : > { %13125 = vmatprep.mubr.msk.f32.mxu1 %vm597_vm4, %v17321_v48  ;;  %18802 = vst [vmem:[#allocation91_spill] sm:$0xff] %v17337_v39  ;;  %v17341_v48 = vld [vmem:[#allocation3 + $0x9a] sm:$0xff] }
 0x4c4   : > { %18803 = vst [vmem:[#allocation93_spill] sm:$0xff] %v17341_v48 }
 0x4c6   : > { %13126 = vmatmul.mubr.msk.f32.gmra.mrb[86].mxu1 %vm597_vm4, %v17325_v61  ;;  %v17345_v61 = vld [vmem:[#allocation3 + $0xaa] sm:$0xff] }
 0x4c7   : > { %13128 = vmatprep.mubr.msk.f32.mxu1 %vm597_vm4, %v17329_v52  ;;  %18804 = vst [vmem:[#allocation95_spill] sm:$0xff] %v17345_v61  ;;  %v17349_v52 = vld [vmem:[#allocation3 + $0xb2] sm:$0xff] }
 0x4c8   : > { %18805 = vst [vmem:[#allocation77_spill] sm:$0xff] %v17349_v52 }
 0x4ca   : > { %13129 = vmatmul.mubr.msk.f32.gmra.mrb[88].mxu1 %vm597_vm4, %v17333_v29  ;;  %v17353_v29 = vld [vmem:[#allocation3 + $0xc2] sm:$0xff] }
 0x4cb   : > { %13131 = vmatprep.mubr.msk.f32.mxu1 %vm597_vm4, %v17337_v39  ;;  %18806 = vst [vmem:[#allocation78_spill] sm:$0xff] %v17353_v29  ;;  %v17357_v39 = vld [vmem:[#allocation3 + $0xca] sm:$0xff] }
 0x4cc   : > { %18807 = vst [vmem:[#allocation79_spill] sm:$0xff] %v17357_v39 }
 0x4ce   : > { %13132 = vmatmul.mubr.msk.f32.gmra.mrb[90].mxu1 %vm597_vm4, %v17341_v48  ;;  %v17361_v48 = vld [vmem:[#allocation3 + $0xda] sm:$0xff] }
 0x4cf   : > { %13134 = vmatprep.mubr.msk.f32.mxu1 %vm597_vm4, %v17345_v61  ;;  %18808 = vst [vmem:[#allocation80_spill] sm:$0xff] %v17361_v48  ;;  %v17365_v61 = vld [vmem:[#allocation3 + $0xe2] sm:$0xff] }
 0x4d0   : > { %18809 = vst [vmem:[#allocation81_spill] sm:$0xff] %v17365_v61 }
 0x4d2   : > { %13135 = vmatmul.mubr.msk.f32.gmra.mrb[92].mxu1 %vm597_vm4, %v17349_v52  ;;  %v17369_v52 = vld [vmem:[#allocation3 + $0xf2] sm:$0xff] }
 0x4d3   : > { %13137 = vmatprep.mubr.msk.f32.mxu1 %vm597_vm4, %v17353_v29  ;;  %18810 = vst [vmem:[#allocation82_spill] sm:$0xff] %v17369_v52  ;;  %v17373_v29 = vld [vmem:[#allocation3 + $0xfa] sm:$0xff] }
 0x4d4   : > { %18811 = vst [vmem:[#allocation83_spill] sm:$0xff] %v17373_v29 }
 0x4d6   : > { %13138 = vmatmul.mubr.msk.f32.gmra.mrb[94].mxu1 %vm597_vm4, %v17357_v39  ;;  %v17377_v39 = vld [vmem:[#allocation3 + $0x10a] sm:$0xff] }
 0x4d7   : > { %13140 = vmatprep.mubr.msk.f32.mxu1 %vm597_vm4, %v17361_v48  ;;  %18812 = vst [vmem:[#allocation84_spill] sm:$0xff] %v17377_v39  ;;  %v17381_v48 = vld [vmem:[#allocation3 + $0x112] sm:$0xff] }
 0x4d8   : > { %18813 = vst [vmem:[#allocation85_spill] sm:$0xff] %v17381_v48 }
 0x4da   : > { %13141 = vmatmul.mubr.msk.f32.gmra.mrb[96].mxu1 %vm597_vm4, %v17365_v61  ;;  %v17385_v61 = vld [vmem:[#allocation3 + $0x122] sm:$0xff] }
 0x4db   : > { %13143 = vmatprep.mubr.msk.f32.mxu1 %vm597_vm4, %v17369_v52  ;;  %18814 = vst [vmem:[#allocation86_spill] sm:$0xff] %v17385_v61  ;;  %v17389_v52 = vld [vmem:[#allocation3 + $0x12a] sm:$0xff] }
 0x4dc   : > { %18815 = vst [vmem:[#allocation88_spill] sm:$0xff] %v17389_v52 }
 0x4de   : > { %13144 = vmatmul.mubr.msk.f32.gmra.mrb[98].mxu1 %vm597_vm4, %v17373_v29  ;;  %v17393_v29 = vld [vmem:[#allocation3 + $0x13a] sm:$0xff] }
 0x4df   : > { %13146 = vmatprep.mubr.msk.f32.mxu1 %vm597_vm4, %v17377_v39  ;;  %18816 = vst [vmem:[#allocation92_spill] sm:$0xff] %v17393_v29  ;;  %v17397_v39 = vld [vmem:[#allocation3 + $0x142] sm:$0xff] }
 0x4e2   : > { %13147 = vmatmul.mubr.msk.f32.gmra.mrb[100].mxu1 %vm597_vm4, %v17381_v48  ;;  %v17401_v48 = vld [vmem:[#allocation3 + $0x152] sm:$0xff] }
 0x4e3   : > { %13149 = vmatprep.mubr.msk.f32.mxu1 %vm597_vm4, %v17385_v61  ;;  %18817 = vst [vmem:[#allocation94_spill] sm:$0xff] %v17401_v48  ;;  %v17405_v61 = vld [vmem:[#allocation3 + $0x15a] sm:$0xff] }
 0x4e6   : > { %13150 = vmatmul.mubr.msk.f32.gmra.mrb[102].mxu1 %vm597_vm4, %v17389_v52  ;;  %v17409_v52 = vld [vmem:[#allocation3 + $0x16a] sm:$0xff] }
 0x4e7   : > { %13152 = vmatprep.mubr.msk.f32.mxu1 %vm597_vm4, %v17393_v29  ;;  %18818 = vst [vmem:[#allocation96_spill] sm:$0xff] %v17409_v52  ;;  %v17413_v29 = vld [vmem:[#allocation3 + $0x172] sm:$0xff] }
 0x4ea   : > { %13153 = vmatmul.mubr.msk.f32.gmra.mrb[104].mxu1 %vm597_vm4, %v17397_v39 }
 0x4eb   : > { %13155 = vmatprep.mubr.msk.f32.mxu1 %vm597_vm4, %v17401_v48  ;;  %v11390_v48 = vld [vmem:[%s18376_s10 + $0x14] sm:$0xf] }
 0x4ee   : > { %13156 = vmatmul.mubr.msk.f32.gmra.mrb[106].mxu1 %vm597_vm4, %v17405_v61 }
 0x4ef   : > { %13158 = vmatprep.mubr.msk.f32.mxu1 %vm597_vm4, %v17409_v52 }
 0x4f2   : > { %13159 = vmatmul.mubr.msk.f32.gmra.mrb[108].mxu1 %vm597_vm4, %v17413_v29 }
 0x4f3   : > { %13163 = vmatprep.mubr.msk.f32.mxu1 %vm597_vm4, %v17162_v32  ;;  %v17487_v32 = vld [vmem:[#allocation3 + $0x188] sm:$0xff] }
 0x4f6   : > { %13164 = vmatmul.mubr.msk.f32.vlgmr.msra.gmra.mrb[78].mxu1 %vm597_vm4, %v17170_v24  ;;  %v11424_v24 = vld [vmem:[%s18376_s10 + $0x18] sm:$0xf] }
 0x4f7   : > { %13212 = vmatpush3.msk.msra.mxu1 %vm5743_vm7, %v17290_v20  ;;  %13166 = vmatprep.mubr.msk.f32.mxu1 %vm597_vm4, %v17174_v35  ;;  %v17483_v20 = vld [vmem:[#allocation3 + $0x180] sm:$0xff] }
 0x4f8   : > { %13261 = vmatprep.subr.msk.mxu1 %vm5743_vm7, %v11390_v48 }
 0x4fa   : > { %13167 = vmatmul.mubr.msk.f32.gmra.mrb[80].mxu1 %vm597_vm4, %v17178_v55 }
 0x4fb   : > { %13169 = vmatprep.mubr.msk.f32.mxu1 %vm597_vm4, %v17182_v27 }
 0x4fe   : > { %13170 = vmatmul.mubr.msk.f32.gmra.mrb[82].mxu1 %vm597_vm4, %v17186_v56 }
 0x4ff   : > { %13172 = vmatprep.mubr.msk.f32.mxu1 %vm597_vm4, %v17190_v8 }
 0x502   : > { %13173 = vmatmul.mubr.msk.f32.gmra.mrb[84].mxu1 %vm597_vm4, %v17194_v9 }
 0x503   : > { %13175 = vmatprep.mubr.msk.f32.mxu1 %vm597_vm4, %v17198_v59 }
 0x506   : > { %13176 = vmatmul.mubr.msk.f32.gmra.mrb[86].mxu1 %vm597_vm4, %v17202_v46 }
 0x507   : > { %13178 = vmatprep.mubr.msk.f32.mxu1 %vm597_vm4, %v17206_v7 }
 0x50a   : > { %13179 = vmatmul.mubr.msk.f32.gmra.mrb[88].mxu1 %vm597_vm4, %v17210_v44 }
 0x50b   : > { %13181 = vmatprep.mubr.msk.f32.mxu1 %vm597_vm4, %v17214_v40 }
 0x50e   : > { %13182 = vmatmul.mubr.msk.f32.gmra.mrb[90].mxu1 %vm597_vm4, %v17218_v0 }
 0x50f   : > { %13184 = vmatprep.mubr.msk.f32.mxu1 %vm597_vm4, %v17222_v5 }
 0x512   : > { %13185 = vmatmul.mubr.msk.f32.gmra.mrb[92].mxu1 %vm597_vm4, %v17226_v12 }
 0x513   : > { %13187 = vmatprep.mubr.msk.f32.mxu1 %vm597_vm4, %v17230_v33 }
 0x516   : > { %13188 = vmatmul.mubr.msk.f32.gmra.mrb[94].mxu1 %vm597_vm4, %v17234_v37 }
 0x517   : > { %13190 = vmatprep.mubr.msk.f32.mxu1 %vm597_vm4, %v17238_v6 }
 0x51a   : > { %13191 = vmatmul.mubr.msk.f32.gmra.mrb[96].mxu1 %vm597_vm4, %v17242_v1 }
 0x51b   : > { %13193 = vmatprep.mubr.msk.f32.mxu1 %vm597_vm4, %v17246_v36 }
 0x51e   : > { %13194 = vmatmul.mubr.msk.f32.gmra.mrb[98].mxu1 %vm597_vm4, %v17250_v54 }
 0x51f   : > { %13196 = vmatprep.mubr.msk.f32.mxu1 %vm597_vm4, %v17254_v4 }
 0x522   : > { %13197 = vmatmul.mubr.msk.f32.gmra.mrb[100].mxu1 %vm597_vm4, %v17258_v50 }
 0x523   : > { %13199 = vmatprep.mubr.msk.f32.mxu1 %vm597_vm4, %v17262_v30 }
 0x526   : > { %13200 = vmatmul.mubr.msk.f32.gmra.mrb[102].mxu1 %vm597_vm4, %v17266_v51 }
 0x527   : > { %13202 = vmatprep.mubr.msk.f32.mxu1 %vm597_vm4, %v17270_v25 }
 0x52a   : > { %13203 = vmatmul.mubr.msk.f32.gmra.mrb[104].mxu1 %vm597_vm4, %v17274_v42 }
 0x52b   : > { %13205 = vmatprep.mubr.msk.f32.mxu1 %vm597_vm4, %v17278_v18 }
 0x52e   : > { %13206 = vmatmul.mubr.msk.f32.gmra.mrb[106].mxu1 %vm597_vm4, %v17282_v49 }
 0x52f   : > { %13208 = vmatprep.mubr.msk.f32.mxu1 %vm597_vm4, %v17483_v20 }
 0x532   : > { %13209 = vmatmul.mubr.msk.f32.gmra.mrb[108].mxu1 %vm597_vm4, %v17487_v32 }
 0x533   : > { %13213 = vmatprep.mubr.msk.f32.mxu1 %vm597_vm4, %v16906_v21  ;;  %v18819_v21 = vld [vmem:[#allocation66_spill] sm:$0xff] }
 0x536   : > { %13214 = vmatmul.mubr.msk.f32.vlgmr.msra.gmra.mrb[78].mxu1 %vm597_vm4, %v16915_v45  ;;  %v18820_v45 = vld [vmem:[#allocation67_spill] sm:$0xff] }
 0x537   : > { %13262 = vmatpush3.msk.msra.mxu1 %vm5743_vm7, %v11390_v48  ;;  %13216 = vmatprep.mubr.msk.f32.mxu1 %vm597_vm4, %v16929_v13  ;;  %v17556_v13 = vld [vmem:[#allocation3 + $0x181] sm:$0xff] }
 0x538   : > { %13311 = vmatprep.subr.msk.mxu1 %vm5743_vm7, %v11424_v24  ;;  %v18827_v48 = vld [vmem:[#allocation75_spill] sm:$0xff] }
 0x53a   : > { %13217 = vmatmul.mubr.msk.f32.gmra.mrb[80].mxu1 %vm597_vm4, %v16938_v58  ;;  %v17560_v58 = vld [vmem:[#allocation3 + $0x189] sm:$0xff] }
 0x53b   : > { %13219 = vmatprep.mubr.msk.f32.mxu1 %vm597_vm4, %v16953_v47  ;;  %18821 = vst [vmem:[#allocation4_spill] sm:$0xff] %v17560_v58  ;;  %v18822_v47 = vld [vmem:[#allocation70_spill] sm:$0xff] }
 0x53e   : > { %13220 = vmatmul.mubr.msk.f32.gmra.mrb[82].mxu1 %vm597_vm4, %v16962_v11  ;;  %v11458_v11 = vld [vmem:[%s18376_s10 + $0x1c] sm:$0xf] }
 0x53f   : > { %13222 = vmatprep.mubr.msk.f32.mxu1 %vm597_vm4, %v16985_v62  ;;  %v18823_v62 = vld [vmem:[#allocation71_spill] sm:$0xff] }
 0x542   : > { %13223 = vmatmul.mubr.msk.f32.gmra.mrb[84].mxu1 %vm597_vm4, %v16992_v31  ;;  %v18824_v31 = vld [vmem:[#allocation72_spill] sm:$0xff] }
 0x543   : > { %13225 = vmatprep.mubr.msk.f32.mxu1 %vm597_vm4, %v17009_v15  ;;  %v18825_v15 = vld [vmem:[#allocation73_spill] sm:$0xff] }
 0x546   : > { %13226 = vmatmul.mubr.msk.f32.gmra.mrb[86].mxu1 %vm597_vm4, %v17015_v3  ;;  %v18826_v3 = vld [vmem:[#allocation74_spill] sm:$0xff] }
 0x547   : > { %13228 = vmatprep.mubr.msk.f32.mxu1 %vm597_vm4, %v17032_v43 }
 0x54a   : > { %13229 = vmatmul.mubr.msk.f32.gmra.mrb[88].mxu1 %vm597_vm4, %v17039_v34 }
 0x54b   : > { %13231 = vmatprep.mubr.msk.f32.mxu1 %vm597_vm4, %v17051_v57 }
 0x54e   : > { %13232 = vmatmul.mubr.msk.f32.gmra.mrb[90].mxu1 %vm597_vm4, %v17058_v28 }
 0x54f   : > { %13234 = vmatprep.mubr.msk.f32.mxu1 %vm597_vm4, %v17066_v63 }
 0x552   : > { %13235 = vmatmul.mubr.msk.f32.gmra.mrb[92].mxu1 %vm597_vm4, %v17070_v23 }
 0x553   : > { %13237 = vmatprep.mubr.msk.f32.mxu1 %vm597_vm4, %v17077_v60 }
 0x556   : > { %13238 = vmatmul.mubr.msk.f32.gmra.mrb[94].mxu1 %vm597_vm4, %v17082_v53 }
 0x557   : > { %13240 = vmatprep.mubr.msk.f32.mxu1 %vm597_vm4, %v17090_v26 }
 0x55a   : > { %13241 = vmatmul.mubr.msk.f32.gmra.mrb[96].mxu1 %vm597_vm4, %v17095_v14 }
 0x55b   : > { %13243 = vmatprep.mubr.msk.f32.mxu1 %vm597_vm4, %v17104_v10 }
 0x55e   : > { %13244 = vmatmul.mubr.msk.f32.gmra.mrb[98].mxu1 %vm597_vm4, %v17108_v2 }
 0x55f   : > { %13246 = vmatprep.mubr.msk.f32.mxu1 %vm597_vm4, %v17115_v38 }
 0x562   : > { %13247 = vmatmul.mubr.msk.f32.gmra.mrb[100].mxu1 %vm597_vm4, %v17119_v22 }
 0x563   : > { %13249 = vmatprep.mubr.msk.f32.mxu1 %vm597_vm4, %v17125_v41 }
 0x566   : > { %13250 = vmatmul.mubr.msk.f32.gmra.mrb[102].mxu1 %vm597_vm4, %v17131_v16 }
 0x567   : > { %13252 = vmatprep.mubr.msk.f32.mxu1 %vm597_vm4, %v17136_v19 }
 0x56a   : > { %13253 = vmatmul.mubr.msk.f32.gmra.mrb[104].mxu1 %vm597_vm4, %v17142_v17 }
 0x56b   : > { %13255 = vmatprep.mubr.msk.f32.mxu1 %vm597_vm4, %v18819_v21 }
 0x56e   : > { %13256 = vmatmul.mubr.msk.f32.gmra.mrb[106].mxu1 %vm597_vm4, %v18820_v45 }
 0x56f   : > { %13258 = vmatprep.mubr.msk.f32.mxu1 %vm597_vm4, %v17556_v13 }
 0x572   : > { %13259 = vmatmul.mubr.msk.f32.gmra.mrb[108].mxu1 %vm597_vm4, %v17560_v58  ;;  %v18832_v58 = vld [vmem:[#allocation91_spill] sm:$0xff] }
 0x573   : > { %13263 = vmatprep.mubr.msk.f32.mxu1 %vm597_vm4, %v18822_v47  ;;  %v18828_v47 = vld [vmem:[#allocation76_spill] sm:$0xff] }
 0x576   : > { %13264 = vmatmul.mubr.msk.f32.vlgmr.msra.gmra.mrb[78].mxu1 %vm597_vm4, %v18823_v62  ;;  %v18829_v62 = vld [vmem:[#allocation87_spill] sm:$0xff] }
 0x577   : > { %13312 = vmatpush3.msk.msra.mxu1 %vm5743_vm7, %v11424_v24  ;;  %13266 = vmatprep.mubr.msk.f32.mxu1 %vm597_vm4, %v18824_v31  ;;  %v18830_v24 = vld [vmem:[#allocation89_spill] sm:$0xff]  ;;  %v18831_v31 = vld [vmem:[#allocation90_spill] sm:$0xff] }
 0x578   : > { %13361 = vmatprep.subr.msk.mxu1 %vm5743_vm7, %v11458_v11 }
 0x57a   : > { %13267 = vmatmul.mubr.msk.f32.gmra.mrb[80].mxu1 %vm597_vm4, %v18825_v15  ;;  %v18833_v15 = vld [vmem:[#allocation93_spill] sm:$0xff] }
 0x57b   : > { %13269 = vmatprep.mubr.msk.f32.mxu1 %vm597_vm4, %v18826_v3  ;;  %v18834_v3 = vld [vmem:[#allocation95_spill] sm:$0xff] }
 0x57e   : > { %13270 = vmatmul.mubr.msk.f32.gmra.mrb[82].mxu1 %vm597_vm4, %v18827_v48  ;;  %v18835_v48 = vld [vmem:[#allocation77_spill] sm:$0xff] }
 0x57f   : > { %13272 = vmatprep.mubr.msk.f32.mxu1 %vm597_vm4, %v18828_v47  ;;  %v18836_v47 = vld [vmem:[#allocation78_spill] sm:$0xff] }
 0x582   : > { %13273 = vmatmul.mubr.msk.f32.gmra.mrb[84].mxu1 %vm597_vm4, %v18829_v62  ;;  %v18837_v62 = vld [vmem:[#allocation79_spill] sm:$0xff] }
 0x583   : > { %13275 = vmatprep.mubr.msk.f32.mxu1 %vm597_vm4, %v18830_v24  ;;  %v18838_v24 = vld [vmem:[#allocation80_spill] sm:$0xff] }
 0x586   : > { %13276 = vmatmul.mubr.msk.f32.gmra.mrb[86].mxu1 %vm597_vm4, %v18831_v31  ;;  %v18839_v31 = vld [vmem:[#allocation81_spill] sm:$0xff] }
 0x587   : > { %13278 = vmatprep.mubr.msk.f32.mxu1 %vm597_vm4, %v18832_v58  ;;  %v18840_v58 = vld [vmem:[#allocation82_spill] sm:$0xff] }
 0x58a   : > { %13279 = vmatmul.mubr.msk.f32.gmra.mrb[88].mxu1 %vm597_vm4, %v18833_v15  ;;  %v18841_v15 = vld [vmem:[#allocation83_spill] sm:$0xff] }
 0x58b   : > { %13281 = vmatprep.mubr.msk.f32.mxu1 %vm597_vm4, %v18834_v3  ;;  %v18842_v3 = vld [vmem:[#allocation84_spill] sm:$0xff] }
 0x58e   : > { %13282 = vmatmul.mubr.msk.f32.gmra.mrb[90].mxu1 %vm597_vm4, %v18835_v48  ;;  %v18843_v48 = vld [vmem:[#allocation85_spill] sm:$0xff] }
 0x58f   : > { %13284 = vmatprep.mubr.msk.f32.mxu1 %vm597_vm4, %v18836_v47  ;;  %v18844_v47 = vld [vmem:[#allocation86_spill] sm:$0xff] }
 0x592   : > { %13285 = vmatmul.mubr.msk.f32.gmra.mrb[92].mxu1 %vm597_vm4, %v18837_v62  ;;  %v18845_v62 = vld [vmem:[#allocation88_spill] sm:$0xff] }
 0x593   : > { %13287 = vmatprep.mubr.msk.f32.mxu1 %vm597_vm4, %v18838_v24  ;;  %v18846_v24 = vld [vmem:[#allocation92_spill] sm:$0xff] }
 0x596   : > { %13288 = vmatmul.mubr.msk.f32.gmra.mrb[94].mxu1 %vm597_vm4, %v18839_v31 }
 0x597   : > { %13290 = vmatprep.mubr.msk.f32.mxu1 %vm597_vm4, %v18840_v58  ;;  %v18847_v58 = vld [vmem:[#allocation94_spill] sm:$0xff] }
 0x59a   : > { %13291 = vmatmul.mubr.msk.f32.gmra.mrb[96].mxu1 %vm597_vm4, %v18841_v15 }
 0x59b   : > { %13293 = vmatprep.mubr.msk.f32.mxu1 %vm597_vm4, %v18842_v3 }
 0x59e   : > { %13294 = vmatmul.mubr.msk.f32.gmra.mrb[98].mxu1 %vm597_vm4, %v18843_v48 }
 0x59f   : > { %13296 = vmatprep.mubr.msk.f32.mxu1 %vm597_vm4, %v18844_v47  ;;  %v17629_v47 = vld [vmem:[#allocation3 + $0x182] sm:$0xff] }
 0x5a2   : > { %13297 = vmatmul.mubr.msk.f32.gmra.mrb[100].mxu1 %vm597_vm4, %v18845_v62 }
 0x5a3   : > { %13299 = vmatprep.mubr.msk.f32.mxu1 %vm597_vm4, %v18846_v24  ;;  %v17633_v24 = vld [vmem:[#allocation3 + $0x18a] sm:$0xff] }
 0x5a6   : > { %13300 = vmatmul.mubr.msk.f32.gmra.mrb[102].mxu1 %vm597_vm4, %v17397_v39 }
 0x5a7   : > { %13302 = vmatprep.mubr.msk.f32.mxu1 %vm597_vm4, %v18847_v58 }
 0x5aa   : > { %13303 = vmatmul.mubr.msk.f32.gmra.mrb[104].mxu1 %vm597_vm4, %v17405_v61 }
 0x5ab   : > { %13305 = vmatprep.mubr.msk.f32.mxu1 %vm597_vm4, %v17409_v52  ;;  %v11492_v52 = vld [vmem:[%s18376_s10 + $0x20] sm:$0xf] }
 0x5ae   : > { %13306 = vmatmul.mubr.msk.f32.gmra.mrb[106].mxu1 %vm597_vm4, %v17413_v29 }
 0x5af   : > { %13308 = vmatprep.mubr.msk.f32.mxu1 %vm597_vm4, %v17629_v47 }
 0x5b2   : > { %13309 = vmatmul.mubr.msk.f32.gmra.mrb[108].mxu1 %vm597_vm4, %v17633_v24 }
 0x5b3   : > { %13313 = vmatprep.mubr.msk.f32.mxu1 %vm597_vm4, %v17174_v35 }
 0x5b6   : > { %13314 = vmatmul.mubr.msk.f32.vlgmr.msra.gmra.mrb[78].mxu1 %vm597_vm4, %v17178_v55  ;;  %v17832_v55 = vld [vmem:[%s18378_s12] ss:$0 sm:$0xff] }
 0x5b7   : > { %13362 = vmatpush3.msk.msra.mxu1 %vm5743_vm7, %v11458_v11  ;;  %13316 = vmatprep.mubr.msk.f32.mxu1 %vm597_vm4, %v17182_v27 }
 0x5b8   : > { %13411 = vmatprep.subr.msk.mxu1 %vm5743_vm7, %v11492_v52 }
 0x5ba   : > { %13317 = vmatmul.mubr.msk.f32.gmra.mrb[80].mxu1 %vm597_vm4, %v17186_v56 }
 0x5bb   : > { %13319 = vmatprep.mubr.msk.f32.mxu1 %vm597_vm4, %v17190_v8 }
 0x5be   : > { %13320 = vmatmul.mubr.msk.f32.gmra.mrb[82].mxu1 %vm597_vm4, %v17194_v9 }
 0x5bf   : > { %13322 = vmatprep.mubr.msk.f32.mxu1 %vm597_vm4, %v17198_v59 }
 0x5c2   : > { %13323 = vmatmul.mubr.msk.f32.gmra.mrb[84].mxu1 %vm597_vm4, %v17202_v46 }
 0x5c3   : > { %13325 = vmatprep.mubr.msk.f32.mxu1 %vm597_vm4, %v17206_v7 }
 0x5c6   : > { %13326 = vmatmul.mubr.msk.f32.gmra.mrb[86].mxu1 %vm597_vm4, %v17210_v44 }
 0x5c7   : > { %13328 = vmatprep.mubr.msk.f32.mxu1 %vm597_vm4, %v17214_v40 }
 0x5ca   : > { %13329 = vmatmul.mubr.msk.f32.gmra.mrb[88].mxu1 %vm597_vm4, %v17218_v0 }
 0x5cb   : > { %13331 = vmatprep.mubr.msk.f32.mxu1 %vm597_vm4, %v17222_v5  ;;  %v18850_v5 = vld [vmem:[#allocation73_spill] sm:$0xff] }
 0x5ce   : > { %13332 = vmatmul.mubr.msk.f32.gmra.mrb[90].mxu1 %vm597_vm4, %v17226_v12  ;;  %v18849_v12 = vld [vmem:[#allocation72_spill] sm:$0xff] }
 0x5cf   : > { %13334 = vmatprep.mubr.msk.f32.mxu1 %vm597_vm4, %v17230_v33  ;;  %v8278_v33 = vld [vmem:[#allocation3 + $0x1a1] sm:$0xff] }
 0x5d2   : > { %13335 = vmatmul.mubr.msk.f32.gmra.mrb[92].mxu1 %vm597_vm4, %v17234_v37  ;;  %v18848_v37 = vld [vmem:[#allocation4_spill] sm:$0xff] }
 0x5d3   : > { %13337 = vmatprep.mubr.msk.f32.mxu1 %vm597_vm4, %v17238_v6  ;;  %v8277_v6 = vld [vmem:[#allocation3 + $0x199] sm:$0xff] }
 0x5d6   : > { %13338 = vmatmul.mubr.msk.f32.gmra.mrb[94].mxu1 %vm597_vm4, %v17242_v1  ;;  %v8254_v1 = vld [vmem:[#allocation3 + $0x81] sm:$0xff] }
 0x5d7   : > { %13340 = vmatprep.mubr.msk.f32.mxu1 %vm597_vm4, %v17246_v36  ;;  %v8253_v36 = vld [vmem:[#allocation3 + $0x79] sm:$0xff] }
 0x5da   : > { %13341 = vmatmul.mubr.msk.f32.gmra.mrb[96].mxu1 %vm597_vm4, %v17250_v54  ;;  %v8252_v54 = vld [vmem:[#allocation3 + $0x69] sm:$0xff] }
 0x5db   : > { %13343 = vmatprep.mubr.msk.f32.mxu1 %vm597_vm4, %v17254_v4  ;;  %v8251_v4 = vld [vmem:[#allocation3 + $0x61] sm:$0xff] }
 0x5de   : > { %13344 = vmatmul.mubr.msk.f32.gmra.mrb[98].mxu1 %vm597_vm4, %v17258_v50  ;;  %v7887_v50 = vld [vmem:[#allocation3 + $0x198] sm:$0xff] }
 0x5df   : > { %13346 = vmatprep.mubr.msk.f32.mxu1 %vm597_vm4, %v17262_v30  ;;  %v8250_v30 = vld [vmem:[#allocation3 + $0x51] sm:$0xff] }
 0x5e2   : > { %13347 = vmatmul.mubr.msk.f32.gmra.mrb[100].mxu1 %vm597_vm4, %v17266_v51  ;;  %v7888_v51 = vld [vmem:[#allocation3 + $0x1a0] sm:$0xff] }
 0x5e3   : > { %13349 = vmatprep.mubr.msk.f32.mxu1 %vm597_vm4, %v17270_v25  ;;  %v8247_v25 = vld [vmem:[#allocation3 + $0x31] sm:$0xff] }
 0x5e6   : > { %13350 = vmatmul.mubr.msk.f32.gmra.mrb[102].mxu1 %vm597_vm4, %v17274_v42  ;;  %v8249_v42 = vld [vmem:[#allocation3 + $0x49] sm:$0xff] }
 0x5e7   : > { %13352 = vmatprep.mubr.msk.f32.mxu1 %vm597_vm4, %v17278_v18  ;;  %v11625_v18 = vld [vmem:[%s18379_s13 + $0x10] sm:$0xff] }
 0x5e8   : > { %13561 = vmatprep.subr.mxu0 %v11625_v18 }
 0x5e9   : > { %13562 = vmatpush3.msra.mxu0 %v11625_v18 }
 0x5ea   : > { %13353 = vmatmul.mubr.msk.f32.gmra.mrb[104].mxu1 %vm597_vm4, %v17282_v49  ;;  %v8248_v49 = vld [vmem:[#allocation3 + $0x39] sm:$0xff] }
 0x5eb   : > { %13355 = vmatprep.mubr.msk.f32.mxu1 %vm597_vm4, %v17483_v20 }
 0x5ee   : > { %13356 = vmatmul.mubr.msk.f32.gmra.mrb[106].mxu1 %vm597_vm4, %v17487_v32 }
 0x5ef   : > { %13358 = vmatprep.mubr.msk.f32.mxu1 %vm597_vm4, %v7887_v50 }
 0x5f2   : > { %13359 = vmatmul.mubr.msk.f32.gmra.mrb[108].mxu1 %vm597_vm4, %v7888_v51 }
 0x5f3   : > { %13363 = vmatprep.mubr.msk.f32.mxu1 %vm597_vm4, %v8247_v25 }
 0x5f6   : > { %13364 = vmatmul.mubr.msk.f32.vlgmr.msra.gmra.mrb[78].mxu1 %vm597_vm4, %v8248_v49 }
 0x5f7   : > { %13412 = vmatpush3.msk.msra.mxu1 %vm5743_vm7, %v11492_v52  ;;  %13366 = vmatprep.mubr.msk.f32.mxu1 %vm597_vm4, %v8249_v42 }
 0x5fa   : > { %13367 = vmatmul.mubr.msk.f32.gmra.mrb[80].mxu1 %vm597_vm4, %v8250_v30 }
 0x5fb   : > { %13369 = vmatprep.mubr.msk.f32.mxu1 %vm597_vm4, %v8251_v4 }
 0x5fe   : > { %13370 = vmatmul.mubr.msk.f32.gmra.mrb[82].mxu1 %vm597_vm4, %v8252_v54 }
 0x5ff   : > { %13372 = vmatprep.mubr.msk.f32.mxu1 %vm597_vm4, %v8253_v36 }
 0x602   : > { %13373 = vmatmul.mubr.msk.f32.gmra.mrb[84].mxu1 %vm597_vm4, %v8254_v1 }
 0x603   : > { %13375 = vmatprep.mubr.msk.f32.mxu1 %vm597_vm4, %v17032_v43  ;;  %v18851_v43 = vld [vmem:[#allocation74_spill] sm:$0xff] }
 0x606   : > { %13376 = vmatmul.mubr.msk.f32.gmra.mrb[86].mxu1 %vm597_vm4, %v17039_v34  ;;  %v18852_v34 = vld [vmem:[#allocation75_spill] sm:$0xff] }
 0x607   : > { %13378 = vmatprep.mubr.msk.f32.mxu1 %vm597_vm4, %v17051_v57  ;;  %v18853_v57 = vld [vmem:[#allocation76_spill] sm:$0xff] }
 0x60a   : > { %13379 = vmatmul.mubr.msk.f32.gmra.mrb[88].mxu1 %vm597_vm4, %v17058_v28  ;;  %v18854_v28 = vld [vmem:[#allocation87_spill] sm:$0xff] }
 0x60b   : > { %13381 = vmatprep.mubr.msk.f32.mxu1 %vm597_vm4, %v17066_v63  ;;  %v18855_v63 = vld [vmem:[#allocation89_spill] sm:$0xff] }
 0x60e   : > { %13382 = vmatmul.mubr.msk.f32.gmra.mrb[90].mxu1 %vm597_vm4, %v17070_v23  ;;  %v18856_v23 = vld [vmem:[#allocation90_spill] sm:$0xff] }
 0x60f   : > { %13384 = vmatprep.mubr.msk.f32.mxu1 %vm597_vm4, %v17077_v60  ;;  %v18857_v60 = vld [vmem:[#allocation91_spill] sm:$0xff] }
 0x612   : > { %13385 = vmatmul.mubr.msk.f32.gmra.mrb[92].mxu1 %vm597_vm4, %v17082_v53  ;;  %v18858_v53 = vld [vmem:[#allocation93_spill] sm:$0xff] }
 0x613   : > { %13387 = vmatprep.mubr.msk.f32.mxu1 %vm597_vm4, %v17090_v26  ;;  %v18859_v26 = vld [vmem:[#allocation95_spill] sm:$0xff] }
 0x616   : > { %13388 = vmatmul.mubr.msk.f32.gmra.mrb[94].mxu1 %vm597_vm4, %v17095_v14  ;;  %v18860_v14 = vld [vmem:[#allocation77_spill] sm:$0xff] }
 0x617   : > { %13390 = vmatprep.mubr.msk.f32.mxu1 %vm597_vm4, %v17104_v10  ;;  %v18861_v10 = vld [vmem:[#allocation78_spill] sm:$0xff] }
 0x61a   : > { %13391 = vmatmul.mubr.msk.f32.gmra.mrb[96].mxu1 %vm597_vm4, %v17108_v2  ;;  %v18862_v2 = vld [vmem:[#allocation79_spill] sm:$0xff] }
 0x61b   : > { %13393 = vmatprep.mubr.msk.f32.mxu1 %vm597_vm4, %v17115_v38  ;;  %v18863_v38 = vld [vmem:[#allocation80_spill] sm:$0xff] }
 0x61e   : > { %13394 = vmatmul.mubr.msk.f32.gmra.mrb[98].mxu1 %vm597_vm4, %v17119_v22  ;;  %v18864_v22 = vld [vmem:[#allocation82_spill] sm:$0xff] }
 0x61f   : > { %13396 = vmatprep.mubr.msk.f32.mxu1 %vm597_vm4, %v17125_v41  ;;  %v18865_v41 = vld [vmem:[#allocation86_spill] sm:$0xff] }
 0x622   : > { %13397 = vmatmul.mubr.msk.f32.gmra.mrb[100].mxu1 %vm597_vm4, %v17131_v16  ;;  %v18866_v16 = vld [vmem:[#allocation92_spill] sm:$0xff] }
 0x623   : > { %13399 = vmatprep.mubr.msk.f32.mxu1 %vm597_vm4, %v17136_v19  ;;  %v18867_v19 = vld [vmem:[#allocation96_spill] sm:$0xff] }
 0x626   : > { %13400 = vmatmul.mubr.msk.f32.gmra.mrb[102].mxu1 %vm597_vm4, %v17142_v17  ;;  %v8667_v17 = vld [vmem:[#allocation3 + $0x19a] sm:$0xff] }
 0x627   : > { %13402 = vmatprep.mubr.msk.f32.mxu1 %vm597_vm4, %v18819_v21 }
 0x62a   : > { %13403 = vmatmul.mubr.msk.f32.gmra.mrb[104].mxu1 %vm597_vm4, %v18820_v45 }
 0x62b   : > { %13405 = vmatprep.mubr.msk.f32.mxu1 %vm597_vm4, %v17556_v13 }
 0x62e   : > { %13406 = vmatmul.mubr.msk.f32.gmra.mrb[106].mxu1 %vm597_vm4, %v18848_v37 }
 0x62f   : > { %13408 = vmatprep.mubr.msk.f32.mxu1 %vm597_vm4, %v8277_v6 }
 0x632   : > { %13409 = vmatmul.mubr.msk.f32.gmra.mrb[108].mxu1 %vm597_vm4, %v8278_v33 }
 0x633   : > { %13413 = vmatprep.mubr.msk.f32.mxu1 %vm597_vm4, %v18849_v12 }
 0x636   : > { %13414 = vmatmul.mubr.msk.f32.vlgmr.msra.gmra.mrb[78].mxu1 %vm597_vm4, %v18850_v5 }
 0x637   : > { %13416 = vmatprep.mubr.msk.f32.mxu1 %vm597_vm4, %v18851_v43 }
 0x63a   : > { %13417 = vmatmul.mubr.msk.f32.gmra.mrb[80].mxu1 %vm597_vm4, %v18852_v34 }
 0x63b   : > { %13419 = vmatprep.mubr.msk.f32.mxu1 %vm597_vm4, %v18853_v57 }
 0x63e   : > { %13420 = vmatmul.mubr.msk.f32.gmra.mrb[82].mxu1 %vm597_vm4, %v18854_v28 }
 0x63f   : > { %13422 = vmatprep.mubr.msk.f32.mxu1 %vm597_vm4, %v18855_v63 }
 0x642   : > { %13423 = vmatmul.mubr.msk.f32.gmra.mrb[84].mxu1 %vm597_vm4, %v18856_v23 }
 0x643   : > { %13425 = vmatprep.mubr.msk.f32.mxu1 %vm597_vm4, %v18857_v60 }
 0x646   : > { %13426 = vmatmul.mubr.msk.f32.gmra.mrb[86].mxu1 %vm597_vm4, %v18858_v53 }
 0x647   : > { %13428 = vmatprep.mubr.msk.f32.mxu1 %vm597_vm4, %v18859_v26 }
 0x64a   : > { %13429 = vmatmul.mubr.msk.f32.gmra.mrb[88].mxu1 %vm597_vm4, %v18860_v14 }
 0x64b   : > { %13431 = vmatprep.mubr.msk.f32.mxu1 %vm597_vm4, %v18861_v10 }
 0x64e   : > { %13432 = vmatmul.mubr.msk.f32.gmra.mrb[90].mxu1 %vm597_vm4, %v18862_v2 }
 0x64f   : > { %13434 = vmatprep.mubr.msk.f32.mxu1 %vm597_vm4, %v18863_v38 }
 0x652   : > { %13435 = vmatmul.mubr.msk.f32.gmra.mrb[92].mxu1 %vm597_vm4, %v18839_v31 }
 0x653   : > { %13437 = vmatprep.mubr.msk.f32.mxu1 %vm597_vm4, %v18864_v22 }
 0x656   : > { %13438 = vmatmul.mubr.msk.f32.gmra.mrb[94].mxu1 %vm597_vm4, %v18841_v15 }
 0x657   : > { %13440 = vmatprep.mubr.msk.f32.mxu1 %vm597_vm4, %v18842_v3 }
 0x65a   : > { %13441 = vmatmul.mubr.msk.f32.gmra.mrb[96].mxu1 %vm597_vm4, %v18843_v48 }
 0x65b   : > { %13443 = vmatprep.mubr.msk.f32.mxu1 %vm597_vm4, %v18865_v41 }
 0x65e   : > { %13444 = vmatmul.mubr.msk.f32.gmra.mrb[98].mxu1 %vm597_vm4, %v18845_v62 }
 0x65f   : > { %13446 = vmatprep.mubr.msk.f32.mxu1 %vm597_vm4, %v18866_v16 }
 0x662   : > { %13447 = vmatmul.mubr.msk.f32.gmra.mrb[100].mxu1 %vm597_vm4, %v17397_v39  ;;  %v8668_v39 = vld [vmem:[#allocation3 + $0x1a2] sm:$0xff] }
 0x663   : > { %13449 = vmatprep.mubr.msk.f32.mxu1 %vm597_vm4, %v18847_v58 }
 0x666   : > { %13450 = vmatmul.mubr.msk.f32.gmra.mrb[102].mxu1 %vm597_vm4, %v17405_v61  ;;  %v17827_v61 = vld [vmem:[%s18377_s11] ss:$0 sm:$0xff] }
 0x667   : > { %13452 = vmatprep.mubr.msk.f32.mxu1 %vm597_vm4, %v18867_v19 }
 0x66a   : > { %13453 = vmatmul.mubr.msk.f32.gmra.mrb[104].mxu1 %vm597_vm4, %v17413_v29 }
 0x66b   : > { %13455 = vmatprep.mubr.msk.f32.mxu1 %vm597_vm4, %v17629_v47 }
 0x66e   : > { %13456 = vmatmul.mubr.msk.f32.gmra.mrb[106].mxu1 %vm597_vm4, %v17633_v24 }
 0x66f   : > { %13458 = vmatprep.mubr.msk.f32.mxu1 %vm597_vm4, %v8667_v17 }
 0x672   : > { %13459 = vmatmul.mubr.msk.f32.gmra.mrb[108].mxu1 %vm597_vm4, %v8668_v39 }
 0x709   : > { %v13415_v35 = vpop.f32.mrb[78].mxu1 }
 0x70a   : > { %v9035_v27 = vmul.f32 %v13415_v35, %v17827_v61  ;;  %v8836_v56 = vpop.f32.mrb[79].mxu1 }
 0x70b   : > { %v9034_v8 = vmul.f32 %v17827_v61, %v8836_v56 }
 0x70c   : > { %v17837_v9 = vadd.f32 %v17832_v55, %v9035_v27 }
 0x70d   : > { %v17840_v59 = vadd.f32 %v17832_v55, %v9034_v8  ;;  %v13418_v46 = vpop.f32.mrb[80].mxu1 }
 0x70e   : > { %v11529_v7 = vmul.f32 -1.442695, %v17837_v9  ;;  %v9037_v44 = vmul.f32 %v13418_v46, %v17827_v61  ;;  %v8846_v40 = vpop.f32.mrb[81].mxu1 }
 0x70f   : > { %v11528_v0 = vmul.f32 -1.442695, %v17840_v59  ;;  %v9036_v52 = vmul.f32 %v17827_v61, %v8846_v40 }
 0x710   : > { %14590 = vpow2.f32 %v11529_v7  ;;  %v17847_v29 = vadd.f32 %v17832_v55, %v9037_v44 }
 0x711   : > { %14592 = vpow2.f32 %v11528_v0  ;;  %v17850_v20 = vadd.f32 %v17832_v55, %v9036_v52  ;;  %v13421_v32 = vpop.f32.mrb[82].mxu1 }
 0x712   : > { %v11531_v21 = vmul.f32 -1.442695, %v17847_v29  ;;  %v9039_v45 = vmul.f32 %v13421_v32, %v17827_v61  ;;  %v8856_v13 = vpop.f32.mrb[83].mxu1 }
 0x713   : > { %v11530_v58 = vmul.f32 -1.442695, %v17850_v20  ;;  %v9038_v11 = vmul.f32 %v17827_v61, %v8856_v13 }
 0x714   : > { %14594 = vpow2.f32 %v11531_v21  ;;  %v17857_v31 = vadd.f32 %v17832_v55, %v9039_v45 }
 0x715   : > { %14596 = vpow2.f32 %v11530_v58  ;;  %v17860_v15 = vadd.f32 %v17832_v55, %v9038_v11  ;;  %v13424_v3 = vpop.f32.mrb[84].mxu1 }
 0x716   : > { %v11533_v48 = vmul.f32 -1.442695, %v17857_v31  ;;  %v9041_v47 = vmul.f32 %v13424_v3, %v17827_v61  ;;  %v8866_v62 = vpop.f32.mrb[85].mxu1 }
 0x717   : > { %v11532_v24 = vmul.f32 -1.442695, %v17860_v15  ;;  %v9040_v50 = vmul.f32 %v17827_v61, %v8866_v62 }
 0x718   : > { %14598 = vpow2.f32 %v11533_v48  ;;  %v17867_v51 = vadd.f32 %v17832_v55, %v9041_v47 }
 0x719   : > { %14600 = vpow2.f32 %v11532_v24  ;;  %v17870_v25 = vadd.f32 %v17832_v55, %v9040_v50  ;;  %v13427_v18 = vpop.f32.mrb[86].mxu1 }
 0x71a   : > { %v14591_v49 = vpop.eup %14590  ;;  %v11535_v42 = vmul.f32 -1.442695, %v17867_v51  ;;  %v9043_v30 = vmul.f32 %v13427_v18, %v17827_v61  ;;  %v8876_v4 = vpop.f32.mrb[87].mxu1 }
 0x71b   : > { %v14593_v54 = vpop.eup %14592  ;;  %v9202_v36 = vadd.f32 1.0, %v14591_v49  ;;  %v11534_v1 = vmul.f32 -1.442695, %v17870_v25  ;;  %v9042_v6 = vmul.f32 %v17827_v61, %v8876_v4 }
 0x71c   : > { %v9201_v37 = vadd.f32 1.0, %v14593_v54  ;;  %14602 = vpow2.f32 %v11535_v42  ;;  %v17877_v33 = vadd.f32 %v17832_v55, %v9043_v30 }
 0x71d   : > { %14604 = vrcp.f32 %v9202_v36  ;;  %v17880_v12 = vadd.f32 %v17832_v55, %v9042_v6  ;;  %v13430_v5 = vpop.f32.mrb[88].mxu1 }
 0x71e   : > { %v14595_v43 = vpop.eup %14594  ;;  %14606 = vrcp.f32 %v9201_v37  ;;  %v11537_v34 = vmul.f32 -1.442695, %v17877_v33  ;;  %v9045_v57 = vmul.f32 %v13430_v5, %v17827_v61  ;;  %v8886_v28 = vpop.f32.mrb[89].mxu1 }
 0x71f   : > { %v14597_v63 = vpop.eup %14596  ;;  %v9204_v23 = vadd.f32 1.0, %v14595_v43  ;;  %14608 = vpow2.f32 %v11534_v1  ;;  %v11536_v60 = vmul.f32 -1.442695, %v17880_v12  ;;  %v9044_v53 = vmul.f32 %v17827_v61, %v8886_v28  ;;  %v18869_v1 = vld [vmem:[#allocation36_spill] sm:$0xff] }
 0x720   : > { %v9203_v26 = vadd.f32 1.0, %v14597_v63  ;;  %14610 = vpow2.f32 %v11537_v34  ;;  %v17887_v14 = vadd.f32 %v17832_v55, %v9045_v57 }
 0x721   : > { %14612 = vrcp.f32 %v9204_v23  ;;  %v17890_v10 = vadd.f32 %v17832_v55, %v9044_v53  ;;  %v13433_v2 = vpop.f32.mrb[90].mxu1  ;;  %v18870_v23 = vld [vmem:[#allocation38_spill] sm:$0xff] }
 0x722   : > { %v14599_v38 = vpop.eup %14598  ;;  %14614 = vrcp.f32 %v9203_v26  ;;  %v11539_v22 = vmul.f32 -1.442695, %v17887_v14  ;;  %v9047_v41 = vmul.f32 %v13433_v2, %v17827_v61  ;;  %v8896_v16 = vpop.f32.mrb[91].mxu1 }
 0x723   : > { %v14601_v19 = vpop.eup %14600  ;;  %v9206_v17 = vadd.f32 1.0, %v14599_v38  ;;  %14616 = vpow2.f32 %v11536_v60  ;;  %v11538_v39 = vmul.f32 -1.442695, %v17890_v10  ;;  %v9046_v35 = vmul.f32 %v17827_v61, %v8896_v16 }
 0x724   : > { %v9205_v27 = vadd.f32 1.0, %v14601_v19  ;;  %14618 = vpow2.f32 %v11539_v22  ;;  %v17897_v56 = vadd.f32 %v17832_v55, %v9047_v41 }
 0x725   : > { %14620 = vrcp.f32 %v9206_v17  ;;  %v17900_v8 = vadd.f32 %v17832_v55, %v9046_v35  ;;  %v13436_v46 = vpop.f32.mrb[92].mxu1 }
 0x726   : > { %v14603_v7 = vpop.eup %14602  ;;  %14622 = vrcp.f32 %v9205_v27  ;;  %v11541_v44 = vmul.f32 -1.442695, %v17897_v56  ;;  %v9049_v40 = vmul.f32 %v13436_v46, %v17827_v61  ;;  %v8906_v0 = vpop.f32.mrb[93].mxu1 }
 0x727   : > { %v14605_v52 = vpop.eup %14604  ;;  %v9208_v32 = vadd.f32 1.0, %v14603_v7  ;;  %14624 = vpow2.f32 %v11538_v39  ;;  %v11540_v21 = vmul.f32 -1.442695, %v17900_v8  ;;  %v9048_v45 = vmul.f32 %v17827_v61, %v8906_v0 }
 0x728   : > { %v14607_v13 = vpop.eup %14606  ;;  %v9298_v58 = vmul.f32 %v14605_v52, %v17837_v9  ;;  %14626 = vpow2.f32 %v11541_v44  ;;  %v17908_v11 = vadd.f32 %v17832_v55, %v9049_v40  ;;  %v18868_v9 = vld [vmem:[#allocation37_spill] sm:$0xff] }
 0x729   : > { %v14609_v3 = vpop.eup %14608  ;;  %v9297_v48 = vmul.f32 %v14607_v13, %v17840_v59  ;;  %14628 = vrcp.f32 %v9208_v32  ;;  %v17912_v47 = vadd.f32 %v17832_v55, %v9048_v45  ;;  %v13439_v62 = vpop.f32.mrb[94].mxu1  ;;  %v18872_v32 = vld [vmem:[#allocation41_spill] sm:$0xff] }
 0x72a   : > { %v14611_v24 = vpop.eup %14610  ;;  %v9207_v50 = vadd.f32 1.0, %v14609_v3  ;;  %14630 = vpow2.f32 %v11540_v21  ;;  %v11543_v18 = vmul.f32 -1.442695, %v17908_v11  ;;  %v8916_v49 = vpop.f32.mrb[95].mxu1  ;;  %v9051_v36 = vmul.f32 %v13439_v62, %v17827_v61 }
 0x72b   : > { %v14613_v42 = vpop.eup %14612  ;;  %v9329_v30 = vadd.f32 %v9297_v48, %v18868_v9  ;;  %v9210_v4 = vadd.f32 1.0, %v14611_v24  ;;  %v11542_v54 = vmul.f32 -1.442695, %v17912_v47  ;;  %v9330_v6 = vadd.f32 %v9298_v58, %v18869_v1  ;;  %v18873_v58 = vld [vmem:[#allocation40_spill] sm:$0xff] }
 0x72c   : > { %v14615_v59 = vpop.eup %14614  ;;  %v9300_v37 = vmul.f32 %v14613_v42, %v17847_v29  ;;  %14632 = vrcp.f32 %v9207_v50  ;;  %v9050_v5 = vmul.f32 %v17827_v61, %v8916_v49  ;;  %v17923_v57 = vadd.f32 %v17832_v55, %v9051_v36 }
 0x72d   : > { %v14617_v43 = vpop.eup %14616  ;;  %v9299_v34 = vmul.f32 %v14615_v59, %v17850_v20  ;;  %14634 = vrcp.f32 %v9210_v4  ;;  %v13442_v28 = vpop.f32.mrb[96].mxu1  ;;  %13563 = vmatprep.mubr.msk.f32.mxu0 %vm554_vm1, %v9329_v30  ;;  %v18871_v20 = vld [vmem:[#allocation39_spill] sm:$0xff] }
 0x72e   : > { %v14619_v63 = vpop.eup %14618  ;;  %v9332_v60 = vadd.f32 %v9300_v37, %v18870_v23  ;;  %v9209_v53 = vadd.f32 1.0, %v14617_v43  ;;  %14636 = vpow2.f32 %v11543_v18  ;;  %v17928_v29 = vadd.f32 %v17832_v55, %v9050_v5  ;;  %v8926_v26 = vpop.f32.mrb[97].mxu1  ;;  %13564 = vmatmul.mubr.msk.f32.vlgmr.msra.gmra.mrb[32].mxu0 %vm554_vm1, %v9330_v6 }
 0x72f   : > { %v14621_v2 = vpop.eup %14620  ;;  %v9331_v38 = vadd.f32 %v9299_v34, %v18871_v20  ;;  %v9212_v22 = vadd.f32 1.0, %v14619_v63  ;;  %14638 = vpow2.f32 %v11542_v54  ;;  %v11545_v41 = vmul.f32 -1.442695, %v17923_v57 }
 0x730   : > { %v14623_v16 = vpop.eup %14622  ;;  %v9302_v19 = vmul.f32 %v14621_v2, %v17857_v31  ;;  %14640 = vrcp.f32 %v9209_v53  ;;  %v11544_v17 = vmul.f32 -1.442695, %v17928_v29  ;;  %v9053_v39 = vmul.f32 %v13442_v28, %v17827_v61  ;;  %v18874_v28 = vld [vmem:[#allocation43_spill] sm:$0xff]  ;;  %v18875_v2 = vld [vmem:[#allocation42_spill] sm:$0xff] }
 0x731   : > { %v14625_v35 = vpop.eup %14624  ;;  %v9301_v27 = vmul.f32 %v14623_v16, %v17860_v15  ;;  %14642 = vrcp.f32 %v9212_v22  ;;  %v9052_v46 = vmul.f32 %v17827_v61, %v8926_v26  ;;  %v13445_v7 = vpop.f32.mrb[98].mxu1  ;;  %13566 = vmatprep.mubr.msk.f32.mxu0 %vm554_vm1, %v9331_v38 }
 0x732   : > { %v14627_v44 = vpop.eup %14626  ;;  %v9211_v40 = vadd.f32 1.0, %v14625_v35  ;;  %14644 = vpow2.f32 %v11545_v41  ;;  %v17940_v0 = vadd.f32 %v17832_v55, %v9053_v39  ;;  %v8936_v31 = vpop.f32.mrb[99].mxu1  ;;  %13567 = vmatmul.mubr.msk.f32.gmra.mrb[34].mxu0 %vm554_vm1, %v9332_v60  ;;  %v9334_v3 = vadd.f32 %v9302_v19, %v18873_v58  ;;  %v18876_v39 = vld [vmem:[#allocation44_spill] sm:$0xff] }
 0x733   : > { %v14629_v52 = vpop.eup %14628  ;;  %v9333_v21 = vadd.f32 %v9301_v27, %v18872_v32  ;;  %v9214_v45 = vadd.f32 1.0, %v14627_v44  ;;  %14646 = vpow2.f32 %v11544_v17  ;;  %v17945_v15 = vadd.f32 %v17832_v55, %v9052_v46  ;;  %v18877_v44 = vld [vmem:[#allocation45_spill] sm:$0xff] }
 0x734   : > { %v14631_v13 = vpop.eup %14630  ;;  %14648 = vrcp.f32 %v9211_v40  ;;  %v11547_v48 = vmul.f32 -1.442695, %v17940_v0  ;;  %v9055_v62 = vmul.f32 %v13445_v7, %v17827_v61  ;;  %v9054_v18 = vmul.f32 %v17827_v61, %v8936_v31 }
 0x735   : > { %14650 = vrcp.f32 %v9214_v45  ;;  %v9213_v24 = vadd.f32 1.0, %v14631_v13  ;;  %v11546_v50 = vmul.f32 -1.442695, %v17945_v15  ;;  %v13448_v49 = vpop.f32.mrb[100].mxu1  ;;  %13569 = vmatprep.mubr.msk.f32.mxu0 %vm554_vm1, %v9333_v21  ;;  %v9304_v9 = vmul.f32 %v14629_v52, %v17867_v51 }
 0x736   : > { %v14633_v42 = vpop.eup %14632  ;;  %14652 = vpow2.f32 %v11547_v48  ;;  %v17955_v30 = vadd.f32 %v17832_v55, %v9055_v62  ;;  %v9057_v4 = vmul.f32 %v13448_v49, %v17827_v61  ;;  %v8946_v54 = vpop.f32.mrb[101].mxu1  ;;  %13570 = vmatmul.mubr.msk.f32.gmra.mrb[36].mxu0 %vm554_vm1, %v9334_v3  ;;  %v17961_v1 = vadd.f32 %v17832_v55, %v9054_v18 }
 0x737   : > { %v14635_v36 = vpop.eup %14634  ;;  %v9303_v59 = vmul.f32 %v14633_v42, %v17870_v25  ;;  %14654 = vrcp.f32 %v9213_v24  ;;  %v9056_v6 = vmul.f32 %v17827_v61, %v8946_v54  ;;  %v9336_v20 = vadd.f32 %v9304_v9, %v18875_v2  ;;  %v18878_v9 = vld [vmem:[#allocation47_spill] sm:$0xff] }
 0x738   : > { %v14637_v37 = vpop.eup %14636  ;;  %v9306_v51 = vmul.f32 %v14635_v36, %v17877_v33  ;;  %14656 = vpow2.f32 %v11546_v50  ;;  %v11549_v5 = vmul.f32 -1.442695, %v17955_v30  ;;  %v17967_v43 = vadd.f32 %v17832_v55, %v9057_v4 }
 0x739   : > { %v14639_v34 = vpop.eup %14638  ;;  %v9335_v63 = vadd.f32 %v9303_v59, %v18874_v28  ;;  %v9216_v23 = vadd.f32 1.0, %v14637_v37  ;;  %v11548_v25 = vmul.f32 -1.442695, %v17961_v1  ;;  %v17972_v60 = vadd.f32 %v17832_v55, %v9056_v6  ;;  %v13451_v53 = vpop.f32.mrb[102].mxu1  ;;  %v18879_v6 = vld [vmem:[#allocation46_spill] sm:$0xff] }
 0x73a   : > { %v14641_v26 = vpop.eup %14640  ;;  %v9215_v33 = vadd.f32 1.0, %v14639_v34  ;;  %14658 = vpow2.f32 %v11549_v5  ;;  %v11551_v38 = vmul.f32 -1.442695, %v17967_v43  ;;  %v8956_v22 = vpop.f32.mrb[103].mxu1  ;;  %v9059_v19 = vmul.f32 %v13451_v53, %v17827_v61 }
 0x73b   : > { %v14643_v41 = vpop.eup %14642  ;;  %v9305_v16 = vmul.f32 %v14641_v26, %v17880_v12  ;;  %14660 = vrcp.f32 %v9216_v23  ;;  %13572 = vmatprep.mubr.msk.f32.mxu0 %vm554_vm1, %v9335_v63  ;;  %v9338_v35 = vadd.f32 %v9306_v51, %v18876_v39  ;;  %v11550_v27 = vmul.f32 -1.442695, %v17972_v60 }
 0x73c   : > { %v14645_v17 = vpop.eup %14644  ;;  %14662 = vrcp.f32 %v9215_v33  ;;  %v9058_v46 = vmul.f32 %v17827_v61, %v8956_v22  ;;  %13573 = vmatmul.mubr.msk.f32.gmra.mrb[38].mxu0 %vm554_vm1, %v9336_v20  ;;  %v17985_v12 = vadd.f32 %v17832_v55, %v9059_v19  ;;  %v9308_v21 = vmul.f32 %v14643_v41, %v17887_v14  ;;  %v18881_v20 = vld [vmem:[#allocation48_spill] sm:$0xff] }
 0x73d   : > { %v14647_v7 = vpop.eup %14646  ;;  %v9337_v40 = vadd.f32 %v9305_v16, %v18877_v44  ;;  %v9218_v31 = vadd.f32 1.0, %v14645_v17  ;;  %14664 = vpow2.f32 %v11548_v25  ;;  %v13454_v52 = vpop.f32.mrb[104].mxu1  ;;  %v18880_v25 = vld [vmem:[#allocation49_spill] sm:$0xff] }
 0x73e   : > { %v14649_v32 = vpop.eup %14648  ;;  %v9217_v45 = vadd.f32 1.0, %v14647_v7  ;;  %14666 = vpow2.f32 %v11551_v38  ;;  %v17989_v13 = vadd.f32 %v17832_v55, %v9058_v46  ;;  %v8966_v58 = vpop.f32.mrb[105].mxu1  ;;  %v11553_v62 = vmul.f32 -1.442695, %v17985_v12 }
 0x73f   : > { %v14651_v3 = vpop.eup %14650  ;;  %v9307_v48 = vmul.f32 %v14649_v32, %v17890_v10  ;;  %14668 = vrcp.f32 %v9218_v31  ;;  %v9061_v24 = vmul.f32 %v13454_v52, %v17827_v61  ;;  %13575 = vmatprep.mubr.msk.f32.mxu0 %vm554_vm1, %v9337_v40  ;;  %v9060_v49 = vmul.f32 %v17827_v61, %v8966_v58  ;;  %v18882_v32 = vld [vmem:[#allocation51_spill] sm:$0xff] }
 0x740   : > { %v14653_v50 = vpop.eup %14652  ;;  %v9310_v18 = vmul.f32 %v14651_v3, %v17897_v56  ;;  %14670 = vrcp.f32 %v9217_v45  ;;  %v11552_v14 = vmul.f32 -1.442695, %v17989_v13  ;;  %13576 = vmatmul.mubr.msk.f32.gmra.mrb[40].mxu0 %vm554_vm1, %v9338_v35  ;;  %v9340_v37 = vadd.f32 %v9308_v21, %v18879_v6  ;;  %v18883_v3 = vld [vmem:[#allocation50_spill] sm:$0xff] }
 0x741   : > { %v14655_v42 = vpop.eup %14654  ;;  %v9339_v10 = vadd.f32 %v9307_v48, %v18878_v9  ;;  %v9220_v4 = vadd.f32 1.0, %v14653_v50  ;;  %14672 = vpow2.f32 %v11550_v27  ;;  %v18001_v54 = vadd.f32 %v17832_v55, %v9061_v24  ;;  %v13457_v36 = vpop.f32.mrb[106].mxu1  ;;  %v18884_v9 = vld [vmem:[#allocation53_spill] sm:$0xff] }
 0x742   : > { %v14657_v59 = vpop.eup %14656  ;;  %v9309_v56 = vmul.f32 %v14655_v42, %v17900_v8  ;;  %14674 = vpow2.f32 %v11553_v62  ;;  %v18006_v51 = vadd.f32 %v17832_v55, %v9060_v49  ;;  %v8976_v5 = vpop.f32.mrb[107].mxu1  ;;  %v9063_v63 = vmul.f32 %v13457_v36, %v17827_v61  ;;  %v18885_v36 = vld [vmem:[#allocation52_spill] sm:$0xff] }
 0x743   : > { %14676 = vrcp.f32 %v9220_v4  ;;  %v9219_v34 = vadd.f32 1.0, %v14657_v59  ;;  %v11555_v28 = vmul.f32 -1.442695, %v18001_v54  ;;  %13578 = vmatprep.mubr.msk.f32.mxu0 %vm554_vm1, %v9339_v10  ;;  %v9062_v8 = vmul.f32 %v17827_v61, %v8976_v5 }
 0x744   : > { %v14659_v23 = vpop.eup %14658  ;;  %v9341_v53 = vadd.f32 %v9309_v56, %v18880_v25  ;;  %14678 = vpow2.f32 %v11552_v14  ;;  %v11554_v26 = vmul.f32 -1.442695, %v18006_v51  ;;  %13579 = vmatmul.mubr.msk.f32.gmra.mrb[42].mxu0 %vm554_vm1, %v9340_v37  ;;  %v9342_v33 = vadd.f32 %v9310_v18, %v18881_v20 }
 0x745   : > { %v14661_v2 = vpop.eup %14660  ;;  %14680 = vrcp.f32 %v9219_v34  ;;  %v9222_v38 = vadd.f32 1.0, %v14659_v23  ;;  %v18017_v22 = vadd.f32 %v17832_v55, %v9063_v63  ;;  %v13460_v41 = vpop.f32.mrb[108].mxu1  ;;  %v18021_v17 = vadd.f32 %v17832_v55, %v9062_v8  ;;  %v18886_v23 = vld [vmem:[#allocation55_spill] sm:$0xff] }
 0x746   : > { %v14663_v16 = vpop.eup %14662  ;;  %v9312_v19 = vmul.f32 %v14661_v2, %v17908_v11  ;;  %14682 = vpow2.f32 %v11555_v28  ;;  %v9065_v39 = vmul.f32 %v13460_v41, %v17827_v61  ;;  %13581 = vmatprep.mubr.msk.f32.mxu0 %vm554_vm1, %v9341_v53  ;;  %v8986_v35 = vpop.f32.mrb[109].mxu1 }
 0x747   : > { %v14665_v27 = vpop.eup %14664  ;;  %v9311_v46 = vmul.f32 %v14663_v16, %v17912_v47  ;;  %14684 = vrcp.f32 %v9222_v38  ;;  %v11557_v7 = vmul.f32 -1.442695, %v18017_v22  ;;  %v9064_v44 = vmul.f32 %v17827_v61, %v8986_v35 }
 0x748   : > { %v14667_v40 = vpop.eup %14666  ;;  %v9221_v31 = vadd.f32 1.0, %v14665_v27  ;;  %14686 = vpow2.f32 %v11554_v26  ;;  %v11556_v11 = vmul.f32 -1.442695, %v18021_v17  ;;  %13582 = vmatmul.mubr.msk.f32.gmra.mrb[44].mxu0 %vm554_vm1, %v9342_v33  ;;  %v18032_v58 = vadd.f32 %v17832_v55, %v9065_v39  ;;  %v18887_v26 = vld [vmem:[#allocation54_spill] sm:$0xff] }
 0x749   : > { %v14669_v52 = vpop.eup %14668  ;;  %v9343_v21 = vadd.f32 %v9311_v46, %v18882_v32  ;;  %v9224_v45 = vadd.f32 1.0, %v14667_v40  ;;  %14688 = vpow2.f32 %v11557_v7  ;;  %v9344_v48 = vadd.f32 %v9312_v19, %v18883_v3  ;;  %v18888_v19 = vld [vmem:[#allocation57_spill] sm:$0xff]  ;;  %v18889_v46 = vld [vmem:[#allocation56_spill] sm:$0xff] }
 0x74a   : > { %v14671_v47 = vpop.eup %14670  ;;  %v9314_v61 = vmul.f32 %v14669_v52, %v17923_v57  ;;  %14690 = vrcp.f32 %v9221_v31  ;;  %v18037_v62 = vadd.f32 %v17832_v55, %v9064_v44  ;;  %v11559_v18 = vmul.f32 -1.442695, %v18032_v58  ;;  %v18890_v52 = vld [vmem:[#allocation59_spill] sm:$0xff] }
 0x74b   : > { %v14673_v24 = vpop.eup %14672  ;;  %v9313_v50 = vmul.f32 %v14671_v47, %v17928_v29  ;;  %14692 = vrcp.f32 %v9224_v45  ;;  %13584 = vmatprep.mubr.msk.f32.mxu0 %vm554_vm1, %v9343_v21  ;;  %v18891_v45 = vld [vmem:[#allocation58_spill] sm:$0xff] }
 0x74c   : > { %v14675_v14 = vpop.eup %14674  ;;  %v9223_v49 = vadd.f32 1.0, %v14673_v24  ;;  %14694 = vpow2.f32 %v11556_v11  ;;  %v11558_v42 = vmul.f32 -1.442695, %v18037_v62  ;;  %13585 = vmatmul.mubr.msk.f32.gmra.mrb[46].mxu0 %vm554_vm1, %v9344_v48  ;;  %v9346_v29 = vadd.f32 %v9314_v61, %v18885_v36 }
 0x74d   : > { %v14677_v57 = vpop.eup %14676  ;;  %v9345_v10 = vadd.f32 %v9313_v50, %v18884_v9  ;;  %v9226_v55 = vadd.f32 1.0, %v14675_v14  ;;  %14696 = vpow2.f32 %v11559_v18  ;;  %v18893_v50 = vld [vmem:[#allocation60_spill] sm:$0xff]  ;;  %v18895_v9 = vld [vmem:[#allocation62_spill] sm:$0xff] }
 0x74e   : > { %v14679_v4 = vpop.eup %14678  ;;  %14698 = vrcp.f32 %v9223_v49  ;;  %v9316_v6 = vmul.f32 %v14677_v57, %v17940_v0 }
 0x74f   : > { %v14681_v59 = vpop.eup %14680  ;;  %14700 = vrcp.f32 %v9226_v55  ;;  %v9225_v37 = vadd.f32 1.0, %v14679_v4  ;;  %13587 = vmatprep.mubr.msk.f32.mxu0 %vm554_vm1, %v9345_v10 }
 0x750   : > { %v14683_v56 = vpop.eup %14682  ;;  %v9315_v5 = vmul.f32 %v14681_v59, %v17945_v15  ;;  %14702 = vpow2.f32 %v11558_v42  ;;  %13588 = vmatmul.mubr.msk.f32.gmra.mrb[48].mxu0 %vm554_vm1, %v9346_v29  ;;  %v9348_v8 = vadd.f32 %v9316_v6, %v18887_v26  ;;  %v18894_v42 = vld [vmem:[#allocation63_spill] sm:$0xff]  ;;  %v18897_v59 = vld [vmem:[#allocation64_spill] sm:$0xff] }
 0x751   : > { %v14685_v34 = vpop.eup %14684  ;;  %14704 = vrcp.f32 %v9225_v37  ;;  %v9228_v28 = vadd.f32 1.0, %v14683_v56 }
 0x752   : > { %v14687_v63 = vpop.eup %14686  ;;  %v9347_v25 = vadd.f32 %v9315_v5, %v18886_v23  ;;  %v9318_v20 = vmul.f32 %v14685_v34, %v17955_v30  ;;  %v18898_v5 = vld [vmem:[#allocation69_spill] sm:$0xff] }
 0x753   : > { %v14689_v53 = vpop.eup %14688  ;;  %14706 = vrcp.f32 %v9228_v28  ;;  %v9227_v0 = vadd.f32 1.0, %v14687_v63  ;;  %v18093_v28 = vld [vmem:[%s18380_s14] ss:$0 sm:$0xff] }
 0x754   : > { %v14691_v2 = vpop.eup %14690  ;;  %v9230_v33 = vadd.f32 1.0, %v14689_v53  ;;  %13590 = vmatprep.mubr.msk.f32.mxu0 %vm554_vm1, %v9347_v25  ;;  %v9350_v7 = vadd.f32 %v9318_v20, %v18889_v46 }
 0x755   : > { %v14693_v15 = vpop.eup %14692  ;;  %v9317_v38 = vmul.f32 %v14691_v2, %v17961_v1  ;;  %14708 = vrcp.f32 %v9227_v0  ;;  %13591 = vmatmul.mubr.msk.f32.gmra.mrb[50].mxu0 %vm554_vm1, %v9348_v8 }
 0x756   : > { %v14695_v41 = vpop.eup %14694  ;;  %14710 = vrcp.f32 %v9230_v33  ;;  %v9320_v30 = vmul.f32 %v14693_v15, %v17967_v43 }
 0x757   : > { %v14697_v16 = vpop.eup %14696  ;;  %v9349_v39 = vadd.f32 %v9317_v38, %v18888_v19  ;;  %v9229_v35 = vadd.f32 1.0, %v14695_v41 }
 0x758   : > { %v14699_v27 = vpop.eup %14698  ;;  %v9232_v44 = vadd.f32 1.0, %v14697_v16  ;;  %v9352_v47 = vadd.f32 %v9320_v30, %v18891_v45 }
 0x759   : > { %v14701_v40 = vpop.eup %14700  ;;  %v9319_v31 = vmul.f32 %v14699_v27, %v17972_v60  ;;  %14712 = vrcp.f32 %v9229_v35  ;;  %13593 = vmatprep.mubr.msk.f32.mxu0 %vm554_vm1, %v9349_v39  ;;  %v18892_v60 = vld [vmem:[#allocation61_spill] sm:$0xff] }
 0x75a   : > { %v14703_v1 = vpop.eup %14702  ;;  %13594 = vmatmul.mubr.msk.f32.gmra.mrb[52].mxu0 %vm554_vm1, %v9350_v7  ;;  %14714 = vrcp.f32 %v9232_v44  ;;  %v9322_v3 = vmul.f32 %v14701_v40, %v17985_v12 }
 0x75b   : > { %v14705_v11 = vpop.eup %14704  ;;  %v9351_v32 = vadd.f32 %v9319_v31, %v18890_v52  ;;  %v9231_v21 = vadd.f32 1.0, %v14703_v1 }
 0x75c   : > { %v9321_v43 = vmul.f32 %v14705_v11, %v17989_v13  ;;  %v9354_v18 = vadd.f32 %v9322_v3, %v18893_v50 }
 0x75d   : > { %v14707_v48 = vpop.eup %14706  ;;  %14716 = vrcp.f32 %v9231_v21  ;;  %13596 = vmatprep.mubr.msk.f32.mxu0 %vm554_vm1, %v9351_v32 }
 0x75e   : > { %v9353_v61 = vadd.f32 %v9321_v43, %v18892_v60  ;;  %13597 = vmatmul.mubr.msk.f32.gmra.mrb[54].mxu0 %vm554_vm1, %v9352_v47  ;;  %v9324_v14 = vmul.f32 %v14707_v48, %v18001_v54  ;;  %v18896_v54 = vld [vmem:[#allocation65_spill] sm:$0xff] }
 0x75f   : > { %v14709_v24 = vpop.eup %14708 }
 0x760   : > { %v9323_v49 = vmul.f32 %v14709_v24, %v18006_v51  ;;  %13599 = vmatprep.mubr.msk.f32.mxu0 %vm554_vm1, %v9353_v61  ;;  %v14711_v12 = vpop.eup %14710  ;;  %v9356_v10 = vadd.f32 %v9324_v14, %v18895_v9 }
 0x761   : > { %v9326_v55 = vmul.f32 %v14711_v12, %v18017_v22 }
 0x762   : > { %v9355_v13 = vadd.f32 %v9323_v49, %v18894_v42  ;;  %13600 = vmatmul.mubr.msk.f32.gmra.mrb[56].mxu0 %vm554_vm1, %v9354_v18 }
 0x763   : > { %v14713_v57 = vpop.eup %14712  ;;  %v9358_v6 = vadd.f32 %v9326_v55, %v18897_v59 }
 0x764   : > { %v9325_v4 = vmul.f32 %v14713_v57, %v18021_v17  ;;  %13602 = vmatprep.mubr.msk.f32.mxu0 %vm554_vm1, %v9355_v13  ;;  %v14715_v36 = vpop.eup %14714  ;;  %v18899_v17 = vld [vmem:[#allocation68_spill] sm:$0xff] }
 0x765   : > { %v9328_v37 = vmul.f32 %v14715_v36, %v18032_v58 }
 0x766   : > { %v9357_v29 = vadd.f32 %v9325_v4, %v18896_v54  ;;  %13603 = vmatmul.mubr.msk.f32.gmra.mrb[58].mxu0 %vm554_vm1, %v9356_v10 }
 0x767   : > { %v14717_v51 = vpop.eup %14716  ;;  %v9360_v34 = vadd.f32 %v9328_v37, %v18899_v17 }
 0x768   : > { %v9327_v56 = vmul.f32 %v14717_v51, %v18037_v62  ;;  %13605 = vmatprep.mubr.msk.f32.mxu0 %vm554_vm1, %v9357_v29  ;;  %v18098_v62 = vld [vmem:[%s18381_s15] ss:$0 sm:$0xff] }
 0x76a   : > { %v9359_v22 = vadd.f32 %v9327_v56, %v18898_v5  ;;  %13606 = vmatmul.mubr.msk.f32.gmra.mrb[60].mxu0 %vm554_vm1, %v9358_v6 }
 0x76c   : > { %13608 = vmatprep.mubr.msk.f32.mxu0 %vm554_vm1, %v9359_v22 }
 0x76e   : > { %13609 = vmatmul.mubr.msk.f32.gmra.mrb[62].mxu0 %vm554_vm1, %v9360_v34 }
 0x801   : > { %v13565_v58 = vpop.f32.mrb[32].mxu0 }
 0x802   : > { %v10369_v63 = vmul.f32 %v13565_v58, %v18093_v28  ;;  %v10170_v23 = vpop.f32.mrb[33].mxu0 }
 0x803   : > { %v10368_v25 = vmul.f32 %v18093_v28, %v10170_v23 }
 0x804   : > { %v18103_v53 = vadd.f32 %v18098_v62, %v10369_v63 }
 0x805   : > { %v18106_v26 = vadd.f32 %v18098_v62, %v10368_v25  ;;  %v13568_v8 = vpop.f32.mrb[34].mxu0 }
 0x806   : > { %v11661_v0 = vmul.f32 -1.442695, %v18103_v53  ;;  %v10371_v2 = vmul.f32 %v13568_v8, %v18093_v28  ;;  %v10180_v20 = vpop.f32.mrb[35].mxu0 }
 0x807   : > { %v11660_v33 = vmul.f32 -1.442695, %v18106_v26  ;;  %v10370_v15 = vmul.f32 %v18093_v28, %v10180_v20 }
 0x808   : > { %14718 = vpow2.f32 %v11661_v0  ;;  %v18113_v38 = vadd.f32 %v18098_v62, %v10371_v2 }
 0x809   : > { %14720 = vpow2.f32 %v11660_v33  ;;  %v18116_v41 = vadd.f32 %v18098_v62, %v10370_v15  ;;  %v13571_v16 = vpop.f32.mrb[36].mxu0 }
 0x80a   : > { %v11663_v19 = vmul.f32 -1.442695, %v18113_v38  ;;  %v10373_v39 = vmul.f32 %v13571_v16, %v18093_v28  ;;  %v10190_v35 = vpop.f32.mrb[37].mxu0 }
 0x80b   : > { %v11662_v27 = vmul.f32 -1.442695, %v18116_v41  ;;  %v10372_v46 = vmul.f32 %v18093_v28, %v10190_v35 }
 0x80c   : > { %14722 = vpow2.f32 %v11663_v19  ;;  %v18123_v7 = vadd.f32 %v18098_v62, %v10373_v39 }
 0x80d   : > { %14724 = vpow2.f32 %v11662_v27  ;;  %v18126_v30 = vadd.f32 %v18098_v62, %v10372_v46 }
 0x80e   : > { %v11665_v44 = vmul.f32 -1.442695, %v18123_v7 }
 0x80f   : > { %v11664_v40 = vmul.f32 -1.442695, %v18126_v30  ;;  %v13574_v31 = vpop.f32.mrb[38].mxu0 }
 0x810   : > { %14726 = vpow2.f32 %v11665_v44  ;;  %v10375_v1 = vmul.f32 %v13574_v31, %v18093_v28  ;;  %v10200_v11 = vpop.f32.mrb[39].mxu0 }
 0x811   : > { %14728 = vpow2.f32 %v11664_v40  ;;  %v10374_v52 = vmul.f32 %v18093_v28, %v10200_v11 }
 0x812   : > { %v14719_v32 = vpop.eup %14718  ;;  %v18133_v21 = vadd.f32 %v18098_v62, %v10375_v1 }
 0x813   : > { %v14721_v45 = vpop.eup %14720  ;;  %v10536_v47 = vadd.f32 1.0, %v14719_v32  ;;  %v18136_v3 = vadd.f32 %v18098_v62, %v10374_v52  ;;  %v13577_v43 = vpop.f32.mrb[40].mxu0 }
 0x814   : > { %v10535_v48 = vadd.f32 1.0, %v14721_v45  ;;  %v11667_v60 = vmul.f32 -1.442695, %v18133_v21  ;;  %v10377_v61 = vmul.f32 %v13577_v43, %v18093_v28  ;;  %v10210_v24 = vpop.f32.mrb[41].mxu0 }
 0x815   : > { %14730 = vrcp.f32 %v10536_v47  ;;  %v11666_v50 = vmul.f32 -1.442695, %v18136_v3  ;;  %v10376_v18 = vmul.f32 %v18093_v28, %v10210_v24 }
 0x816   : > { %v14723_v14 = vpop.eup %14722  ;;  %14732 = vrcp.f32 %v10535_v48  ;;  %v18143_v49 = vadd.f32 %v18098_v62, %v10377_v61 }
 0x817   : > { %v14725_v12 = vpop.eup %14724  ;;  %v10538_v42 = vadd.f32 1.0, %v14723_v14  ;;  %14734 = vpow2.f32 %v11667_v60  ;;  %v18146_v13 = vadd.f32 %v18098_v62, %v10376_v18  ;;  %v13580_v57 = vpop.f32.mrb[42].mxu0 }
 0x818   : > { %v10537_v9 = vadd.f32 1.0, %v14725_v12  ;;  %14736 = vpow2.f32 %v11666_v50  ;;  %v11669_v10 = vmul.f32 -1.442695, %v18143_v49  ;;  %v10379_v55 = vmul.f32 %v13580_v57, %v18093_v28  ;;  %v10220_v4 = vpop.f32.mrb[43].mxu0 }
 0x819   : > { %14738 = vrcp.f32 %v10538_v42  ;;  %v11668_v36 = vmul.f32 -1.442695, %v18146_v13  ;;  %v10378_v54 = vmul.f32 %v18093_v28, %v10220_v4 }
 0x81a   : > { %v14727_v29 = vpop.eup %14726  ;;  %14740 = vrcp.f32 %v10537_v9  ;;  %v18153_v51 = vadd.f32 %v18098_v62, %v10379_v55 }
 0x81b   : > { %v14729_v59 = vpop.eup %14728  ;;  %v10540_v6 = vadd.f32 1.0, %v14727_v29  ;;  %14742 = vpow2.f32 %v11669_v10  ;;  %v18156_v37 = vadd.f32 %v18098_v62, %v10378_v54  ;;  %v13583_v56 = vpop.f32.mrb[44].mxu0 }
 0x81c   : > { %v10539_v5 = vadd.f32 1.0, %v14729_v59  ;;  %14744 = vpow2.f32 %v11668_v36  ;;  %v11671_v22 = vmul.f32 -1.442695, %v18153_v51  ;;  %v10381_v17 = vmul.f32 %v13583_v56, %v18093_v28  ;;  %v10230_v34 = vpop.f32.mrb[45].mxu0 }
 0x81d   : > { %14746 = vrcp.f32 %v10540_v6  ;;  %v11670_v58 = vmul.f32 -1.442695, %v18156_v37  ;;  %v10380_v63 = vmul.f32 %v18093_v28, %v10230_v34 }
 0x81e   : > { %14748 = vrcp.f32 %v10539_v5  ;;  %v18163_v23 = vadd.f32 %v18098_v62, %v10381_v17 }
 0x81f   : > { %v14731_v25 = vpop.eup %14730  ;;  %14750 = vpow2.f32 %v11671_v22  ;;  %v18173_v8 = vadd.f32 %v18098_v62, %v10380_v63  ;;  %v13586_v0 = vpop.f32.mrb[46].mxu0 }
 0x820   : > { %v14733_v2 = vpop.eup %14732  ;;  %v10632_v20 = vmul.f32 %v14731_v25, %v18103_v53  ;;  %14752 = vpow2.f32 %v11670_v58  ;;  %v11673_v33 = vmul.f32 -1.442695, %v18163_v23  ;;  %v10383_v15 = vmul.f32 %v13586_v0, %v18093_v28  ;;  %v10240_v16 = vpop.f32.mrb[47].mxu0 }
 0x821   : > { %v14735_v19 = vpop.eup %14734  ;;  %v10631_v39 = vmul.f32 %v14733_v2, %v18106_v26  ;;  %v11672_v35 = vmul.f32 -1.442695, %v18173_v8  ;;  %v10382_v27 = vmul.f32 %v18093_v28, %v10240_v16 }
 0x822   : > { %v14737_v46 = vpop.eup %14736  ;;  %10664 = vst.msk [vmem:[%s18170_s27 + $0x8] sm:$0xff] %vm642_vm0, %v10632_v20  ;;  %v10542_v44 = vadd.f32 1.0, %v14735_v19  ;;  %14754 = vpow2.f32 %v11673_v33  ;;  %v18184_v53 = vadd.f32 %v18098_v62, %v10383_v15 }
 0x823   : > { %v14739_v40 = vpop.eup %14738  ;;  %10663 = vst.msk [vmem:[%s18170_s27] sm:$0xff] %vm642_vm0, %v10631_v39  ;;  %v10541_v31 = vadd.f32 1.0, %v14737_v46  ;;  %14756 = vpow2.f32 %v11672_v35  ;;  %v18189_v26 = vadd.f32 %v18098_v62, %v10382_v27  ;;  %v13589_v1 = vpop.f32.mrb[48].mxu0 }
 0x824   : > { %v14741_v11 = vpop.eup %14740  ;;  %v10634_v52 = vmul.f32 %v14739_v40, %v18113_v38  ;;  %14758 = vrcp.f32 %v10542_v44  ;;  %v11675_v32 = vmul.f32 -1.442695, %v18184_v53  ;;  %v10385_v45 = vmul.f32 %v13589_v1, %v18093_v28  ;;  %v10250_v47 = vpop.f32.mrb[49].mxu0 }
 0x825   : > { %v14743_v43 = vpop.eup %14742  ;;  %v10633_v48 = vmul.f32 %v14741_v11, %v18116_v41  ;;  %14760 = vrcp.f32 %v10541_v31  ;;  %v11674_v60 = vmul.f32 -1.442695, %v18189_v26  ;;  %v10384_v61 = vmul.f32 %v18093_v28, %v10250_v47 }
 0x826   : > { %v14745_v24 = vpop.eup %14744  ;;  %10666 = vst.msk [vmem:[%s18170_s27 + $0x18] sm:$0xff] %vm642_vm0, %v10634_v52  ;;  %v10544_v50 = vadd.f32 1.0, %v14743_v43  ;;  %14762 = vpow2.f32 %v11675_v32  ;;  %v18200_v38 = vadd.f32 %v18098_v62, %v10385_v45 }
 0x827   : > { %v14747_v18 = vpop.eup %14746  ;;  %10665 = vst.msk [vmem:[%s18170_s27 + $0x10] sm:$0xff] %vm642_vm0, %v10633_v48  ;;  %v10543_v14 = vadd.f32 1.0, %v14745_v24  ;;  %14764 = vpow2.f32 %v11674_v60  ;;  %v18205_v41 = vadd.f32 %v18098_v62, %v10384_v61 }
 0x828   : > { %v14749_v12 = vpop.eup %14748  ;;  %v10636_v42 = vmul.f32 %v14747_v18, %v18123_v7  ;;  %14766 = vrcp.f32 %v10544_v50  ;;  %v11677_v57 = vmul.f32 -1.442695, %v18200_v38  ;;  %v13592_v9 = vpop.f32.mrb[50].mxu0 }
 0x829   : > { %v14751_v10 = vpop.eup %14750  ;;  %v10635_v55 = vmul.f32 %v14749_v12, %v18126_v30  ;;  %14768 = vrcp.f32 %v10543_v14  ;;  %v11676_v4 = vmul.f32 -1.442695, %v18205_v41  ;;  %v10387_v36 = vmul.f32 %v13592_v9, %v18093_v28  ;;  %v10260_v54 = vpop.f32.mrb[51].mxu0 }
 0x82a   : > { %v14753_v29 = vpop.eup %14752  ;;  %10668 = vst.msk [vmem:[%s18170_s27 + $0x28] sm:$0xff] %vm642_vm0, %v10636_v42  ;;  %v10546_v59 = vadd.f32 1.0, %v14751_v10  ;;  %14770 = vpow2.f32 %v11677_v57  ;;  %v10386_v7 = vmul.f32 %v18093_v28, %v10260_v54 }
 0x82b   : > { %10667 = vst.msk [vmem:[%s18170_s27 + $0x20] sm:$0xff] %vm642_vm0, %v10635_v55  ;;  %v10545_v6 = vadd.f32 1.0, %v14753_v29  ;;  %14772 = vpow2.f32 %v11676_v4  ;;  %v18218_v56 = vadd.f32 %v18098_v62, %v10387_v36 }
 0x82c   : > { %v14755_v30 = vpop.eup %14754  ;;  %14774 = vrcp.f32 %v10546_v59  ;;  %v18221_v5 = vadd.f32 %v18098_v62, %v10386_v7 }
 0x82d   : > { %v14757_v22 = vpop.eup %14756  ;;  %14776 = vrcp.f32 %v10545_v6  ;;  %v10548_v17 = vadd.f32 1.0, %v14755_v30  ;;  %v11679_v34 = vmul.f32 -1.442695, %v18218_v56  ;;  %v13595_v58 = vpop.f32.mrb[52].mxu0 }
 0x82e   : > { %v14759_v63 = vpop.eup %14758  ;;  %v10547_v25 = vadd.f32 1.0, %v14757_v22  ;;  %v11678_v0 = vmul.f32 -1.442695, %v18221_v5  ;;  %v10389_v2 = vmul.f32 %v13595_v58, %v18093_v28  ;;  %v10270_v20 = vpop.f32.mrb[53].mxu0 }
 0x82f   : > { %v14761_v33 = vpop.eup %14760  ;;  %v10638_v15 = vmul.f32 %v14759_v63, %v18133_v21  ;;  %14778 = vrcp.f32 %v10548_v17  ;;  %v10388_v16 = vmul.f32 %v18093_v28, %v10270_v20 }
 0x830   : > { %v14763_v19 = vpop.eup %14762  ;;  %v10637_v39 = vmul.f32 %v14761_v33, %v18136_v3  ;;  %14780 = vrcp.f32 %v10547_v25  ;;  %v18230_v35 = vadd.f32 %v18098_v62, %v10389_v2 }
 0x831   : > { %v14765_v27 = vpop.eup %14764  ;;  %10670 = vst.msk [vmem:[%s18170_s27 + $0x38] sm:$0xff] %vm642_vm0, %v10638_v15  ;;  %v10550_v46 = vadd.f32 1.0, %v14763_v19  ;;  %14782 = vpow2.f32 %v11679_v34  ;;  %v18235_v44 = vadd.f32 %v18098_v62, %v10388_v16  ;;  %v13598_v40 = vpop.f32.mrb[54].mxu0 }
 0x832   : > { %v14767_v21 = vpop.eup %14766  ;;  %10669 = vst.msk [vmem:[%s18170_s27 + $0x30] sm:$0xff] %vm642_vm0, %v10637_v39  ;;  %v10549_v31 = vadd.f32 1.0, %v14765_v27  ;;  %14784 = vpow2.f32 %v11678_v0  ;;  %v11681_v3 = vmul.f32 -1.442695, %v18230_v35  ;;  %v10391_v1 = vmul.f32 %v13598_v40, %v18093_v28  ;;  %v10280_v11 = vpop.f32.mrb[55].mxu0 }
 0x833   : > { %v14769_v52 = vpop.eup %14768  ;;  %v10640_v32 = vmul.f32 %v14767_v21, %v18143_v49  ;;  %14786 = vrcp.f32 %v10550_v46  ;;  %v11680_v45 = vmul.f32 -1.442695, %v18235_v44  ;;  %v10390_v47 = vmul.f32 %v18093_v28, %v10280_v11 }
 0x834   : > { %v14771_v43 = vpop.eup %14770  ;;  %v10639_v48 = vmul.f32 %v14769_v52, %v18146_v13  ;;  %14788 = vrcp.f32 %v10549_v31  ;;  %v18246_v60 = vadd.f32 %v18098_v62, %v10391_v1 }
 0x835   : > { %v14773_v61 = vpop.eup %14772  ;;  %10672 = vst.msk [vmem:[%s18170_s27 + $0x48] sm:$0xff] %vm642_vm0, %v10640_v32  ;;  %v10552_v24 = vadd.f32 1.0, %v14771_v43  ;;  %14790 = vpow2.f32 %v11681_v3  ;;  %v18251_v50 = vadd.f32 %v18098_v62, %v10390_v47  ;;  %v13601_v49 = vpop.f32.mrb[56].mxu0 }
 0x836   : > { %v14775_v18 = vpop.eup %14774  ;;  %10671 = vst.msk [vmem:[%s18170_s27 + $0x40] sm:$0xff] %vm642_vm0, %v10639_v48  ;;  %v10551_v14 = vadd.f32 1.0, %v14773_v61  ;;  %14792 = vpow2.f32 %v11680_v45  ;;  %v11683_v13 = vmul.f32 -1.442695, %v18246_v60  ;;  %v10393_v12 = vmul.f32 %v13601_v49, %v18093_v28  ;;  %v10290_v42 = vpop.f32.mrb[57].mxu0 }
 0x837   : > { %v14777_v57 = vpop.eup %14776  ;;  %v10642_v9 = vmul.f32 %v14775_v18, %v18153_v51  ;;  %14794 = vrcp.f32 %v10552_v24  ;;  %v11682_v10 = vmul.f32 -1.442695, %v18251_v50  ;;  %v10392_v55 = vmul.f32 %v18093_v28, %v10290_v42 }
 0x838   : > { %v10641_v4 = vmul.f32 %v14777_v57, %v18156_v37  ;;  %14796 = vrcp.f32 %v10551_v14  ;;  %v18262_v36 = vadd.f32 %v18098_v62, %v10393_v12 }
 0x839   : > { %v14779_v54 = vpop.eup %14778  ;;  %10674 = vst.msk [vmem:[%s18170_s27 + $0x58] sm:$0xff] %vm642_vm0, %v10642_v9  ;;  %14798 = vpow2.f32 %v11683_v13  ;;  %v18267_v29 = vadd.f32 %v18098_v62, %v10392_v55  ;;  %v13604_v51 = vpop.f32.mrb[58].mxu0 }
 0x83a   : > { %v14781_v59 = vpop.eup %14780  ;;  %10673 = vst.msk [vmem:[%s18170_s27 + $0x50] sm:$0xff] %vm642_vm0, %v10641_v4  ;;  %v10644_v7 = vmul.f32 %v14779_v54, %v18163_v23  ;;  %14800 = vpow2.f32 %v11682_v10  ;;  %v11685_v37 = vmul.f32 -1.442695, %v18262_v36  ;;  %v10395_v6 = vmul.f32 %v13604_v51, %v18093_v28  ;;  %v10300_v30 = vpop.f32.mrb[59].mxu0 }
 0x83b   : > { %v14783_v22 = vpop.eup %14782  ;;  %v10643_v17 = vmul.f32 %v14781_v59, %v18173_v8  ;;  %v11684_v34 = vmul.f32 -1.442695, %v18267_v29  ;;  %v10394_v58 = vmul.f32 %v18093_v28, %v10300_v30 }
 0x83c   : > { %v14785_v63 = vpop.eup %14784  ;;  %10676 = vst.msk [vmem:[%s18170_s27 + $0x68] sm:$0xff] %vm642_vm0, %v10644_v7  ;;  %v10554_v25 = vadd.f32 1.0, %v14783_v22  ;;  %14802 = vpow2.f32 %v11685_v37  ;;  %v18280_v23 = vadd.f32 %v18098_v62, %v10395_v6 }
 0x83d   : > { %v14787_v0 = vpop.eup %14786  ;;  %10675 = vst.msk [vmem:[%s18170_s27 + $0x60] sm:$0xff] %vm642_vm0, %v10643_v17  ;;  %v10553_v2 = vadd.f32 1.0, %v14785_v63  ;;  %14804 = vpow2.f32 %v11684_v34  ;;  %v18285_v8 = vadd.f32 %v18098_v62, %v10394_v58  ;;  %v13607_v20 = vpop.f32.mrb[60].mxu0 }
 0x83e   : > { %v14789_v33 = vpop.eup %14788  ;;  %v10646_v15 = vmul.f32 %v14787_v0, %v18184_v53  ;;  %14806 = vrcp.f32 %v10554_v25  ;;  %v11687_v16 = vmul.f32 -1.442695, %v18280_v23  ;;  %v10397_v19 = vmul.f32 %v13607_v20, %v18093_v28  ;;  %v10310_v39 = vpop.f32.mrb[61].mxu0 }
 0x83f   : > { %v14791_v27 = vpop.eup %14790  ;;  %v10645_v46 = vmul.f32 %v14789_v33, %v18189_v26  ;;  %14808 = vrcp.f32 %v10553_v2  ;;  %v11686_v40 = vmul.f32 -1.442695, %v18285_v8  ;;  %v10396_v21 = vmul.f32 %v18093_v28, %v10310_v39 }
 0x840   : > { %v14793_v31 = vpop.eup %14792  ;;  %10678 = vst.msk [vmem:[%s18170_s27 + $0x78] sm:$0xff] %vm642_vm0, %v10646_v15  ;;  %v10556_v3 = vadd.f32 1.0, %v14791_v27  ;;  %14810 = vpow2.f32 %v11687_v16  ;;  %v18296_v53 = vadd.f32 %v18098_v62, %v10397_v19 }
 0x841   : > { %v14795_v1 = vpop.eup %14794  ;;  %10677 = vst.msk [vmem:[%s18170_s27 + $0x70] sm:$0xff] %vm642_vm0, %v10645_v46  ;;  %v10555_v11 = vadd.f32 1.0, %v14793_v31  ;;  %14812 = vpow2.f32 %v11686_v40  ;;  %v18301_v26 = vadd.f32 %v18098_v62, %v10396_v21  ;;  %v13610_v52 = vpop.f32.mrb[62].mxu0 }
 0x842   : > { %v14797_v32 = vpop.eup %14796  ;;  %v10648_v45 = vmul.f32 %v14795_v1, %v18200_v38  ;;  %14814 = vrcp.f32 %v10556_v3  ;;  %v11689_v47 = vmul.f32 -1.442695, %v18296_v53  ;;  %v10399_v43 = vmul.f32 %v13610_v52, %v18093_v28  ;;  %v10320_v48 = vpop.f32.mrb[63].mxu0 }
 0x843   : > { %v14799_v61 = vpop.eup %14798  ;;  %v10647_v24 = vmul.f32 %v14797_v32, %v18205_v41  ;;  %14816 = vrcp.f32 %v10555_v11  ;;  %v11688_v49 = vmul.f32 -1.442695, %v18301_v26  ;;  %v10398_v18 = vmul.f32 %v18093_v28, %v10320_v48 }
 0x844   : > { %v14801_v14 = vpop.eup %14800  ;;  %10680 = vst.msk [vmem:[%s18170_s27 + $0x88] sm:$0xff] %vm642_vm0, %v10648_v45  ;;  %v10558_v13 = vadd.f32 1.0, %v14799_v61  ;;  %14818 = vpow2.f32 %v11689_v47  ;;  %v18312_v38 = vadd.f32 %v18098_v62, %v10399_v43 }
 0x845   : > { %10679 = vst.msk [vmem:[%s18170_s27 + $0x80] sm:$0xff] %vm642_vm0, %v10647_v24  ;;  %v10557_v12 = vadd.f32 1.0, %v14801_v14  ;;  %14820 = vpow2.f32 %v11688_v49  ;;  %v18317_v42 = vadd.f32 %v18098_v62, %v10398_v18 }
 0x846   : > { %v14803_v41 = vpop.eup %14802  ;;  %14822 = vrcp.f32 %v10558_v13  ;;  %v11691_v28 = vmul.f32 -1.442695, %v18312_v38 }
 0x847   : > { %v14805_v57 = vpop.eup %14804  ;;  %14824 = vrcp.f32 %v10557_v12  ;;  %v10560_v9 = vadd.f32 1.0, %v14803_v41  ;;  %v11690_v10 = vmul.f32 -1.442695, %v18317_v42 }
 0x848   : > { %v14807_v55 = vpop.eup %14806  ;;  %v10559_v4 = vadd.f32 1.0, %v14805_v57  ;;  %14826 = vpow2.f32 %v11691_v28 }
 0x849   : > { %v14809_v54 = vpop.eup %14808  ;;  %v10650_v51 = vmul.f32 %v14807_v55, %v18218_v56  ;;  %14828 = vrcp.f32 %v10560_v9 }
 0x84a   : > { %v14811_v62 = vpop.eup %14810  ;;  %v10649_v59 = vmul.f32 %v14809_v54, %v18221_v5  ;;  %14830 = vrcp.f32 %v10559_v4 }
 0x84b   : > { %v14813_v7 = vpop.eup %14812  ;;  %10682 = vst.msk [vmem:[%s18170_s27 + $0x98] sm:$0xff] %vm642_vm0, %v10650_v51  ;;  %v10562_v37 = vadd.f32 1.0, %v14811_v62  ;;  %14832 = vpow2.f32 %v11690_v10 }
 0x84c   : > { %v14815_v6 = vpop.eup %14814  ;;  %10681 = vst.msk [vmem:[%s18170_s27 + $0x90] sm:$0xff] %vm642_vm0, %v10649_v59  ;;  %v10561_v30 = vadd.f32 1.0, %v14813_v7 }
 0x84d   : > { %v14817_v22 = vpop.eup %14816  ;;  %v10652_v17 = vmul.f32 %v14815_v6, %v18230_v35  ;;  %14834 = vrcp.f32 %v10562_v37 }
 0x84e   : > { %v14819_v56 = vpop.eup %14818  ;;  %v10651_v5 = vmul.f32 %v14817_v22, %v18235_v44  ;;  %14836 = vrcp.f32 %v10561_v30 }
 0x84f   : > { %v14821_v34 = vpop.eup %14820  ;;  %10684 = vst.msk [vmem:[%s18170_s27 + $0xa8] sm:$0xff] %vm642_vm0, %v10652_v17  ;;  %v10564_v58 = vadd.f32 1.0, %v14819_v56 }
 0x850   : > { %v14823_v63 = vpop.eup %14822  ;;  %10683 = vst.msk [vmem:[%s18170_s27 + $0xa0] sm:$0xff] %vm642_vm0, %v10651_v5  ;;  %v10563_v25 = vadd.f32 1.0, %v14821_v34 }
 0x851   : > { %v14825_v0 = vpop.eup %14824  ;;  %v10654_v2 = vmul.f32 %v14823_v63, %v18246_v60  ;;  %14838 = vrcp.f32 %v10564_v58 }
 0x852   : > { %v14827_v35 = vpop.eup %14826  ;;  %v10653_v20 = vmul.f32 %v14825_v0, %v18251_v50  ;;  %14840 = vrcp.f32 %v10563_v25 }
 0x853   : > { %v14829_v44 = vpop.eup %14828  ;;  %10686 = vst.msk [vmem:[%s18170_s27 + $0xb8] sm:$0xff] %vm642_vm0, %v10654_v2  ;;  %v10566_v33 = vadd.f32 1.0, %v14827_v35 }
 0x854   : > { %v14831_v15 = vpop.eup %14830  ;;  %10685 = vst.msk [vmem:[%s18170_s27 + $0xb0] sm:$0xff] %vm642_vm0, %v10653_v20  ;;  %v10656_v16 = vmul.f32 %v14829_v44, %v18262_v36 }
 0x855   : > { %v14833_v19 = vpop.eup %14832  ;;  %v10655_v60 = vmul.f32 %v14831_v15, %v18267_v29  ;;  %14842 = vrcp.f32 %v10566_v33 }
 0x856   : > { %10688 = vst.msk [vmem:[%s18170_s27 + $0xc8] sm:$0xff] %vm642_vm0, %v10656_v16  ;;  %v10565_v50 = vadd.f32 1.0, %v14833_v19 }
 0x857   : > { %v14835_v39 = vpop.eup %14834  ;;  %10687 = vst.msk [vmem:[%s18170_s27 + $0xc0] sm:$0xff] %vm642_vm0, %v10655_v60 }
 0x858   : > { %v14837_v27 = vpop.eup %14836  ;;  %v10658_v46 = vmul.f32 %v14835_v39, %v18280_v23  ;;  %14844 = vrcp.f32 %v10565_v50 }
 0x859   : > { %v10657_v36 = vmul.f32 %v14837_v27, %v18285_v8 }
 0x85a   : > { %10690 = vst.msk [vmem:[%s18170_s27 + $0xd8] sm:$0xff] %vm642_vm0, %v10658_v46 }
 0x85b   : > { %v14839_v29 = vpop.eup %14838  ;;  %10689 = vst.msk [vmem:[%s18170_s27 + $0xd0] sm:$0xff] %vm642_vm0, %v10657_v36 }
 0x85c   : > { %v14841_v40 = vpop.eup %14840  ;;  %v10660_v21 = vmul.f32 %v14839_v29, %v18296_v53 }
 0x85d   : > { %v10659_v31 = vmul.f32 %v14841_v40, %v18301_v26 }
 0x85e   : > { %10692 = vst.msk [vmem:[%s18170_s27 + $0xe8] sm:$0xff] %vm642_vm0, %v10660_v21 }
 0x85f   : > { %v14843_v3 = vpop.eup %14842  ;;  %10691 = vst.msk [vmem:[%s18170_s27 + $0xe0] sm:$0xff] %vm642_vm0, %v10659_v31 }
 0x860   : > { %v10662_v23 = vmul.f32 %v14843_v3, %v18312_v38 }
 0x862   : > { %v14845_v1 = vpop.eup %14844  ;;  %10694 = vst.msk [vmem:[%s18170_s27 + $0xf8] sm:$0xff] %vm642_vm0, %v10662_v23 }
 0x863   : > { %v10661_v8 = vmul.f32 %v14845_v1, %v18317_v42 }
 0x865   : > { %10693 = vst.msk [vmem:[%s18170_s27 + $0xf0] sm:$0xff] %vm642_vm0, %v10661_v8 }
 0x866 PF: > { %s26_s21 = sadd.s32 1, %s14852_s21  }
 0x867   : > { %p23_p4 = scmp.ge.s32.totalorder %s26_s21, 4  }
 0x869   :  { %25 = sbr.rel (!%p23_p4) target bundleno = 2 (0x2), region = 138 }

</bundles_post_ra>
